<compile_context>
chip_gen: v7x
topology: tpu7x:2x2x1
jax: 0.10.0
libtpu: 0.0.40
codegen_flags: <defaults>
</compile_context>

<pallas_src>
import functools

import jax
import jax.numpy as jnp
from jax.experimental import pallas as pl
from jax.experimental.pallas import tpu as pltpu

BN_EPS = 1e-5


def _round_up(x, m):
    return (x + m - 1) // m * m


def _bn_train_per_view(h, gamma, beta, views, batch):
    """BatchNorm1d training-mode forward; batch statistics computed
    independently per view (h is the view-collapsed [V*B, dim] activation)."""
    hv = h.reshape(views, batch, h.shape[-1])
    mean = jnp.mean(hv, axis=1, keepdims=True)
    d = hv - mean
    var = jnp.mean(d * d, axis=1, keepdims=True)
    out = gamma * d * jax.lax.rsqrt(var + BN_EPS) + beta
    return out.reshape(h.shape)


def nnclr_kernel(
    x_ref,    # [V*B, C, H*W]   f32   both views, spatial axis lane-dense
    wb_ref,   # [C, F]          f32 (small C) / bf16 (large C)  backbone linear
    w1p_ref,  # [F, PH+QH]      bf16  fused layer-1: proj l1 | pred l1
    w2p_ref,  # [PH+QH, PH+D]   bf16  fused layer-2: block-diag [[w2,0],[0,wp2]]
    w3_ref,   # [PH, D]         bf16  proj l3
    vec_ref,  # [10, P]         f32   packed bias / gamma / beta rows
    out_ref,  # [V*B, OUT_PAD]  f32   lane-dense [f | z | p | pad] slab
    *, views, batch, channels, num_ftrs, proj_h, pred_h, out_dim, out_pad,
):
    vb = views * batch
    phqh = proj_h + pred_h
    vecs = vec_ref[...]

    # --- backbone: global average pool over the lane-dense spatial axis ---
    pooled = jnp.mean(x_ref[...], axis=-1)                      # [V*B, C] f32

    # --- backbone: Linear + ReLU -> features f (before the heads) ---
    wb = wb_ref[...]
    if channels <= 16:
        # K is tiny: unrolled VPU broadcast-MAC in f32 (no bf16 pack, no MXU).
        f = pooled[:, 0:1] * wb[0:1, :]
        for c in range(1, channels):
            f = f + pooled[:, c:c + 1] * wb[c:c + 1, :]
    else:
        f = jnp.dot(pooled.astype(jnp.bfloat16), wb.astype(jnp.bfloat16),
                    preferred_element_type=jnp.float32)
    f = jnp.maximum(f + vecs[0:1, :num_ftrs], 0.0)               # [V*B, F]

    # --- fused layer 1 of projection + prediction heads (shared input f) ---
    h = jnp.dot(f.astype(jnp.bfloat16), w1p_ref[...],
                preferred_element_type=jnp.float32)
    h = h + vecs[1:2, :phqh]
    h = jnp.maximum(
        _bn_train_per_view(h, vecs[2:3, :phqh], vecs[3:4, :phqh], views, batch),
        0.0)                                                     # [V*B, PH+QH]

    # --- fused layer 2: block-diagonal [[w2,0],[0,wp2]], one K=PH+QH pass ---
    hz = jnp.dot(h.astype(jnp.bfloat16), w2p_ref[...],
                 preferred_element_type=jnp.float32)
    hz = hz + vecs[4:5, :proj_h + out_dim]                       # [V*B, PH+D]
    p = hz[:, proj_h:proj_h + out_dim]                           # pred head out
    h2 = jnp.maximum(
        _bn_train_per_view(hz[:, :proj_h], vecs[5:6, :proj_h],
                           vecs[6:7, :proj_h], views, batch), 0.0)

    # --- projection head layer 3: Linear -> BN (no ReLU) ---
    z = jnp.dot(h2.astype(jnp.bfloat16), w3_ref[...],
                preferred_element_type=jnp.float32)
    z = z + vecs[7:8, :out_dim]
    z = _bn_train_per_view(z, vecs[8:9, :out_dim], vecs[9:10, :out_dim],
                           views, batch)

    # --- single lane-dense store: [f | z | p | zero-pad] ---
    parts = [f, z, p]
    pad = out_pad - (num_ftrs + 2 * out_dim)
    if pad > 0:
        parts.append(jnp.zeros((vb, pad), jnp.float32))
    out_ref[...] = jnp.concatenate(parts, axis=-1)


def init_params(key, channels, num_ftrs, proj_hidden, pred_hidden, out_dim):
    """Deterministic synthetic parameters (matches module shapes, not a checkpoint)."""
    ks = jax.random.split(key, 8)

    def lin(k, fan_in, fan_out):
        scale = 1.0 / jnp.sqrt(jnp.float32(fan_in))
        w = jax.random.normal(k, (fan_in, fan_out), jnp.float32) * scale
        b = jnp.zeros((1, fan_out), jnp.float32)
        return w, b

    def bn(dim):
        return jnp.ones((1, dim), jnp.float32), jnp.zeros((1, dim), jnp.float32)

    wb, bb = lin(ks[0], channels, num_ftrs)
    w1, b1 = lin(ks[1], num_ftrs, proj_hidden)
    g1, be1 = bn(proj_hidden)
    w2, b2 = lin(ks[2], proj_hidden, proj_hidden)
    g2, be2 = bn(proj_hidden)
    w3, b3 = lin(ks[3], proj_hidden, out_dim)
    g3, be3 = bn(out_dim)
    wp1, bp1 = lin(ks[4], num_ftrs, pred_hidden)
    gp1, bep1 = bn(pred_hidden)
    wp2, bp2 = lin(ks[5], pred_hidden, out_dim)

    return (wb, bb,
            w1, b1, g1, be1,
            w2, b2, g2, be2,
            w3, b3, g3, be3,
            wp1, bp1, gp1, bep1,
            wp2, bp2)


def pack_params(params):
    """Fuse l1(proj|pred) and block-diag l2(proj|pred) weights, cast to bf16,
    pack all bias / gamma / beta vectors into one [10, P] f32 array."""
    (wb, bb,
     w1, b1, g1, be1,
     w2, b2, g2, be2,
     w3, b3, g3, be3,
     wp1, bp1, gp1, bep1,
     wp2, bp2) = params

    channels, num_ftrs = wb.shape
    proj_h = w2.shape[0]
    pred_h = wp2.shape[0]
    out_dim = w3.shape[1]

    # Fused layer 1 (shared input f): [F, PH+QH].
    w1p = jnp.concatenate([w1, wp1], axis=1)
    b1p = jnp.concatenate([b1, bp1], axis=1)
    g1p = jnp.concatenate([g1, gp1], axis=1)
    be1p = jnp.concatenate([be1, bep1], axis=1)

    # Fused block-diagonal layer 2: [[w2, 0], [0, wp2]] -> [PH+QH, PH+D].
    w2p = jnp.zeros((proj_h + pred_h, proj_h + out_dim), jnp.float32)
    w2p = w2p.at[:proj_h, :proj_h].set(w2)
    w2p = w2p.at[proj_h:, proj_h:].set(wp2)
    b2p = jnp.concatenate([b2, bp2], axis=1)

    widths = (num_ftrs, proj_h + pred_h, proj_h + out_dim, proj_h, out_dim)
    P = _round_up(max(widths), 128)

    def row(v):
        return jnp.pad(v.reshape(1, -1), ((0, 0), (0, P - v.shape[-1])))

    vecs = jnp.concatenate([
        row(bb),                           # 0   backbone bias
        row(b1p), row(g1p), row(be1p),     # 1-3 fused layer-1 (proj | pred)
        row(b2p),                          # 4   fused layer-2 bias (proj | pred)
        row(g2), row(be2),                 # 5-6 proj layer-2 BN
        row(b3), row(g3), row(be3),        # 7-9 proj layer-3
    ], axis=0).astype(jnp.float32)

    bf = lambda w: w.astype(jnp.bfloat16)
    wb_packed = wb if channels <= 16 else bf(wb)   # tiny-K backbone stays f32
    return (wb_packed, bf(w1p), bf(w2p), bf(w3), vecs)


@functools.partial(jax.jit,
                   static_argnames=("num_ftrs", "proj_h", "pred_h", "out_dim"))
def _nnclr_views(x_views, packed, *, num_ftrs, proj_h, pred_h, out_dim):
    """x_views: [V, B, C, H, W] -> (z, p, f) each with leading view axis V."""
    V, B, C, H, W = x_views.shape
    # Contiguous reshape only (no transpose); pooling happens inside the kernel.
    x_flat = x_views.astype(jnp.float32).reshape(V * B, C, H * W)

    wb, w1p, w2p, w3, vecs = packed
    out_pad = _round_up(num_ftrs + 2 * out_dim, 128)

    kernel = functools.partial(
        nnclr_kernel, views=V, batch=B, channels=C,
        num_ftrs=num_ftrs, proj_h=proj_h, pred_h=pred_h,
        out_dim=out_dim, out_pad=out_pad)

    # VMEM budget from actual buffer sizes (single invocation, no double
    # buffering), clamped below v7x's 64 MiB per-TC capacity.
    def nbytes(a):
        return a.size * a.dtype.itemsize

    buf_bytes = (nbytes(x_flat) + sum(nbytes(a) for a in packed)
                 + V * B * out_pad * 4)
    vmem_limit = int(min(48 * 1024 * 1024,
                         max(16 * 1024 * 1024, 4 * buf_bytes)))

    vmem = pl.BlockSpec(memory_space=pltpu.MemorySpace.VMEM)
    out = pl.pallas_call(
        kernel,
        out_shape=jax.ShapeDtypeStruct((V * B, out_pad), jnp.float32),
        in_specs=[vmem] * 6,
        out_specs=vmem,
        compiler_params=pltpu.CompilerParams(vmem_limit_bytes=vmem_limit),
    )(x_flat, wb, w1p, w2p, w3, vecs)

    out = out.reshape(V, B, out_pad)
    f = out[:, :, :num_ftrs]
    z = out[:, :, num_ftrs:num_ftrs + out_dim]
    p = out[:, :, num_ftrs + out_dim:num_ftrs + 2 * out_dim]
    return z, p, f


def nnclr_forward(packed, dims, x0, x1=None, return_features=False):
    """Mirrors NNCLR.forward: returns (z, p) per view; optionally (out, f)."""
    num_ftrs, proj_h, pred_h, out_dim = dims
    assert x0.shape[0] > 1, "BatchNorm1d training-mode forward needs batch > 1"
    xs = x0[None] if x1 is None else jnp.stack([x0, x1], axis=0)
    z, p, f = _nnclr_views(xs, packed, num_ftrs=num_ftrs, proj_h=proj_h,
                           pred_h=pred_h, out_dim=out_dim)

    def view(i):
        out = (z[i], p[i])
        return (out, f[i]) if return_features else out

    if x1 is None:
        return view(0)
    return view(0), view(1)


# TODO(synk): nn.BatchNorm1d running_mean / running_var EMA updates (stateful
# side effect) are not modeled; normalization math matches training-mode forward.


if __name__ == "__main__":
    # Small, module-consistent shapes.
    B, C, H, W = 8, 4, 16, 16
    NUM_FTRS, PROJ_H, PRED_H, OUT_DIM = 32, 64, 64, 32

    key = jax.random.PRNGKey(0)
    k_x0, k_x1, k_p = jax.random.split(key, 3)
    x0 = jax.random.normal(k_x0, (B, C, H, W), jnp.float32)
    x1 = jax.random.normal(k_x1, (B, C, H, W), jnp.float32)

    raw_params = init_params(k_p, C, NUM_FTRS, PROJ_H, PRED_H, OUT_DIM)
    packed = pack_params(raw_params)
    dims = (NUM_FTRS, PROJ_H, PRED_H, OUT_DIM)

    (out0, f0), (out1, f1) = nnclr_forward(
        packed, dims, x0, x1, return_features=True)
    z0, p0 = out0
    z1, p1 = out1
    jax.block_until_ready((z0, p0, f0, z1, p1, f1))

    assert z0.shape == (B, OUT_DIM) and p0.shape == (B, OUT_DIM)
    assert f0.shape == (B, NUM_FTRS)
    assert z1.shape == (B, OUT_DIM) and p1.shape == (B, OUT_DIM)
    assert f1.shape == (B, NUM_FTRS)

    # Single-view path (x1=None), as in the PyTorch forward.
    z_s, p_s = nnclr_forward(packed, dims, x0)
    jax.block_until_ready((z_s, p_s))
    assert z_s.shape == (B, OUT_DIM) and p_s.shape == (B, OUT_DIM)

    print("KERNEL_OK")
</pallas_src>

<mosaic_0001>
module attributes {stable_mosaic.version = 11 : i64} {
  func.func @nnclr_kernel(%arg0: memref<16x4x256xf32, #tpu.memory_space<vmem>>, %arg1: memref<4x32xf32, #tpu.memory_space<vmem>>, %arg2: memref<32x128xbf16, #tpu.memory_space<vmem>>, %arg3: memref<128x96xbf16, #tpu.memory_space<vmem>>, %arg4: memref<64x32xbf16, #tpu.memory_space<vmem>>, %arg5: memref<10x128xf32, #tpu.memory_space<vmem>>, %arg6: memref<16x128xf32, #tpu.memory_space<vmem>>) attributes {dimension_semantics = [], scalar_prefetch = 0 : i64, scratch_operands = 0 : i64, tpu.core_type = #tpu.core_type<tc>} {
    %c0 = arith.constant 0 : index
    %c0_0 = arith.constant 0 : index
    %0 = vector.load %arg5[%c0, %c0_0] : memref<10x128xf32, #tpu.memory_space<vmem>>, vector<10x128xf32>
    %c0_1 = arith.constant 0 : index
    %c0_2 = arith.constant 0 : index
    %c0_3 = arith.constant 0 : index
    %1 = vector.load %arg0[%c0_1, %c0_2, %c0_3] : memref<16x4x256xf32, #tpu.memory_space<vmem>>, vector<16x4x256xf32>
    %cst = arith.constant dense<0.000000e+00> : vector<16x4xf32>
    %2 = vector.multi_reduction <add>, %1, %cst [2] : vector<16x4x256xf32> to vector<16x4xf32>
    %cst_4 = arith.constant 2.560000e+02 : f32
    %3 = vector.broadcast %cst_4 : f32 to vector<16x4xf32>
    %4 = arith.divf %2, %3 : vector<16x4xf32>
    %c0_5 = arith.constant 0 : index
    %c0_6 = arith.constant 0 : index
    %5 = vector.load %arg1[%c0_5, %c0_6] : memref<4x32xf32, #tpu.memory_space<vmem>>, vector<4x32xf32>
    %6 = vector.extract_strided_slice %4 {offsets = [0, 0], sizes = [16, 1], strides = [1, 1]} : vector<16x4xf32> to vector<16x1xf32>
    %7 = vector.extract_strided_slice %5 {offsets = [0, 0], sizes = [1, 32], strides = [1, 1]} : vector<4x32xf32> to vector<1x32xf32>
    %8 = vector.broadcast %6 : vector<16x1xf32> to vector<16x32xf32>
    %9 = vector.broadcast %7 : vector<1x32xf32> to vector<16x32xf32>
    %10 = arith.mulf %8, %9 : vector<16x32xf32>
    %11 = vector.extract_strided_slice %4 {offsets = [0, 1], sizes = [16, 1], strides = [1, 1]} : vector<16x4xf32> to vector<16x1xf32>
    %12 = vector.extract_strided_slice %5 {offsets = [1, 0], sizes = [1, 32], strides = [1, 1]} : vector<4x32xf32> to vector<1x32xf32>
    %13 = vector.broadcast %11 : vector<16x1xf32> to vector<16x32xf32>
    %14 = vector.broadcast %12 : vector<1x32xf32> to vector<16x32xf32>
    %15 = arith.mulf %13, %14 : vector<16x32xf32>
    %16 = arith.addf %10, %15 : vector<16x32xf32>
    %17 = vector.extract_strided_slice %4 {offsets = [0, 2], sizes = [16, 1], strides = [1, 1]} : vector<16x4xf32> to vector<16x1xf32>
    %18 = vector.extract_strided_slice %5 {offsets = [2, 0], sizes = [1, 32], strides = [1, 1]} : vector<4x32xf32> to vector<1x32xf32>
    %19 = vector.broadcast %17 : vector<16x1xf32> to vector<16x32xf32>
    %20 = vector.broadcast %18 : vector<1x32xf32> to vector<16x32xf32>
    %21 = arith.mulf %19, %20 : vector<16x32xf32>
    %22 = arith.addf %16, %21 : vector<16x32xf32>
    %23 = vector.extract_strided_slice %4 {offsets = [0, 3], sizes = [16, 1], strides = [1, 1]} : vector<16x4xf32> to vector<16x1xf32>
    %24 = vector.extract_strided_slice %5 {offsets = [3, 0], sizes = [1, 32], strides = [1, 1]} : vector<4x32xf32> to vector<1x32xf32>
    %25 = vector.broadcast %23 : vector<16x1xf32> to vector<16x32xf32>
    %26 = vector.broadcast %24 : vector<1x32xf32> to vector<16x32xf32>
    %27 = arith.mulf %25, %26 : vector<16x32xf32>
    %28 = arith.addf %22, %27 : vector<16x32xf32>
    %29 = vector.extract_strided_slice %0 {offsets = [0, 0], sizes = [1, 32], strides = [1, 1]} : vector<10x128xf32> to vector<1x32xf32>
    %30 = vector.broadcast %29 : vector<1x32xf32> to vector<16x32xf32>
    %31 = arith.addf %28, %30 : vector<16x32xf32>
    %cst_7 = arith.constant 0.000000e+00 : f32
    %32 = vector.broadcast %cst_7 : f32 to vector<16x32xf32>
    %33 = arith.maximumf %31, %32 : vector<16x32xf32>
    %34 = arith.truncf %33 : vector<16x32xf32> to vector<16x32xbf16>
    %c0_8 = arith.constant 0 : index
    %c0_9 = arith.constant 0 : index
    %35 = vector.load %arg2[%c0_8, %c0_9] : memref<32x128xbf16, #tpu.memory_space<vmem>>, vector<32x128xbf16>
    %cst_10 = arith.constant dense<0.000000e+00> : vector<16x128xf32>
    %36 = tpu.matmul %34, %35, %cst_10 {dimension_numbers = #tpu.dot_dimension_numbers<[1], [0], [0], [1], [0, 0, 1, 1], [], []>} : vector<16x32xbf16>, vector<32x128xbf16>, vector<16x128xf32> -> vector<16x128xf32>
    %37 = vector.extract_strided_slice %0 {offsets = [1, 0], sizes = [1, 128], strides = [1, 1]} : vector<10x128xf32> to vector<1x128xf32>
    %38 = vector.broadcast %37 : vector<1x128xf32> to vector<16x128xf32>
    %39 = arith.addf %36, %38 : vector<16x128xf32>
    %40 = vector.extract_strided_slice %0 {offsets = [2, 0], sizes = [1, 128], strides = [1, 1]} : vector<10x128xf32> to vector<1x128xf32>
    %41 = vector.extract_strided_slice %0 {offsets = [3, 0], sizes = [1, 128], strides = [1, 1]} : vector<10x128xf32> to vector<1x128xf32>
    %42 = vector.shape_cast %39 : vector<16x128xf32> to vector<2x8x128xf32>
    %cst_11 = arith.constant dense<0.000000e+00> : vector<2x128xf32>
    %43 = vector.multi_reduction <add>, %42, %cst_11 [1] : vector<2x8x128xf32> to vector<2x128xf32>
    %44 = vector.shape_cast %43 : vector<2x128xf32> to vector<2x1x128xf32>
    %cst_12 = arith.constant 8.000000e+00 : f32
    %45 = vector.broadcast %cst_12 : f32 to vector<2x1x128xf32>
    %46 = arith.divf %44, %45 : vector<2x1x128xf32>
    %47 = vector.broadcast %46 : vector<2x1x128xf32> to vector<2x8x128xf32>
    %48 = arith.subf %42, %47 : vector<2x8x128xf32>
    %49 = arith.mulf %48, %48 : vector<2x8x128xf32>
    %cst_13 = arith.constant dense<0.000000e+00> : vector<2x128xf32>
    %50 = vector.multi_reduction <add>, %49, %cst_13 [1] : vector<2x8x128xf32> to vector<2x128xf32>
    %51 = vector.shape_cast %50 : vector<2x128xf32> to vector<2x1x128xf32>
    %cst_14 = arith.constant 8.000000e+00 : f32
    %52 = vector.broadcast %cst_14 : f32 to vector<2x1x128xf32>
    %53 = arith.divf %51, %52 : vector<2x1x128xf32>
    %54 = vector.shape_cast %40 : vector<1x128xf32> to vector<1x1x128xf32>
    %55 = vector.broadcast %54 : vector<1x1x128xf32> to vector<2x8x128xf32>
    %56 = arith.mulf %55, %48 : vector<2x8x128xf32>
    %cst_15 = arith.constant 9.99999974E-6 : f32
    %57 = vector.broadcast %cst_15 : f32 to vector<2x1x128xf32>
    %58 = arith.addf %53, %57 : vector<2x1x128xf32>
    %59 = math.rsqrt %58 : vector<2x1x128xf32>
    %60 = vector.broadcast %59 : vector<2x1x128xf32> to vector<2x8x128xf32>
    %61 = arith.mulf %56, %60 : vector<2x8x128xf32>
    %62 = vector.shape_cast %41 : vector<1x128xf32> to vector<1x1x128xf32>
    %63 = vector.broadcast %62 : vector<1x1x128xf32> to vector<2x8x128xf32>
    %64 = arith.addf %61, %63 : vector<2x8x128xf32>
    %65 = vector.shape_cast %64 : vector<2x8x128xf32> to vector<16x128xf32>
    %cst_16 = arith.constant 0.000000e+00 : f32
    %66 = vector.broadcast %cst_16 : f32 to vector<16x128xf32>
    %67 = arith.maximumf %65, %66 : vector<16x128xf32>
    %68 = arith.truncf %67 : vector<16x128xf32> to vector<16x128xbf16>
    %c0_17 = arith.constant 0 : index
    %c0_18 = arith.constant 0 : index
    %69 = vector.load %arg3[%c0_17, %c0_18] : memref<128x96xbf16, #tpu.memory_space<vmem>>, vector<128x96xbf16>
    %cst_19 = arith.constant dense<0.000000e+00> : vector<16x96xf32>
    %70 = tpu.matmul %68, %69, %cst_19 {dimension_numbers = #tpu.dot_dimension_numbers<[1], [0], [0], [1], [0, 0, 1, 1], [], []>} : vector<16x128xbf16>, vector<128x96xbf16>, vector<16x96xf32> -> vector<16x96xf32>
    %71 = vector.extract_strided_slice %0 {offsets = [4, 0], sizes = [1, 96], strides = [1, 1]} : vector<10x128xf32> to vector<1x96xf32>
    %72 = vector.broadcast %71 : vector<1x96xf32> to vector<16x96xf32>
    %73 = arith.addf %70, %72 : vector<16x96xf32>
    %74 = vector.extract_strided_slice %73 {offsets = [0, 64], sizes = [16, 32], strides = [1, 1]} : vector<16x96xf32> to vector<16x32xf32>
    %75 = vector.extract_strided_slice %73 {offsets = [0, 0], sizes = [16, 64], strides = [1, 1]} : vector<16x96xf32> to vector<16x64xf32>
    %76 = vector.extract_strided_slice %0 {offsets = [5, 0], sizes = [1, 64], strides = [1, 1]} : vector<10x128xf32> to vector<1x64xf32>
    %77 = vector.extract_strided_slice %0 {offsets = [6, 0], sizes = [1, 64], strides = [1, 1]} : vector<10x128xf32> to vector<1x64xf32>
    %78 = vector.shape_cast %75 : vector<16x64xf32> to vector<2x8x64xf32>
    %cst_20 = arith.constant dense<0.000000e+00> : vector<2x64xf32>
    %79 = vector.multi_reduction <add>, %78, %cst_20 [1] : vector<2x8x64xf32> to vector<2x64xf32>
    %80 = vector.shape_cast %79 : vector<2x64xf32> to vector<2x1x64xf32>
    %cst_21 = arith.constant 8.000000e+00 : f32
    %81 = vector.broadcast %cst_21 : f32 to vector<2x1x64xf32>
    %82 = arith.divf %80, %81 : vector<2x1x64xf32>
    %83 = vector.broadcast %82 : vector<2x1x64xf32> to vector<2x8x64xf32>
    %84 = arith.subf %78, %83 : vector<2x8x64xf32>
    %85 = arith.mulf %84, %84 : vector<2x8x64xf32>
    %cst_22 = arith.constant dense<0.000000e+00> : vector<2x64xf32>
    %86 = vector.multi_reduction <add>, %85, %cst_22 [1] : vector<2x8x64xf32> to vector<2x64xf32>
    %87 = vector.shape_cast %86 : vector<2x64xf32> to vector<2x1x64xf32>
    %cst_23 = arith.constant 8.000000e+00 : f32
    %88 = vector.broadcast %cst_23 : f32 to vector<2x1x64xf32>
    %89 = arith.divf %87, %88 : vector<2x1x64xf32>
    %90 = vector.shape_cast %76 : vector<1x64xf32> to vector<1x1x64xf32>
    %91 = vector.broadcast %90 : vector<1x1x64xf32> to vector<2x8x64xf32>
    %92 = arith.mulf %91, %84 : vector<2x8x64xf32>
    %cst_24 = arith.constant 9.99999974E-6 : f32
    %93 = vector.broadcast %cst_24 : f32 to vector<2x1x64xf32>
    %94 = arith.addf %89, %93 : vector<2x1x64xf32>
    %95 = math.rsqrt %94 : vector<2x1x64xf32>
    %96 = vector.broadcast %95 : vector<2x1x64xf32> to vector<2x8x64xf32>
    %97 = arith.mulf %92, %96 : vector<2x8x64xf32>
    %98 = vector.shape_cast %77 : vector<1x64xf32> to vector<1x1x64xf32>
    %99 = vector.broadcast %98 : vector<1x1x64xf32> to vector<2x8x64xf32>
    %100 = arith.addf %97, %99 : vector<2x8x64xf32>
    %101 = vector.shape_cast %100 : vector<2x8x64xf32> to vector<16x64xf32>
    %cst_25 = arith.constant 0.000000e+00 : f32
    %102 = vector.broadcast %cst_25 : f32 to vector<16x64xf32>
    %103 = arith.maximumf %101, %102 : vector<16x64xf32>
    %104 = arith.truncf %103 : vector<16x64xf32> to vector<16x64xbf16>
    %c0_26 = arith.constant 0 : index
    %c0_27 = arith.constant 0 : index
    %105 = vector.load %arg4[%c0_26, %c0_27] : memref<64x32xbf16, #tpu.memory_space<vmem>>, vector<64x32xbf16>
    %cst_28 = arith.constant dense<0.000000e+00> : vector<16x32xf32>
    %106 = tpu.matmul %104, %105, %cst_28 {dimension_numbers = #tpu.dot_dimension_numbers<[1], [0], [0], [1], [0, 0, 1, 1], [], []>} : vector<16x64xbf16>, vector<64x32xbf16>, vector<16x32xf32> -> vector<16x32xf32>
    %107 = vector.extract_strided_slice %0 {offsets = [7, 0], sizes = [1, 32], strides = [1, 1]} : vector<10x128xf32> to vector<1x32xf32>
    %108 = vector.broadcast %107 : vector<1x32xf32> to vector<16x32xf32>
    %109 = arith.addf %106, %108 : vector<16x32xf32>
    %110 = vector.extract_strided_slice %0 {offsets = [8, 0], sizes = [1, 32], strides = [1, 1]} : vector<10x128xf32> to vector<1x32xf32>
    %111 = vector.extract_strided_slice %0 {offsets = [9, 0], sizes = [1, 32], strides = [1, 1]} : vector<10x128xf32> to vector<1x32xf32>
    %112 = vector.shape_cast %109 : vector<16x32xf32> to vector<2x8x32xf32>
    %cst_29 = arith.constant dense<0.000000e+00> : vector<2x32xf32>
    %113 = vector.multi_reduction <add>, %112, %cst_29 [1] : vector<2x8x32xf32> to vector<2x32xf32>
    %114 = vector.shape_cast %113 : vector<2x32xf32> to vector<2x1x32xf32>
    %cst_30 = arith.constant 8.000000e+00 : f32
    %115 = vector.broadcast %cst_30 : f32 to vector<2x1x32xf32>
    %116 = arith.divf %114, %115 : vector<2x1x32xf32>
    %117 = vector.broadcast %116 : vector<2x1x32xf32> to vector<2x8x32xf32>
    %118 = arith.subf %112, %117 : vector<2x8x32xf32>
    %119 = arith.mulf %118, %118 : vector<2x8x32xf32>
    %cst_31 = arith.constant dense<0.000000e+00> : vector<2x32xf32>
    %120 = vector.multi_reduction <add>, %119, %cst_31 [1] : vector<2x8x32xf32> to vector<2x32xf32>
    %121 = vector.shape_cast %120 : vector<2x32xf32> to vector<2x1x32xf32>
    %cst_32 = arith.constant 8.000000e+00 : f32
    %122 = vector.broadcast %cst_32 : f32 to vector<2x1x32xf32>
    %123 = arith.divf %121, %122 : vector<2x1x32xf32>
    %124 = vector.shape_cast %110 : vector<1x32xf32> to vector<1x1x32xf32>
    %125 = vector.broadcast %124 : vector<1x1x32xf32> to vector<2x8x32xf32>
    %126 = arith.mulf %125, %118 : vector<2x8x32xf32>
    %cst_33 = arith.constant 9.99999974E-6 : f32
    %127 = vector.broadcast %cst_33 : f32 to vector<2x1x32xf32>
    %128 = arith.addf %123, %127 : vector<2x1x32xf32>
    %129 = math.rsqrt %128 : vector<2x1x32xf32>
    %130 = vector.broadcast %129 : vector<2x1x32xf32> to vector<2x8x32xf32>
    %131 = arith.mulf %126, %130 : vector<2x8x32xf32>
    %132 = vector.shape_cast %111 : vector<1x32xf32> to vector<1x1x32xf32>
    %133 = vector.broadcast %132 : vector<1x1x32xf32> to vector<2x8x32xf32>
    %134 = arith.addf %131, %133 : vector<2x8x32xf32>
    %135 = vector.shape_cast %134 : vector<2x8x32xf32> to vector<16x32xf32>
    %cst_34 = arith.constant 0.000000e+00 : f32
    %136 = vector.broadcast %cst_34 : f32 to vector<16x32xf32>
    %137 = tpu.concatenate %33, %135, %74, %136 in 1 : vector<16x32xf32>, vector<16x32xf32>, vector<16x32xf32>, vector<16x32xf32> -> vector<16x128xf32>
    %c0_35 = arith.constant 0 : index
    %c0_36 = arith.constant 0 : index
    %138 = vector.load %arg6[%c0_35, %c0_36] : memref<16x128xf32, #tpu.memory_space<vmem>>, vector<16x128xf32>
    tpu.vector_store %arg6[%c0_35, %c0_36], %137 {strides = array<i32>} : memref<16x128xf32, #tpu.memory_space<vmem>>, vector<16x128xf32>,
    return
  }
}

</mosaic_0001>

<bundles_post_ra>
// kernel: _nnclr_views.1
= control target key start
LH: loop header
LB: loop body
LE: loop exit
PB: predicated region body
PF: predicated region fallthrough
CT: control target
= control target key end

     0   :  { %vm90_vm0 = vcmask 1043456   ;;  %vm2936_vm1 = vmmov 0   ;;  %vm1480_vm2 = vcmask 130112   ;;  %vm1487_vm3 = vcmask 195712   ;;  %s2937_s10 = smov 32   ;;  %s5025_s0 = inlined_call_operand.vmem [shape: f32[16,4,256], index: 0, kind: input, shape index: {}]   ;;  %s5026_s1 = inlined_call_operand.vmem [shape: f32[4,32], index: 1, kind: input, shape index: {}]   ;;  %s5027_s5 = inlined_call_operand.vmem [shape: f32[10,128], index: 5, kind: input, shape index: {}]   ;;  %s5028_s2 = inlined_call_operand.vmem [shape: bf16[32,128], index: 2, kind: input, shape index: {}]   ;;  %s5029_s3 = inlined_call_operand.vmem [shape: bf16[128,96], index: 3, kind: input, shape index: {}]   ;;  %s5030_s4 = inlined_call_operand.vmem [shape: bf16[64,32], index: 4, kind: input, shape index: {}]   ;;  %s5031_s6 = inlined_call_operand.vmem [shape: f32[16,128], index: 6, kind: output, shape index: {}]  }
   0x1   :  { %v34_v0 = vld [vmem:[%s5025_s0 + $0x40] sm:$0xff]  ;;  %v35_v2 = vld [vmem:[%s5025_s0 + $0x48] sm:$0xff]  ;;  %v36_v8 = vld [vmem:[%s5025_s0 + $0x50] sm:$0xff]  ;;  %vm1494_vm4 = vcmask 261312   ;;  %vm1781_vm5 = vcmask 1041409   ;;  %vm1783_vm6 = vcmask 1042434  }
   0x2   :  { %v26_v1 = vld [vmem:[%s5025_s0] sm:$0xff]  ;;  %v66_v3 = vcombine.high %v34_v0, %v34_v0  ;;  %v131_v4 = vsel %vm90_vm0, %v34_v0, 0.0  ;;  %v27_v7 = vld [vmem:[%s5025_s0 + $0x8] sm:$0xff]  ;;  %v67_v9 = vcombine.high %v35_v2, %v35_v2  ;;  %v136_v10 = vsel %vm90_vm0, %v35_v2, 0.0  ;;  %v28_v12 = vld [vmem:[%s5025_s0 + $0x10] sm:$0xff] }
   0x3   :  { %v58_v5 = vcombine.high %v26_v1, %v26_v1  ;;  %v91_v6 = vsel %vm90_vm0, %v26_v1, 0.0  ;;  %v59_v11 = vcombine.high %v27_v7, %v27_v7  ;;  %v96_v15 = vsel %vm90_vm0, %v27_v7, 0.0  ;;  %v37_v21 = vld [vmem:[%s5025_s0 + $0x58] sm:$0xff]  ;;  %v38_v32 = vld [vmem:[%s5025_s0 + $0x60] sm:$0xff]  ;;  %v39_v42 = vld [vmem:[%s5025_s0 + $0x68] sm:$0xff] }
   0x4   :  { %v132_v13 = vsel %vm90_vm0, %v66_v3, 0.0  ;;  %v68_v16 = vcombine.high %v36_v8, %v36_v8  ;;  %v137_v19 = vsel %vm90_vm0, %v67_v9, 0.0  ;;  %v29_v22 = vld [vmem:[%s5025_s0 + $0x18] sm:$0xff]  ;;  %v60_v23 = vcombine.high %v28_v12, %v28_v12  ;;  %v30_v33 = vld [vmem:[%s5025_s0 + $0x20] sm:$0xff]  ;;  %v31_v43 = vld [vmem:[%s5025_s0 + $0x28] sm:$0xff] }
   0x5   :  { %v92_v14 = vsel %vm90_vm0, %v58_v5, 0.0  ;;  %v133_v17 = vadd.f32 %v132_v13, %v131_v4  ;;  %v97_v20 = vsel %vm90_vm0, %v59_v11, 0.0  ;;  %v138_v24 = vadd.f32 %v137_v19, %v136_v10  ;;  %v40_v52 = vld [vmem:[%s5025_s0 + $0x70] sm:$0xff]  ;;  %v41_v62 = vld [vmem:[%s5025_s0 + $0x78] sm:$0xff]  ;;  %v188_v19 = vld [vmem:[%s5026_s1] sm:$0xf] }
   0x6   :  { %v93_v18 = vadd.f32 %v92_v14, %v91_v6  ;;  %v98_v25 = vadd.f32 %v97_v20, %v96_v15  ;;  %v141_v26 = vsel %vm90_vm0, %v36_v8, 0.0  ;;  %v142_v27 = vsel %vm90_vm0, %v68_v16, 0.0  ;;  %v32_v53 = vld [vmem:[%s5025_s0 + $0x30] sm:$0xff]  ;;  %v33_v63 = vld [vmem:[%s5025_s0 + $0x38] sm:$0xff] }
   0x7   :  { %134 = vadd.xlane.f32.xlu1 %v133_v17  ;;  %v101_v28 = vsel %vm90_vm0, %v28_v12, 0.0  ;;  %v102_v29 = vsel %vm90_vm0, %v60_v23, 0.0  ;;  %v69_v30 = vcombine.high %v37_v21, %v37_v21  ;;  %v61_v31 = vcombine.high %v29_v22, %v29_v22 }
   0x8   :  { %94 = vadd.xlane.f32.xlu0 %v93_v18  ;;  %v143_v34 = vadd.f32 %v142_v27, %v141_v26  ;;  %v103_v35 = vadd.f32 %v102_v29, %v101_v28  ;;  %v146_v36 = vsel %vm90_vm0, %v37_v21, 0.0  ;;  %v70_v37 = vcombine.high %v38_v32, %v38_v32  ;;  %v24_v27 = vld [vmem:[%s5027_s5] sm:$0xff] }
   0x9   :  { %v147_v38 = vsel %vm90_vm0, %v69_v30, 0.0  ;;  %v106_v39 = vsel %vm90_vm0, %v29_v22, 0.0  ;;  %v107_v40 = vsel %vm90_vm0, %v61_v31, 0.0  ;;  %v62_v41 = vcombine.high %v30_v33, %v30_v33 }
   0xa   :  { %v148_v44 = vadd.f32 %v147_v38, %v146_v36  ;;  %v108_v45 = vadd.f32 %v107_v40, %v106_v39  ;;  %v151_v46 = vsel %vm90_vm0, %v38_v32, 0.0  ;;  %v152_v47 = vsel %vm90_vm0, %v70_v37, 0.0 }
   0xb   :  { %139 = vadd.xlane.f32.xlu1 %v138_v24  ;;  %v111_v48 = vsel %vm90_vm0, %v30_v33, 0.0  ;;  %v112_v49 = vsel %vm90_vm0, %v62_v41, 0.0  ;;  %v71_v50 = vcombine.high %v39_v42, %v39_v42  ;;  %v63_v51 = vcombine.high %v31_v43, %v31_v43 }
   0xc   :  { %99 = vadd.xlane.f32.xlu0 %v98_v25  ;;  %v153_v54 = vadd.f32 %v152_v47, %v151_v46  ;;  %v113_v55 = vadd.f32 %v112_v49, %v111_v48  ;;  %v156_v56 = vsel %vm90_vm0, %v39_v42, 0.0  ;;  %v116_v57 = vsel %vm90_vm0, %v31_v43, 0.0 }
   0xd   :  { %v157_v58 = vsel %vm90_vm0, %v71_v50, 0.0  ;;  %v117_v59 = vsel %vm90_vm0, %v63_v51, 0.0  ;;  %v72_v60 = vcombine.high %v40_v52, %v40_v52  ;;  %v64_v61 = vcombine.high %v32_v53, %v32_v53 }
   0xe   :  { %v158_v0 = vadd.f32 %v157_v58, %v156_v56  ;;  %v118_v1 = vadd.f32 %v117_v59, %v116_v57  ;;  %v161_v2 = vsel %vm90_vm0, %v40_v52, 0.0  ;;  %v121_v3 = vsel %vm90_vm0, %v32_v53, 0.0 }
   0xf   :  { %144 = vadd.xlane.f32.xlu1 %v143_v34  ;;  %v162_v4 = vsel %vm90_vm0, %v72_v60, 0.0  ;;  %v122_v5 = vsel %vm90_vm0, %v64_v61, 0.0  ;;  %v73_v6 = vcombine.high %v41_v62, %v41_v62  ;;  %v65_v7 = vcombine.high %v33_v63, %v33_v63 }
  0x10   :  { %104 = vadd.xlane.f32.xlu0 %v103_v35  ;;  %v163_v8 = vadd.f32 %v162_v4, %v161_v2  ;;  %v123_v9 = vadd.f32 %v122_v5, %v121_v3  ;;  %v166_v10 = vsel %vm90_vm0, %v41_v62, 0.0  ;;  %v126_v12 = vsel %vm90_vm0, %v33_v63, 0.0 }
  0x11   :  { %v167_v11 = vsel %vm90_vm0, %v73_v6, 0.0  ;;  %v127_v13 = vsel %vm90_vm0, %v65_v7, 0.0  ;;  %v5032_v16 = vlaneseq  ;;  %v2934_v29 = vmov 0  }
  0x12   :  { %v168_v14 = vadd.f32 %v167_v11, %v166_v10  ;;  %v128_v15 = vadd.f32 %v127_v13, %v126_v12  ;;  %2890 = vset.pattern.permute.xlu1 %v2934_v29  ;;  %2889 = vset.pattern.permute.xlu0 %v2934_v29  ;;  %vm1785_vm7 = vcmask 1043459   ;;  %vm1787_vm8 = vcmask 1044484  }
  0x13   :  { %149 = vadd.xlane.f32.xlu1 %v148_v44  ;;  %v3054_v17 = vshrl.u32 %v5032_v16, 7  ;;  %vm1789_vm9 = vcmask 1045509   ;;  %vm1791_vm10 = vcmask 1046534   ;;  %vm1793_vm11 = vcmask 1047559  }
  0x14   :  { %109 = vadd.xlane.f32.xlu0 %v108_v45  ;;  %vm1815_vm12 = vcmask 261120   ;;  %vm2023_vm13 = vcmask 523264   ;;  %vm2803_vm14 = vcmask 785408  }
  0x15   :  { %5197 = vst [vmem:[#allocation2_spill] sm:$0xff] %v3054_v17  ;;  %v3057_v18 = vsub.s32 0, %v3054_v17  ;;  %v3064_v21 = vsub.s32 1, %v3054_v17  ;;  %v3068_v23 = vsub.s32 2, %v3054_v17  ;;  %v3072_v25 = vsub.s32 3, %v3054_v17 }
  0x17   :  { %154 = vadd.xlane.f32.xlu1 %v153_v54  ;;  %5198 = vst [vmem:[#allocation3_spill] sm:$0xff] %v3057_v18  ;;  %v256_v20 = vrot.slane %v188_v19, %v3057_v18  ;;  %5199 = vst [vmem:[#allocation4_spill] sm:$0xff] %v3064_v21  ;;  %v408_v22 = vrot.slane %v188_v19, %v3064_v21  ;;  %v624_v24 = vrot.slane %v188_v19, %v3068_v23 }
  0x18   :  { %114 = vadd.xlane.f32.xlu0 %v113_v55  ;;  %5200 = vst [vmem:[#allocation5_spill] sm:$0xff] %v3068_v23  ;;  %5201 = vst [vmem:[#allocation6_spill] sm:$0xff] %v3072_v25  ;;  %v840_v26 = vrot.slane %v188_v19, %v3072_v25  ;;  %v992_v28 = vrot.slane %v24_v27, %v3057_v18 }
  0x1b   :  { %159 = vadd.xlane.f32.xlu1 %v158_v0 }
  0x1c   :  { %119 = vadd.xlane.f32.xlu0 %v118_v1 }
  0x1f   :  { %164 = vadd.xlane.f32.xlu1 %v163_v8 }
  0x20   :  { %124 = vadd.xlane.f32.xlu0 %v123_v9 }
  0x23   :  { %169 = vadd.xlane.f32.xlu1 %v168_v14 }
  0x24   :  { %129 = vadd.xlane.f32.xlu0 %v128_v15 }
  0x34   :  { %263 = vbcast.lane.b32.xlu1 %v256_v20, 264 }
  0x38   :  { %411 = vbcast.lane.b32.xlu1 %v408_v22, 256 }
  0x3a   :  { %259 = vbcast.lane.b32.xlu0 %v256_v20, 256 }
  0x3c   :  { %415 = vbcast.lane.b32.xlu1 %v408_v22, 264 }
  0x3e   :  { %267 = vbcast.lane.b32.xlu0 %v256_v20, 272 }
  0x40   :  { %271 = vbcast.lane.b32.xlu1 %v256_v20, 280 }
  0x42   :  { %419 = vbcast.lane.b32.xlu0 %v408_v22, 272 }
  0x44   :  { %423 = vbcast.lane.b32.xlu1 %v408_v22, 280 }
  0x46   :  { %627 = vbcast.lane.b32.xlu0 %v624_v24, 256 }
  0x48   :  { %631 = vbcast.lane.b32.xlu1 %v624_v24, 264 }
  0x4a   :  { %635 = vbcast.lane.b32.xlu0 %v624_v24, 272 }
  0x4c   :  { %639 = vbcast.lane.b32.xlu1 %v624_v24, 280 }
  0x4e   :  { %843 = vbcast.lane.b32.xlu0 %v840_v26, 256 }
  0x50   :  { %847 = vbcast.lane.b32.xlu1 %v840_v26, 264 }
  0x52   :  { %851 = vbcast.lane.b32.xlu0 %v840_v26, 272 }
  0x54   :  { %855 = vbcast.lane.b32.xlu1 %v840_v26, 280 }
  0x56   :  { %995 = vbcast.lane.b32.xlu0 %v992_v28, 256 }
  0x58   :  { %999 = vbcast.lane.b32.xlu1 %v992_v28, 264 }
  0x5a   :  { %1003 = vbcast.lane.b32.xlu0 %v992_v28, 272 }
  0x5c   :  { %1007 = vbcast.lane.b32.xlu1 %v992_v28, 280 }
  0x94   :  { %v135_v30 = vpop.xlane.xlu1 %134 }
  0x95   :  { %v95_v31 = vpop.xlane.xlu0 %94  ;;  %v180_v36 = vmul.f32 0.00390625, %v135_v30 }
  0x96   :  { %v172_v37 = vmul.f32 0.00390625, %v95_v31 }
  0x97   :  { %v3080_v42 = vrot.slane %v180_v36, %v3057_v18  ;;  %v3083_v43 = vrot.slane %v180_v36, %v3064_v21  ;;  %v3086_v44 = vrot.slane %v180_v36, %v3068_v23  ;;  %v3089_v45 = vrot.slane %v180_v36, %v3072_v25 }
  0x98   :  { %v140_v32 = vpop.xlane.xlu1 %139  ;;  %v3092_v46 = vrot.slane %v172_v37, %v3057_v18  ;;  %v3095_v47 = vrot.slane %v172_v37, %v3064_v21  ;;  %v3098_v48 = vrot.slane %v172_v37, %v3068_v23  ;;  %v3101_v52 = vrot.slane %v172_v37, %v3072_v25 }
  0x99   :  { %v100_v33 = vpop.xlane.xlu0 %99  ;;  %v181_v40 = vmul.f32 0.00390625, %v140_v32 }
  0x9a   :  { %v173_v41 = vmul.f32 0.00390625, %v100_v33 }
  0x9b   :  { %v3104_v53 = vrot.slane %v181_v40, %v3057_v18  ;;  %v3107_v54 = vrot.slane %v181_v40, %v3064_v21  ;;  %v3110_v56 = vrot.slane %v181_v40, %v3068_v23  ;;  %v3113_v57 = vrot.slane %v181_v40, %v3072_v25 }
  0x9c   :  { %v145_v34 = vpop.xlane.xlu1 %144  ;;  %v3116_v58 = vrot.slane %v173_v41, %v3057_v18  ;;  %v3119_v60 = vrot.slane %v173_v41, %v3064_v21  ;;  %v3122_v61 = vrot.slane %v173_v41, %v3068_v23  ;;  %v3125_v62 = vrot.slane %v173_v41, %v3072_v25 }
  0x9d   :  { %v105_v35 = vpop.xlane.xlu0 %104  ;;  %v182_v49 = vmul.f32 0.00390625, %v145_v34 }
  0x9e   :  { %v174_v55 = vmul.f32 0.00390625, %v105_v35 }
  0x9f   :  { %v3128_v0 = vrot.slane %v182_v49, %v3057_v18  ;;  %v3131_v1 = vrot.slane %v182_v49, %v3064_v21  ;;  %v3134_v2 = vrot.slane %v182_v49, %v3068_v23  ;;  %v3137_v3 = vrot.slane %v182_v49, %v3072_v25 }
  0xa0   :  { %v150_v38 = vpop.xlane.xlu1 %149  ;;  %v3140_v6 = vrot.slane %v174_v55, %v3057_v18  ;;  %v3143_v7 = vrot.slane %v174_v55, %v3064_v21  ;;  %v3146_v8 = vrot.slane %v174_v55, %v3068_v23  ;;  %v3149_v10 = vrot.slane %v174_v55, %v3072_v25 }
  0xa1   :  { %v110_v39 = vpop.xlane.xlu0 %109  ;;  %v183_v59 = vmul.f32 0.00390625, %v150_v38  ;;  %5202 = vst [vmem:[#allocation7_spill] sm:$0xff] %v3128_v0  ;;  %5203 = vst [vmem:[#allocation8_spill] sm:$0xff] %v3131_v1 }
  0xa2   :  { %v175_v63 = vmul.f32 0.00390625, %v110_v39  ;;  %5204 = vst [vmem:[#allocation9_spill] sm:$0xff] %v3140_v6  ;;  %5205 = vst [vmem:[#allocation10_spill] sm:$0xff] %v3143_v7 }
  0xa3   :  { %v3152_v11 = vrot.slane %v183_v59, %v3057_v18  ;;  %v3155_v12 = vrot.slane %v183_v59, %v3064_v21  ;;  %v3158_v14 = vrot.slane %v183_v59, %v3068_v23  ;;  %v3161_v15 = vrot.slane %v183_v59, %v3072_v25 }
  0xa4   :  { %v155_v50 = vpop.xlane.xlu1 %154  ;;  %v3164_v19 = vrot.slane %v175_v63, %v3057_v18  ;;  %v3167_v22 = vrot.slane %v175_v63, %v3064_v21  ;;  %v3170_v24 = vrot.slane %v175_v63, %v3068_v23  ;;  %v3173_v26 = vrot.slane %v175_v63, %v3072_v25 }
  0xa5   :  { %v115_v51 = vpop.xlane.xlu0 %114  ;;  %v184_v9 = vmul.f32 0.00390625, %v155_v50  ;;  %5206 = vst [vmem:[#allocation11_spill] sm:$0xff] %v3152_v11  ;;  %5207 = vst [vmem:[#allocation12_spill] sm:$0xff] %v3155_v12 }
  0xa6   :  { %v176_v13 = vmul.f32 0.00390625, %v115_v51  ;;  %5208 = vst [vmem:[#allocation13_spill] sm:$0xff] %v3158_v14  ;;  %5209 = vst [vmem:[#allocation14_spill] sm:$0xff] %v3161_v15 }
  0xa7   :  { %5210 = vst [vmem:[#allocation15_spill] sm:$0xff] %v3164_v19  ;;  %5211 = vst [vmem:[#allocation16_spill] sm:$0xff] %v3170_v24  ;;  %v3176_v30 = vrot.slane %v184_v9, %v3057_v18  ;;  %v3179_v31 = vrot.slane %v184_v9, %v3064_v21  ;;  %v3182_v32 = vrot.slane %v184_v9, %v3068_v23 }
  0xa8   :  { %v160_v4 = vpop.xlane.xlu1 %159  ;;  %5212 = vst [vmem:[#allocation17_spill] sm:$0xff] %v3173_v26  ;;  %v3185_v33 = vrot.slane %v184_v9, %v3072_v25  ;;  %v3188_v34 = vrot.slane %v176_v13, %v3057_v18  ;;  %v3191_v35 = vrot.slane %v176_v13, %v3064_v21  ;;  %v3194_v36 = vrot.slane %v176_v13, %v3068_v23 }
  0xa9   :  { %v120_v5 = vpop.xlane.xlu0 %119  ;;  %v185_v20 = vmul.f32 0.00390625, %v160_v4  ;;  %5213 = vst [vmem:[#allocation18_spill] sm:$0xff] %v3176_v30  ;;  %5214 = vst [vmem:[#allocation19_spill] sm:$0xff] %v3179_v31  ;;  %v3197_v38 = vrot.slane %v176_v13, %v3072_v25 }
  0xaa   :  { %v177_v27 = vmul.f32 0.00390625, %v120_v5  ;;  %5215 = vst [vmem:[#allocation20_spill] sm:$0xff] %v3182_v32  ;;  %5216 = vst [vmem:[#allocation21_spill] sm:$0xff] %v3185_v33 }
  0xab   :  { %5217 = vst [vmem:[#allocation22_spill] sm:$0xff] %v3188_v34  ;;  %5218 = vst [vmem:[#allocation23_spill] sm:$0xff] %v3191_v35  ;;  %v3200_v39 = vrot.slane %v185_v20, %v3057_v18  ;;  %v3203_v40 = vrot.slane %v185_v20, %v3064_v21  ;;  %v3206_v49 = vrot.slane %v185_v20, %v3068_v23 }
  0xac   :  { %v165_v28 = vpop.xlane.xlu1 %164  ;;  %5219 = vst [vmem:[#allocation24_spill] sm:$0xff] %v3194_v36  ;;  %5220 = vst [vmem:[#allocation25_spill] sm:$0xff] %v3197_v38  ;;  %v3209_v50 = vrot.slane %v185_v20, %v3072_v25  ;;  %v3212_v51 = vrot.slane %v177_v27, %v3057_v18  ;;  %v3215_v55 = vrot.slane %v177_v27, %v3064_v21 }
  0xad   :  { %v125_v29 = vpop.xlane.xlu0 %124  ;;  %v186_v37 = vmul.f32 0.00390625, %v165_v28  ;;  %5221 = vst [vmem:[#allocation26_spill] sm:$0xff] %v3200_v39  ;;  %5222 = vst [vmem:[#allocation27_spill] sm:$0xff] %v3203_v40  ;;  %v3218_v4 = vrot.slane %v177_v27, %v3068_v23  ;;  %v3221_v5 = vrot.slane %v177_v27, %v3072_v25 }
  0xae   :  { %v178_v41 = vmul.f32 0.00390625, %v125_v29  ;;  %5223 = vst [vmem:[#allocation28_spill] sm:$0xff] %v3206_v49  ;;  %5224 = vst [vmem:[#allocation29_spill] sm:$0xff] %v3209_v50 }
  0xaf   :  { %5225 = vst [vmem:[#allocation30_spill] sm:$0xff] %v3212_v51  ;;  %5226 = vst [vmem:[#allocation31_spill] sm:$0xff] %v3215_v55  ;;  %v3224_v28 = vrot.slane %v186_v37, %v3057_v18  ;;  %v3227_v20 = vrot.slane %v186_v37, %v3064_v21  ;;  %v3230_v29 = vrot.slane %v186_v37, %v3068_v23 }
  0xb0   :  { %v170_v59 = vpop.xlane.xlu1 %169  ;;  %5227 = vst [vmem:[#allocation32_spill] sm:$0xff] %v3218_v4  ;;  %5228 = vst [vmem:[#allocation33_spill] sm:$0xff] %v3221_v5  ;;  %v3233_v16 = vrot.slane %v186_v37, %v3072_v25  ;;  %v3236_v17 = vrot.slane %v178_v41, %v3057_v18  ;;  %v3239_v27 = vrot.slane %v178_v41, %v3064_v21 }
  0xb1   :  { %v130_v63 = vpop.xlane.xlu0 %129  ;;  %v187_v9 = vmul.f32 0.00390625, %v170_v59  ;;  %5229 = vst [vmem:[#allocation34_spill] sm:$0xff] %v3224_v28  ;;  %5230 = vst [vmem:[#allocation35_spill] sm:$0xff] %v3227_v20  ;;  %v3242_v59 = vrot.slane %v178_v41, %v3068_v23 }
  0xb2   :  { %v179_v13 = vmul.f32 0.00390625, %v130_v63  ;;  %5231 = vst [vmem:[#allocation36_spill] sm:$0xff] %v3230_v29  ;;  %5232 = vst [vmem:[#allocation37_spill] sm:$0xff] %v3233_v16  ;;  %v3245_v63 = vrot.slane %v178_v41, %v3072_v25 }
  0xb3   :  { %5233 = vst [vmem:[#allocation38_spill] sm:$0xff] %v3236_v17  ;;  %5234 = vst [vmem:[#allocation39_spill] sm:$0xff] %v3239_v27  ;;  %v3248_v20 = vrot.slane %v187_v9, %v3057_v18  ;;  %v3251_v29 = vrot.slane %v187_v9, %v3064_v21  ;;  %v3254_v37 = vrot.slane %v187_v9, %v3068_v23 }
  0xb4   :  { %5235 = vst [vmem:[#allocation40_spill] sm:$0xff] %v3242_v59  ;;  %5236 = vst [vmem:[#allocation41_spill] sm:$0xff] %v3245_v63  ;;  %v3257_v16 = vrot.slane %v187_v9, %v3072_v25  ;;  %v3259_v28 = vpop.permute.xlu1 %263  ;;  %v3264_v59 = vrot.slane %v179_v13, %v3057_v18  ;;  %v3267_v41 = vrot.slane %v179_v13, %v3064_v21 }
  0xb5   :  { %5237 = vst [vmem:[#allocation42_spill] sm:$0xff] %v3248_v20  ;;  %5238 = vst [vmem:[#allocation43_spill] sm:$0xff] %v3251_v29  ;;  %v3261_v27 = vpop.permute.xlu0 %259  ;;  %v3270_v20 = vrot.slane %v179_v13, %v3068_v23  ;;  %v3273_v29 = vrot.slane %v179_v13, %v3072_v25  ;;  %v282_v18 = vmul.f32 %v3259_v28, %v3116_v58 }
  0xb6   :  { %5239 = vst [vmem:[#allocation44_spill] sm:$0xff] %v3254_v37  ;;  %5240 = vst [vmem:[#allocation45_spill] sm:$0xff] %v3257_v16  ;;  %v277_v9 = vmul.f32 %v3261_v27, %v3092_v46  ;;  %v278_v16 = vmul.f32 %v3259_v28, %v3092_v46  ;;  %v281_v37 = vmul.f32 %v3261_v27, %v3116_v58 }
  0xb7   :  { %5241 = vst [vmem:[#allocation46_spill] sm:$0xff] %v3259_v28  ;;  %5242 = vst [vmem:[#allocation47_spill] sm:$0xff] %v3261_v27  ;;  %v309_v21 = vmul.f32 %v3261_v27, %v3080_v42  ;;  %v310_v23 = vmul.f32 %v3259_v28, %v3080_v42  ;;  %v313_v13 = vmul.f32 %v3261_v27, %v3104_v53 }
  0xb8   :  { %5243 = vst [vmem:[#allocation48_spill] sm:$0xff] %v3264_v59  ;;  %5244 = vst [vmem:[#allocation49_spill] sm:$0xff] %v3267_v41  ;;  %v314_v25 = vmul.f32 %v3259_v28, %v3104_v53  ;;  %v285_v41 = vmul.f32 %v3261_v27, %v3140_v6  ;;  %v286_v59 = vmul.f32 %v3259_v28, %v3140_v6 }
  0xb9   :  { %5245 = vst [vmem:[#allocation50_spill] sm:$0xff] %v3270_v20  ;;  %5246 = vst [vmem:[#allocation51_spill] sm:$0xff] %v3273_v29  ;;  %v3291_v29 = vpop.permute.xlu1 %411  ;;  %v3293_v20 = vpop.permute.xlu0 %267  ;;  %v3301_v63 = vmul.f32 %v3261_v27, %v3128_v0  ;;  %v3305_v17 = vmul.f32 %v3259_v28, %v3128_v0  ;;  %v3319_v4 = vmul.f32 %v3261_v27, %v3164_v19 }
  0xba   :  { %5247 = vst [vmem:[#allocation52_spill] sm:$0xff] %v3291_v29  ;;  %5248 = vst [vmem:[#allocation53_spill] sm:$0xff] %v3293_v20  ;;  %v429_v50 = vmul.f32 %v3291_v29, %v3095_v47  ;;  %v433_v49 = vmul.f32 %v3291_v29, %v3119_v60  ;;  %v461_v40 = vmul.f32 %v3291_v29, %v3083_v43 }
  0xbb   :  { %v465_v39 = vmul.f32 %v3291_v29, %v3107_v54  ;;  %v437_v5 = vmul.f32 %v3291_v29, %v3143_v7  ;;  %v3323_v55 = vmul.f32 %v3259_v28, %v3164_v19  ;;  %v3327_v51 = vmul.f32 %v3261_v27, %v3152_v11 }
  0xbc   :  { %v283_v33 = vmul.f32 %v3293_v20, %v3116_v58  ;;  %v279_v32 = vmul.f32 %v3293_v20, %v3092_v46  ;;  %v315_v31 = vmul.f32 %v3293_v20, %v3104_v53  ;;  %v3337_v30 = vmul.f32 %v3259_v28, %v3152_v11 }
  0xbd   :  { %5249 = vst [vmem:[#allocation54_spill] sm:$0xff] %v3323_v55  ;;  %5250 = vst [vmem:[#allocation55_spill] sm:$0xff] %v3327_v51  ;;  %v3339_v38 = vpop.permute.xlu1 %415  ;;  %v3341_v36 = vpop.permute.xlu0 %419  ;;  %v493_v35 = vadd.f32 %v429_v50, %v277_v9  ;;  %v497_v27 = vadd.f32 %v433_v49, %v281_v37  ;;  %v525_v34 = vadd.f32 %v461_v40, %v309_v21 }
  0xbe   :  { %5251 = vst [vmem:[#allocation56_spill] sm:$0xff] %v3337_v30  ;;  %v529_v19 = vadd.f32 %v465_v39, %v313_v13  ;;  %v430_v15 = vmul.f32 %v3339_v38, %v3095_v47  ;;  %v434_v14 = vmul.f32 %v3339_v38, %v3119_v60  ;;  %v462_v51 = vmul.f32 %v3339_v38, %v3083_v43 }
  0xbf   :  { %v466_v11 = vmul.f32 %v3339_v38, %v3107_v54  ;;  %v435_v28 = vmul.f32 %v3341_v36, %v3119_v60  ;;  %v431_v49 = vmul.f32 %v3341_v36, %v3095_v47  ;;  %v438_v21 = vmul.f32 %v3339_v38, %v3143_v7 }
  0xc0   :  { %v501_v39 = vadd.f32 %v437_v5, %v285_v41  ;;  %v467_v40 = vmul.f32 %v3341_v36, %v3107_v54  ;;  %v311_v50 = vmul.f32 %v3293_v20, %v3080_v42  ;;  %v3363_v37 = vmul.f32 %v3291_v29, %v3131_v1 }
  0xc1   :  { %v3367_v9 = vmul.f32 %v3291_v29, %v3167_v22  ;;  %v3369_v13 = vpop.permute.xlu1 %271  ;;  %v3371_v30 = vpop.permute.xlu0 %627  ;;  %v494_v12 = vadd.f32 %v430_v15, %v278_v16  ;;  %v498_v5 = vadd.f32 %v434_v14, %v282_v18  ;;  %v526_v41 = vadd.f32 %v462_v51, %v310_v23 }
  0xc2   :  { %v3373_v0 = vadd.f32 %v466_v11, %v314_v25  ;;  %v645_v7 = vmul.f32 %v3371_v30, %v3098_v48  ;;  %v649_v20 = vmul.f32 %v3371_v30, %v3122_v61  ;;  %v677_v6 = vmul.f32 %v3371_v30, %v3086_v44 }
  0xc3   :  { %v499_v29 = vadd.f32 %v435_v28, %v283_v33  ;;  %v681_v26 = vmul.f32 %v3371_v30, %v3110_v56  ;;  %v495_v55 = vadd.f32 %v431_v49, %v279_v32  ;;  %v3383_v24 = vadd.f32 %v438_v21, %v286_v59 }
  0xc4   :  { %v653_v16 = vmul.f32 %v3371_v30, %v3146_v8  ;;  %v284_v18 = vmul.f32 %v3369_v13, %v3116_v58  ;;  %v280_v23 = vmul.f32 %v3369_v13, %v3092_v46  ;;  %v316_v25 = vmul.f32 %v3369_v13, %v3104_v53 }
  0xc5   :  { %v531_v11 = vadd.f32 %v467_v40, %v315_v31  ;;  %v3393_v14 = vpop.permute.xlu1 %423  ;;  %v3395_v15 = vpop.permute.xlu0 %635  ;;  %v709_v32 = vadd.f32 %v645_v7, %v493_v35  ;;  %v713_v33 = vadd.f32 %v649_v20, %v497_v27  ;;  %v741_v51 = vadd.f32 %v677_v6, %v525_v34 }
  0xc6   :  { %5252 = vst [vmem:[#allocation57_spill] sm:$0xff] %v3393_v14  ;;  %5253 = vst [vmem:[#allocation58_spill] sm:$0xff] %v3395_v15  ;;  %v463_v28 = vmul.f32 %v3341_v36, %v3083_v43  ;;  %v436_v58 = vmul.f32 %v3393_v14, %v3119_v60  ;;  %v651_v46 = vmul.f32 %v3395_v15, %v3122_v61 }
  0xc7   :  { %v432_v53 = vmul.f32 %v3393_v14, %v3095_v47  ;;  %v647_v31 = vmul.f32 %v3395_v15, %v3098_v48  ;;  %v745_v59 = vadd.f32 %v681_v26, %v529_v19  ;;  %v717_v49 = vadd.f32 %v653_v16, %v501_v39 }
  0xc8   :  { %v468_v6 = vmul.f32 %v3393_v14, %v3107_v54  ;;  %v683_v7 = vmul.f32 %v3395_v15, %v3110_v56  ;;  %v312_v60 = vmul.f32 %v3369_v13, %v3080_v42  ;;  %v464_v34 = vmul.f32 %v3393_v14, %v3083_v43 }
  0xc9   :  { %v3415_v35 = vadd.f32 %v463_v28, %v311_v50  ;;  %v3419_v47 = vmul.f32 %v3339_v38, %v3131_v1  ;;  %v3421_v19 = vpop.permute.xlu1 %631  ;;  %v3423_v26 = vpop.permute.xlu0 %843  ;;  %v500_v54 = vadd.f32 %v436_v58, %v284_v18  ;;  %v715_v20 = vadd.f32 %v651_v46, %v499_v29 }
  0xca   :  { %v496_v27 = vadd.f32 %v432_v53, %v280_v23  ;;  %v711_v21 = vadd.f32 %v647_v31, %v495_v55  ;;  %v646_v42 = vmul.f32 %v3421_v19, %v3098_v48  ;;  %v861_v43 = vmul.f32 %v3423_v26, %v3101_v52 }
  0xcb   :  { %v650_v39 = vmul.f32 %v3421_v19, %v3122_v61  ;;  %v865_v40 = vmul.f32 %v3423_v26, %v3125_v62  ;;  %v678_v50 = vmul.f32 %v3421_v19, %v3086_v44  ;;  %v893_v29 = vmul.f32 %v3423_v26, %v3089_v45 }
  0xcc   :  { %v532_v16 = vadd.f32 %v468_v6, %v316_v25  ;;  %v747_v55 = vadd.f32 %v683_v7, %v531_v11  ;;  %v682_v18 = vmul.f32 %v3421_v19, %v3110_v56  ;;  %v897_v23 = vmul.f32 %v3423_v26, %v3113_v57 }
  0xcd   :  { %v3441_v28 = vadd.f32 %v464_v34, %v312_v60  ;;  %v3445_v58 = vmul.f32 %v3395_v15, %v3086_v44  ;;  %v3447_v46 = vpop.permute.xlu1 %639  ;;  %v3449_v53 = vpop.permute.xlu0 %851  ;;  %v710_v31 = vadd.f32 %v646_v42, %v494_v12  ;;  %v925_v1 = vadd.f32 %v861_v43, %v709_v32 }
  0xce   :  { %v714_v25 = vadd.f32 %v650_v39, %v498_v5  ;;  %v929_v11 = vadd.f32 %v865_v40, %v713_v33  ;;  %v652_v6 = vmul.f32 %v3447_v46, %v3122_v61  ;;  %v867_v7 = vmul.f32 %v3449_v53, %v3125_v62 }
  0xcf   :  { %v648_v60 = vmul.f32 %v3447_v46, %v3098_v48  ;;  %v863_v34 = vmul.f32 %v3449_v53, %v3101_v52  ;;  %v742_v15 = vadd.f32 %v678_v50, %v526_v41  ;;  %v957_v14 = vadd.f32 %v893_v29, %v741_v51 }
  0xd0   :  { %v654_v12 = vmul.f32 %v3421_v19, %v3146_v8  ;;  %v869_v5 = vmul.f32 %v3423_v26, %v3149_v10  ;;  %v746_v32 = vadd.f32 %v682_v18, %v3373_v0  ;;  %v961_v61 = vadd.f32 %v897_v23, %v745_v59 }
  0xd1   :  { %v684_v33 = vmul.f32 %v3447_v46, %v3110_v56  ;;  %v899_v48 = vmul.f32 %v3449_v53, %v3113_v57  ;;  %v3468_v42 = vpop.permute.xlu1 %847  ;;  %v3470_v43 = vpop.permute.xlu0 %995  ;;  %v716_v41 = vadd.f32 %v652_v6, %v500_v54  ;;  %v931_v51 = vadd.f32 %v867_v7, %v715_v20 }
  0xd2   :  { %v712_v39 = vadd.f32 %v648_v60, %v496_v27  ;;  %v927_v40 = vadd.f32 %v863_v34, %v711_v21  ;;  %v862_v50 = vmul.f32 %v3468_v42, %v3101_v52  ;;  %v3475_v0 = vadd.f32 %v3470_v43, %v925_v1 }
  0xd3   :  { %v866_v56 = vmul.f32 %v3468_v42, %v3125_v62  ;;  %v3480_v59 = vadd.f32 %v3470_v43, %v929_v11  ;;  %v894_v29 = vmul.f32 %v3468_v42, %v3089_v45  ;;  %v3485_v54 = vadd.f32 %v3470_v43, %v957_v14 }
  0xd4   :  { %v718_v20 = vadd.f32 %v654_v12, %v3383_v24  ;;  %v933_v27 = vadd.f32 %v869_v5, %v717_v49  ;;  %v898_v21 = vmul.f32 %v3468_v42, %v3113_v57  ;;  %v3491_v1 = vadd.f32 %v3470_v43, %v961_v61 }
  0xd5   :  { %5254 = vst [vmem:[#allocation59_spill] sm:$0xff] %v3485_v54  ;;  %v748_v18 = vadd.f32 %v684_v33, %v532_v16  ;;  %v963_v23 = vadd.f32 %v899_v48, %v747_v55  ;;  %v3493_v6 = vpop.permute.xlu1 %855  ;;  %v3495_v11 = vpop.permute.xlu0 %1003  ;;  %v926_v7 = vadd.f32 %v862_v50, %v710_v31  ;;  %v5106_v60 = vmax.f32 %v3475_v0, 0.0 }
  0xd6   :  { %5255 = vst [vmem:[#allocation60_spill] sm:$0xff] %v3491_v1  ;;  %v930_v14 = vadd.f32 %v866_v56, %v714_v25  ;;  %v5103_v34 = vmax.f32 %v3480_v59, 0.0  ;;  %v958_v24 = vadd.f32 %v894_v29, %v742_v15  ;;  %v868_v49 = vmul.f32 %v3493_v6, %v3125_v62 }
  0xd7   :  { %v3502_v12 = vadd.f32 %v3495_v11, %v931_v51  ;;  %v864_v16 = vmul.f32 %v3493_v6, %v3101_v52  ;;  %v5105_v55 = vmax.f32 %v3485_v54, 0.0  ;;  %v3508_v5 = vadd.f32 %v3495_v11, %v927_v40 }
  0xd8   :  { %v870_v31 = vmul.f32 %v3468_v42, %v3149_v10  ;;  %v3513_v25 = vadd.f32 %v3470_v43, %v933_v27  ;;  %v962_v15 = vadd.f32 %v898_v21, %v746_v32  ;;  %v5108_v62 = vmax.f32 %v3491_v1, 0.0 }
  0xd9   :  { %v900_v61 = vmul.f32 %v3493_v6, %v3113_v57  ;;  %v3519_v33 = vadd.f32 %v3495_v11, %v963_v23  ;;  %v3521_v52 = vpop.permute.xlu1 %999  ;;  %v932_v48 = vadd.f32 %v868_v49, %v716_v41  ;;  %v5112_v51 = vmax.f32 %v3502_v12, 0.0 }
  0xda   :  { %v928_v40 = vadd.f32 %v864_v16, %v712_v39  ;;  %v934_v50 = vadd.f32 %v870_v31, %v718_v20  ;;  %v3525_v56 = vadd.f32 %v3521_v52, %v926_v7  ;;  %v3528_v32 = vadd.f32 %v3521_v52, %v930_v14 }
  0xdb   :  { %5256 = vst [vmem:[#allocation61_spill] sm:$0xff] %v3519_v33  ;;  %v3531_v29 = vadd.f32 %v3521_v52, %v958_v24  ;;  %v3534_v57 = vadd.f32 %v3521_v52, %v962_v15  ;;  %v5110_v39 = vmax.f32 %v3513_v25, 0.0  ;;  %v680_v20 = vmul.f32 %v3447_v46, %v3086_v44 }
  0xdc   :  { %v3538_v41 = vadd.f32 %v3521_v52, %v934_v50  ;;  %v5101_v21 = vmax.f32 %v3525_v56, 0.0  ;;  %v5102_v23 = vmax.f32 %v3528_v32, 0.0  ;;  %v964_v16 = vadd.f32 %v900_v61, %v748_v18 }
  0xdd   :  { %5257 = vst [vmem:[#allocation62_spill] sm:$0xff] %v3531_v29  ;;  %5258 = vst [vmem:[#allocation63_spill] sm:$0xff] %v3534_v57  ;;  %v5104_v7 = vmax.f32 %v3531_v29, 0.0  ;;  %v5107_v14 = vmax.f32 %v3534_v57, 0.0  ;;  %v3547_v24 = vpop.permute.xlu1 %1007  ;;  %v743_v31 = vadd.f32 %v3445_v58, %v3415_v35  ;;  %v895_v15 = vmul.f32 %v3449_v53, %v3089_v45  ;;  %v5276_v57 = vld [vmem:[#allocation58_spill] sm:$0xff] }
  0xde   :  { %5259 = vst [vmem:[#allocation64_spill] sm:$0xff] %v3538_v41  ;;  %v5109_v49 = vmax.f32 %v3538_v41, 0.0  ;;  %v1141_v44 = vpack.c.bf16 %v5101_v21, %v5106_v60  ;;  %v1143_v50 = vpack.c.bf16 %v5102_v23, %v5103_v34  ;;  %v896_v35 = vmul.f32 %v3493_v6, %v3089_v45 }
  0xdf   :  { %v1157_v18 = vpack.c.bf16 %v5104_v7, %v5105_v55  ;;  %v3572_v58 = vpack.c.bf16 %v5107_v14, %v5108_v62  ;;  %v3575_v61 = vadd.f32 %v3547_v24, %v932_v48  ;;  %v3578_v21 = vadd.f32 %v3547_v24, %v928_v40 }
  0xe0   :  { %v3581_v23 = vadd.f32 %v3547_v24, %v964_v16  ;;  %v1214_v34 = vunpack.c.h.b16 %v1141_v44  ;;  %v1213_v7 = vunpack.c.l.b16 %v1141_v44  ;;  %v744_v45 = vadd.f32 %v680_v20, %v3441_v28 }
  0xe1   :  { %v1217_v60 = vunpack.c.l.b16 %v1143_v50  ;;  %v1218_v27 = vunpack.c.h.b16 %v1143_v50  ;;  %v3589_v48 = vpack.c.bf16 %v5109_v49, %v5110_v39  ;;  %v959_v14 = vadd.f32 %v895_v15, %v743_v31 }
  0xe2   :  { %5260 = vst [vmem:[#allocation65_spill] sm:$0xff] %v3581_v23  ;;  %1281 = vperm.xlu1 %2890, %v1214_v34   ;;  %1278 = vperm.xlu0 %2889, %v1213_v7   ;;  %v1245_v40 = vunpack.c.l.b16 %v1157_v18  ;;  %v1246_v16 = vunpack.c.h.b16 %v1157_v18  ;;  %v5111_v62 = vmax.f32 %v3575_v61, 0.0  ;;  %v5114_v44 = vmax.f32 %v3578_v21, 0.0 }
  0xe3   :  { %v1249_v55 = vunpack.c.l.b16 %v3572_v58  ;;  %v5113_v28 = vmax.f32 %v3581_v23, 0.0  ;;  %v960_v20 = vadd.f32 %v896_v35, %v744_v45  ;;  %v3596_v50 = vadd.f32 %v3495_v11, %v959_v14  ;;  %v5265_v45 = vld [vmem:[#allocation16_spill] sm:$0xff] }
  0xe4   :  { %v1250_v49 = vunpack.c.h.b16 %v3572_v58  ;;  %v3603_v34 = vpack.c.bf16 %v5111_v62, %v5112_v51  ;;  %v5262_v7 = vmax.f32 %v3508_v5, 0.0  ;;  %v685_v15 = vmul.f32 %v3371_v30, %v3134_v2 }
  0xe5   :  { %5261 = vst [vmem:[#allocation66_spill] sm:$0xff] %v3596_v50  ;;  %v3614_v14 = vadd.f32 %v3547_v24, %v960_v20  ;;  %v533_v18 = vadd.f32 %v3363_v37, %v3301_v63  ;;  %v534_v35 = vadd.f32 %v3419_v47, %v3305_v17  ;;  %v686_v58 = vmul.f32 %v3421_v19, %v3134_v2 }
  0xe6   :  { %v3609_v31 = vpack.c.bf16 %v5114_v44, %v5262_v7  ;;  %1290 = vperm.xlu1 %2890, %v1217_v60   ;;  %1293 = vperm.xlu0 %2889, %v1218_v27   ;;  %v5264_v39 = vmax.f32 %v3519_v33, 0.0  ;;  %v901_v63 = vmul.f32 %v3423_v26, %v3137_v3  ;;  %v902_v60 = vmul.f32 %v3468_v42, %v3137_v3 }
  0xe7   :  { %5263 = vst [vmem:[#allocation67_spill] sm:$0xff] %v3614_v14  ;;  %v749_v37 = vadd.f32 %v685_v15, %v533_v18  ;;  %v750_v47 = vadd.f32 %v686_v58, %v534_v35  ;;  %v1219_v27 = vunpack.c.l.b16 %v3603_v34  ;;  %v505_v7 = vadd.f32 %v3367_v9, %v3319_v4  ;;  %v5266_v58 = vld [vmem:[#allocation54_spill] sm:$0xff]  ;;  %v5269_v9 = vld [vmem:[#allocation17_spill] sm:$0xff] }
  0xe8   :  { %v3628_v20 = vpack.c.bf16 %v5113_v28, %v5264_v39  ;;  %v1215_v62 = vunpack.c.l.b16 %v3609_v31  ;;  %v442_v39 = vmul.f32 %v3339_v38, %v3167_v22  ;;  %v657_v15 = vmul.f32 %v3371_v30, %v5265_v45  ;;  %v5272_v35 = vld [vmem:[#allocation9_spill] sm:$0xff] }
  0xe9   :  { %v965_v28 = vadd.f32 %v901_v63, %v749_v37  ;;  %v966_v44 = vadd.f32 %v902_v60, %v750_v47  ;;  %v658_v51 = vmul.f32 %v3421_v19, %v5265_v45  ;;  %v5271_v47 = vmax.f32 %v3614_v14, 0.0 }
  0xea   :  { %1374 = vperm.xlu1 %2890, %v1245_v40   ;;  %1377 = vperm.xlu0 %2889, %v1246_v16   ;;  %v506_v17 = vadd.f32 %v442_v39, %v5266_v58  ;;  %v721_v4 = vadd.f32 %v657_v15, %v505_v7  ;;  %v873_v40 = vmul.f32 %v3423_v26, %v5269_v9  ;;  %v5270_v16 = vmax.f32 %v3596_v50, 0.0  ;;  %v5274_v15 = vld [vmem:[#allocation10_spill] sm:$0xff] }
  0xeb   :  { %v3650_v63 = vadd.f32 %v3470_v43, %v965_v28  ;;  %v3653_v37 = vadd.f32 %v3521_v52, %v966_v44  ;;  %v874_v58 = vmul.f32 %v3468_v42, %v5269_v9  ;;  %v5273_v28 = vld [vmem:[#allocation53_spill] sm:$0xff]  ;;  %v288_v7 = vmul.f32 %v3369_v13, %v5272_v35 }
  0xec   :  { %v3661_v60 = vpack.c.bf16 %v5271_v47, %v5270_v16  ;;  %v722_v39 = vadd.f32 %v658_v51, %v506_v17  ;;  %v287_v18 = vmul.f32 %v5273_v28, %v5272_v35  ;;  %v937_v23 = vadd.f32 %v873_v40, %v721_v4  ;;  %v5275_v17 = vld [vmem:[#allocation57_spill] sm:$0xff]  ;;  %v5280_v16 = vld [vmem:[#allocation7_spill] sm:$0xff] }
  0xed   :  { %5267 = vst [vmem:[#allocation16_spill] sm:$0xff] %v3650_v63  ;;  %5268 = vst [vmem:[#allocation54_spill] sm:$0xff] %v3653_v37  ;;  %v439_v33 = vmul.f32 %v3341_v36, %v5274_v15  ;;  %v440_v47 = vmul.f32 %v5275_v17, %v5274_v15  ;;  %v655_v1 = vmul.f32 %v5276_v57, %v3146_v8  ;;  %v5122_v44 = vmax.f32 %v3650_v63, 0.0  ;;  %v5281_v63 = vld [vmem:[#allocation8_spill] sm:$0xff] }
  0xee   :  { %1386 = vperm.xlu1 %2890, %v1249_v55   ;;  %1389 = vperm.xlu0 %2889, %v1250_v49   ;;  %v938_v51 = vadd.f32 %v874_v58, %v722_v39  ;;  %v3679_v4 = vadd.f32 %v3470_v43, %v937_v23  ;;  %v656_v40 = vmul.f32 %v3447_v46, %v3146_v8  ;;  %v1247_v15 = vunpack.c.l.b16 %v3661_v60 }
  0xef   :  { %v503_v35 = vadd.f32 %v439_v33, %v287_v18  ;;  %v504_v49 = vadd.f32 %v440_v47, %v288_v7  ;;  %v871_v39 = vmul.f32 %v3449_v53, %v3149_v10  ;;  %v872_v58 = vmul.f32 %v3493_v6, %v3149_v10 }
  0xf0   :  { %5277 = vst [vmem:[#allocation17_spill] sm:$0xff] %v3679_v4  ;;  %v3684_v55 = vadd.f32 %v3521_v52, %v938_v51  ;;  %v5279_v23 = vmax.f32 %v3653_v37, 0.0  ;;  %v319_v10 = vmul.f32 %v5273_v28, %v5280_v16  ;;  %v320_v14 = vmul.f32 %v3369_v13, %v5280_v16 }
  0xf1   :  { %v719_v51 = vadd.f32 %v655_v1, %v503_v35  ;;  %v720_v47 = vadd.f32 %v656_v40, %v504_v49  ;;  %v471_v37 = vmul.f32 %v3341_v36, %v5281_v63  ;;  %v688_v35 = vmul.f32 %v3447_v46, %v3134_v2 }
  0xf2   :  { %5278 = vst [vmem:[#allocation9_spill] sm:$0xff] %v3684_v55  ;;  %v1161_v33 = vpack.c.bf16 %v5279_v23, %v5122_v44  ;;  %1296 = vperm.xlu0 %2889, %v1219_v27   ;;  %1284 = vperm.xlu1 %2890, %v1215_v62   ;;  %v472_v23 = vmul.f32 %v5275_v17, %v5281_v63  ;;  %v5127_v62 = vmax.f32 %v3679_v4, 0.0  ;;  %v5282_v63 = vunpack.c.h.b16 %v3589_v48 }
  0xf3   :  { %v687_v27 = vmul.f32 %v5276_v57, %v3134_v2  ;;  %v935_v44 = vadd.f32 %v871_v39, %v719_v51  ;;  %v936_v1 = vadd.f32 %v872_v58, %v720_v47  ;;  %v535_v40 = vadd.f32 %v471_v37, %v319_v10  ;;  %v5287_v37 = vld [vmem:[#allocation52_spill] sm:$0xff] }
  0xf4   :  { %v536_v49 = vadd.f32 %v472_v23, %v320_v14  ;;  %v903_v16 = vmul.f32 %v3449_v53, %v3137_v3  ;;  %v904_v8 = vmul.f32 %v3493_v6, %v3137_v3  ;;  %v5283_v18 = vunpack.c.l.b16 %v3589_v48  ;;  %v5286_v14 = vld [vmem:[#allocation12_spill] sm:$0xff] }
  0xf5   :  { %v1254_v7 = vunpack.c.h.b16 %v1161_v33  ;;  %v3720_v39 = vadd.f32 %v3495_v11, %v935_v44  ;;  %v3723_v2 = vadd.f32 %v3547_v24, %v936_v1  ;;  %v473_v58 = vmul.f32 %v5287_v37, %v5286_v14  ;;  %v5290_v1 = vld [vmem:[#allocation13_spill] sm:$0xff] }
  0xf6   :  { %1305 = vperm.xlu0 %2889, %v5282_v63   ;;  %1302 = vperm.xlu1 %2890, %v5283_v18   ;;  %v5288_v3 = vmax.f32 %v3684_v55, 0.0  ;;  %v751_v47 = vadd.f32 %v687_v27, %v535_v40  ;;  %v752_v10 = vadd.f32 %v688_v35, %v536_v49  ;;  %v474_v48 = vmul.f32 %v3339_v38, %v5286_v14  ;;  %v5289_v18 = vld [vmem:[#allocation55_spill] sm:$0xff]  ;;  %v5291_v55 = vld [vmem:[#allocation56_spill] sm:$0xff] }
  0xf7   :  { %5284 = vst [vmem:[#allocation53_spill] sm:$0xff] %v3720_v39  ;;  %5285 = vst [vmem:[#allocation10_spill] sm:$0xff] %v3723_v2  ;;  %v537_v23 = vadd.f32 %v473_v58, %v5289_v18  ;;  %v689_v63 = vmul.f32 %v3371_v30, %v5290_v1  ;;  %v690_v50 = vmul.f32 %v3421_v19, %v5290_v1  ;;  %v5293_v35 = vunpack.c.l.b16 %v3628_v20 }
  0xf8   :  { %v3731_v51 = vpack.c.bf16 %v5288_v3, %v5127_v62  ;;  %v967_v29 = vadd.f32 %v903_v16, %v751_v47  ;;  %v968_v54 = vadd.f32 %v904_v8, %v752_v10  ;;  %v538_v3 = vadd.f32 %v474_v48, %v5291_v55  ;;  %v5292_v62 = vld [vmem:[#allocation14_spill] sm:$0xff]  ;;  %v5297_v10 = vld [vmem:[#allocation15_spill] sm:$0xff] }
  0xf9   :  { %v905_v27 = vmul.f32 %v3423_v26, %v5292_v62  ;;  %v1253_v40 = vunpack.c.l.b16 %v1161_v33  ;;  %v5130_v49 = vmax.f32 %v3720_v39, 0.0  ;;  %v753_v58 = vadd.f32 %v689_v63, %v537_v23  ;;  %v5311_v39 = vld [vmem:[#allocation11_spill] sm:$0xff] }
  0xfa   :  { %1392 = vperm.xlu0 %2889, %v5293_v35   ;;  %1380 = vperm.xlu1 %2890, %v1247_v15   ;;  %v906_v18 = vmul.f32 %v3468_v42, %v5292_v62  ;;  %v1225_v44 = vunpack.c.l.b16 %v3731_v51  ;;  %v3751_v8 = vadd.f32 %v3495_v11, %v967_v29  ;;  %v3754_v55 = vadd.f32 %v3547_v24, %v968_v54 }
  0xfb   :  { %v754_v16 = vadd.f32 %v690_v50, %v538_v3  ;;  %v5296_v15 = vmax.f32 %v3723_v2, 0.0  ;;  %v969_v47 = vadd.f32 %v905_v27, %v753_v58  ;;  %v291_v48 = vmul.f32 %v5273_v28, %v5297_v10 }
  0xfc   :  { %5294 = vst [vmem:[#allocation57_spill] sm:$0xff] %v3751_v8  ;;  %5295 = vst [vmem:[#allocation58_spill] sm:$0xff] %v3754_v55  ;;  %v443_v23 = vmul.f32 %v3341_v36, %v3167_v22  ;;  %v5128_v29 = vmax.f32 %v3754_v55, 0.0  ;;  %v292_v54 = vmul.f32 %v3369_v13, %v5297_v10  ;;  %v444_v50 = vmul.f32 %v5275_v17, %v3167_v22 }
  0xfd   :  { %v3760_v33 = vpack.c.bf16 %v5296_v15, %v5130_v49  ;;  %v970_v63 = vadd.f32 %v906_v18, %v754_v16  ;;  %v5129_v3 = vmax.f32 %v3751_v8, 0.0  ;;  %v3773_v27 = vadd.f32 %v3470_v43, %v969_v47 }
  0xfe   :  { %1401 = vperm.xlu0 %2889, %v1254_v7   ;;  %1398 = vperm.xlu1 %2890, %v1253_v40   ;;  %v507_v35 = vadd.f32 %v443_v23, %v291_v48  ;;  %v659_v58 = vmul.f32 %v5276_v57, %v5265_v45  ;;  %v1226_v15 = vunpack.c.h.b16 %v3731_v51  ;;  %v508_v16 = vadd.f32 %v444_v50, %v292_v54 }
  0xff   :  { %5298 = vst [vmem:[#allocation7_spill] sm:$0xff] %v3773_v27  ;;  %v3779_v18 = vadd.f32 %v3521_v52, %v970_v63  ;;  %v660_v22 = vmul.f32 %v3447_v46, %v5265_v45  ;;  %v3787_v7 = vpack.c.bf16 %v5128_v29, %v5129_v3  ;;  %v875_v47 = vmul.f32 %v3449_v53, %v5269_v9  ;;  %v5303_v29 = vld [vmem:[#allocation47_spill] sm:$0xff] }
 0x100   :  { %v723_v40 = vadd.f32 %v659_v58, %v507_v35  ;;  %v876_v51 = vmul.f32 %v3493_v6, %v5269_v9  ;;  %v1223_v10 = vunpack.c.l.b16 %v3760_v33  ;;  %v5300_v63 = vunpack.c.h.b16 %v3603_v34  ;;  %v5302_v58 = vld [vmem:[#allocation22_spill] sm:$0xff]  ;;  %v5304_v9 = vld [vmem:[#allocation23_spill] sm:$0xff] }
 0x101   :  { %5299 = vst [vmem:[#allocation8_spill] sm:$0xff] %v3779_v18  ;;  %v724_v23 = vadd.f32 %v660_v22, %v508_v16  ;;  %v5301_v54 = vunpack.c.h.b16 %v3609_v31  ;;  %v5138_v50 = vmax.f32 %v3773_v27, 0.0  ;;  %v293_v3 = vmul.f32 %v5303_v29, %v5302_v58  ;;  %v5305_v16 = vld [vmem:[#allocation46_spill] sm:$0xff] }
 0x102   :  { %1299 = vperm.xlu0 %2889, %v5300_v63   ;;  %v939_v35 = vadd.f32 %v875_v47, %v723_v40  ;;  %v445_v49 = vmul.f32 %v5287_v37, %v5304_v9  ;;  %v294_v22 = vmul.f32 %v5305_v16, %v5302_v58  ;;  %v446_v34 = vmul.f32 %v3339_v38, %v5304_v9  ;;  %v5306_v63 = vld [vmem:[#allocation24_spill] sm:$0xff]  ;;  %v5307_v47 = vld [vmem:[#allocation25_spill] sm:$0xff] }
 0x103   :  { %1287 = vperm.xlu1 %2890, %v5301_v54   ;;  %v940_v55 = vadd.f32 %v876_v51, %v724_v23  ;;  %v661_v31 = vmul.f32 %v3371_v30, %v5306_v63  ;;  %v1255_v54 = vunpack.c.l.b16 %v3787_v7  ;;  %v662_v40 = vmul.f32 %v3421_v19, %v5306_v63 }
 0x104   :  { %v509_v45 = vadd.f32 %v445_v49, %v293_v3  ;;  %v877_v48 = vmul.f32 %v3423_v26, %v5307_v47  ;;  %v5308_v51 = vmax.f32 %v3779_v18, 0.0  ;;  %v3821_v8 = vadd.f32 %v3495_v11, %v939_v35 }
 0x105   :  { %v3824_v4 = vadd.f32 %v3547_v24, %v940_v55  ;;  %v510_v2 = vadd.f32 %v446_v34, %v294_v22  ;;  %v878_v3 = vmul.f32 %v3468_v42, %v5307_v47  ;;  %v323_v41 = vmul.f32 %v5273_v28, %v5311_v39 }
 0x106   :  { %v1163_v23 = vpack.c.bf16 %v5308_v51, %v5138_v50  ;;  %5309 = vst [vmem:[#allocation12_spill] sm:$0xff] %v3821_v8  ;;  %1314 = vperm.xlu0 %2889, %v1225_v44   ;;  %v725_v49 = vadd.f32 %v661_v31, %v509_v45  ;;  %v324_v35 = vmul.f32 %v3369_v13, %v5311_v39  ;;  %v5140_v34 = vmax.f32 %v3821_v8, 0.0  ;;  %v5319_v8 = vld [vmem:[#allocation21_spill] sm:$0xff] }
 0x107   :  { %5310 = vst [vmem:[#allocation52_spill] sm:$0xff] %v3824_v4  ;;  %1308 = vperm.xlu1 %2890, %v1223_v10   ;;  %v5139_v51 = vmax.f32 %v3824_v4, 0.0  ;;  %v726_v50 = vadd.f32 %v662_v40, %v510_v2  ;;  %v475_v55 = vmul.f32 %v3341_v36, %v5286_v14  ;;  %v476_v10 = vmul.f32 %v5275_v17, %v5286_v14 }
 0x108   :  { %v941_v44 = vadd.f32 %v877_v48, %v725_v49  ;;  %v691_v45 = vmul.f32 %v5276_v57, %v5290_v1  ;;  %v692_v22 = vmul.f32 %v3447_v46, %v5290_v1  ;;  %v907_v39 = vmul.f32 %v3449_v53, %v5292_v62 }
 0x109   :  { %v942_v31 = vadd.f32 %v878_v3, %v726_v50  ;;  %v539_v2 = vadd.f32 %v475_v55, %v323_v41  ;;  %v5312_v40 = vunpack.c.h.b16 %v3661_v60  ;;  %v1258_v48 = vunpack.c.h.b16 %v1163_v23  ;;  %v5314_v50 = vld [vmem:[#allocation18_spill] sm:$0xff] }
 0x10a   :  { %v3848_v14 = vadd.f32 %v3470_v43, %v941_v44  ;;  %v540_v49 = vadd.f32 %v476_v10, %v324_v35  ;;  %v908_v27 = vmul.f32 %v3493_v6, %v5292_v62  ;;  %v3856_v41 = vpack.c.bf16 %v5139_v51, %v5140_v34  ;;  %v5315_v62 = vld [vmem:[#allocation19_spill] sm:$0xff]  ;;  %v5316_v51 = vld [vmem:[#allocation20_spill] sm:$0xff] }
 0x10b   :  { %1383 = vperm.xlu0 %2889, %v5312_v40   ;;  %1317 = vperm.xlu1 %2890, %v1226_v15   ;;  %v3859_v1 = vadd.f32 %v3521_v52, %v942_v31  ;;  %v755_v60 = vadd.f32 %v691_v45, %v539_v2  ;;  %v325_v15 = vmul.f32 %v5303_v29, %v5314_v50  ;;  %v5317_v2 = vunpack.c.h.b16 %v3628_v20 }
 0x10c   :  { %v756_v55 = vadd.f32 %v692_v22, %v540_v49  ;;  %v326_v35 = vmul.f32 %v5305_v16, %v5314_v50  ;;  %v477_v44 = vmul.f32 %v5287_v37, %v5315_v62  ;;  %v478_v31 = vmul.f32 %v3339_v38, %v5315_v62 }
 0x10d   :  { %5313 = vst [vmem:[#allocation55_spill] sm:$0xff] %v3859_v1  ;;  %v5146_v10 = vmax.f32 %v3859_v1, 0.0  ;;  %v971_v40 = vadd.f32 %v907_v39, %v755_v60  ;;  %v693_v45 = vmul.f32 %v3371_v30, %v5316_v51  ;;  %v1257_v22 = vunpack.c.l.b16 %v1163_v23 }
 0x10e   :  { %v972_v49 = vadd.f32 %v908_v27, %v756_v55  ;;  %v541_v34 = vadd.f32 %v477_v44, %v325_v15  ;;  %v694_v3 = vmul.f32 %v3421_v19, %v5316_v51  ;;  %v1227_v18 = vunpack.c.l.b16 %v3856_v41 }
 0x10f   :  { %1404 = vperm.xlu0 %2889, %v1255_v54   ;;  %1395 = vperm.xlu1 %2890, %v5317_v2   ;;  %v5318_v39 = vmax.f32 %v3848_v14, 0.0  ;;  %v542_v4 = vadd.f32 %v478_v31, %v326_v35  ;;  %v909_v54 = vmul.f32 %v3423_v26, %v5319_v8  ;;  %v3885_v20 = vadd.f32 %v3495_v11, %v971_v40  ;;  %v5328_v35 = vld [vmem:[#allocation33_spill] sm:$0xff] }
 0x110   :  { %v3888_v27 = vadd.f32 %v3547_v24, %v972_v49  ;;  %v757_v23 = vadd.f32 %v693_v45, %v541_v34  ;;  %v910_v15 = vmul.f32 %v3468_v42, %v5319_v8  ;;  %v295_v2 = vmul.f32 %v5273_v28, %v5302_v58 }
 0x111   :  { %v1149_v60 = vpack.c.bf16 %v5146_v10, %v5318_v39  ;;  %5320 = vst [vmem:[#allocation13_spill] sm:$0xff] %v3885_v20  ;;  %v758_v44 = vadd.f32 %v694_v3, %v542_v4  ;;  %v296_v49 = vmul.f32 %v3369_v13, %v5302_v58  ;;  %v447_v34 = vmul.f32 %v3341_v36, %v5304_v9 }
 0x112   :  { %5321 = vst [vmem:[#allocation56_spill] sm:$0xff] %v3888_v27  ;;  %v5144_v31 = vmax.f32 %v3888_v27, 0.0  ;;  %v973_v40 = vadd.f32 %v909_v54, %v757_v23  ;;  %v448_v4 = vmul.f32 %v5275_v17, %v5304_v9  ;;  %v663_v3 = vmul.f32 %v5276_v57, %v5306_v63 }
 0x113   :  { %v1230_v55 = vunpack.c.h.b16 %v1149_v60  ;;  %1413 = vperm.xlu0 %2889, %v1258_v48   ;;  %1410 = vperm.xlu1 %2890, %v1257_v22   ;;  %v974_v45 = vadd.f32 %v910_v15, %v758_v44  ;;  %v664_v48 = vmul.f32 %v3447_v46, %v5306_v63  ;;  %v5145_v22 = vmax.f32 %v3885_v20, 0.0 }
 0x114   :  { %v3908_v39 = vadd.f32 %v3470_v43, %v973_v40  ;;  %v511_v54 = vadd.f32 %v447_v34, %v295_v2  ;;  %v879_v58 = vmul.f32 %v3449_v53, %v5307_v47  ;;  %v1229_v23 = vunpack.c.l.b16 %v1149_v60  ;;  %v5325_v34 = vld [vmem:[#allocation30_spill] sm:$0xff] }
 0x115   :  { %v3913_v15 = vadd.f32 %v3521_v52, %v974_v45  ;;  %v512_v9 = vadd.f32 %v448_v4, %v296_v49  ;;  %v880_v44 = vmul.f32 %v3493_v6, %v5307_v47  ;;  %v5324_v63 = vunpack.c.h.b16 %v3760_v33  ;;  %v5326_v47 = vld [vmem:[#allocation31_spill] sm:$0xff] }
 0x116   :  { %5322 = vst [vmem:[#allocation14_spill] sm:$0xff] %v3908_v39  ;;  %v3923_v2 = vpack.c.bf16 %v5144_v31, %v5145_v22  ;;  %v5153_v40 = vmax.f32 %v3908_v39, 0.0  ;;  %v727_v60 = vadd.f32 %v663_v3, %v511_v54  ;;  %v297_v45 = vmul.f32 %v5303_v29, %v5325_v34  ;;  %v5327_v22 = vld [vmem:[#allocation32_spill] sm:$0xff] }
 0x117   :  { %5323 = vst [vmem:[#allocation15_spill] sm:$0xff] %v3913_v15  ;;  %1320 = vperm.xlu0 %2889, %v1227_v18   ;;  %1311 = vperm.xlu1 %2890, %v5324_v63   ;;  %v5152_v49 = vmax.f32 %v3913_v15, 0.0  ;;  %v728_v4 = vadd.f32 %v664_v48, %v512_v9  ;;  %v449_v18 = vmul.f32 %v5287_v37, %v5326_v47 }
 0x118   :  { %v450_v33 = vmul.f32 %v3339_v38, %v5326_v47  ;;  %v943_v63 = vadd.f32 %v879_v58, %v727_v60  ;;  %v298_v31 = vmul.f32 %v5305_v16, %v5325_v34  ;;  %v665_v10 = vmul.f32 %v3371_v30, %v5327_v22 }
 0x119   :  { %v666_v3 = vmul.f32 %v3421_v19, %v5327_v22  ;;  %v1165_v48 = vpack.c.bf16 %v5152_v49, %v5153_v40  ;;  %v944_v54 = vadd.f32 %v880_v44, %v728_v4  ;;  %v513_v9 = vadd.f32 %v449_v18, %v297_v45  ;;  %v5335_v49 = vld [vmem:[#allocation28_spill] sm:$0xff] }
 0x11a   :  { %v881_v27 = vmul.f32 %v3423_v26, %v5328_v35  ;;  %v1259_v58 = vunpack.c.l.b16 %v3923_v2  ;;  %v3947_v60 = vadd.f32 %v3495_v11, %v943_v63  ;;  %v514_v20 = vadd.f32 %v450_v33, %v298_v31 }
 0x11b   :  { %1329 = vperm.xlu0 %2889, %v1230_v55   ;;  %1326 = vperm.xlu1 %2890, %v1229_v23   ;;  %v882_v1 = vmul.f32 %v3468_v42, %v5328_v35  ;;  %v1262_v39 = vunpack.c.h.b16 %v1165_v48  ;;  %v3952_v15 = vadd.f32 %v3547_v24, %v944_v54  ;;  %v729_v44 = vadd.f32 %v665_v10, %v513_v9 }
 0x11c   :  { %v327_v45 = vmul.f32 %v5273_v28, %v5314_v50  ;;  %v5155_v55 = vmax.f32 %v3947_v60, 0.0  ;;  %v730_v23 = vadd.f32 %v666_v3, %v514_v20  ;;  %v328_v4 = vmul.f32 %v3369_v13, %v5314_v50 }
 0x11d   :  { %5329 = vst [vmem:[#allocation22_spill] sm:$0xff] %v3952_v15  ;;  %v479_v31 = vmul.f32 %v3341_v36, %v5315_v62  ;;  %v5154_v18 = vmax.f32 %v3952_v15, 0.0  ;;  %v945_v33 = vadd.f32 %v881_v27, %v729_v44  ;;  %v480_v63 = vmul.f32 %v5275_v17, %v5315_v62 }
 0x11e   :  { %v695_v10 = vmul.f32 %v5276_v57, %v5316_v51  ;;  %v5330_v54 = vunpack.c.h.b16 %v3787_v7  ;;  %v1261_v20 = vunpack.c.l.b16 %v1165_v48  ;;  %v946_v3 = vadd.f32 %v882_v1, %v730_v23 }
 0x11f   :  { %1416 = vperm.xlu0 %2889, %v1259_v58   ;;  %v543_v9 = vadd.f32 %v479_v31, %v327_v45  ;;  %v696_v50 = vmul.f32 %v3447_v46, %v5316_v51  ;;  %v3974_v27 = vpack.c.bf16 %v5154_v18, %v5155_v55  ;;  %v3977_v62 = vadd.f32 %v3470_v43, %v945_v33  ;;  %v5333_v58 = vld [vmem:[#allocation26_spill] sm:$0xff] }
 0x120   :  { %1407 = vperm.xlu1 %2890, %v5330_v54   ;;  %v544_v44 = vadd.f32 %v480_v63, %v328_v4  ;;  %v911_v7 = vmul.f32 %v3449_v53, %v5319_v8  ;;  %v3982_v48 = vadd.f32 %v3521_v52, %v946_v3  ;;  %v912_v51 = vmul.f32 %v3493_v6, %v5319_v8 }
 0x121   :  { %5331 = vst [vmem:[#allocation47_spill] sm:$0xff] %v3977_v62  ;;  %v759_v1 = vadd.f32 %v695_v10, %v543_v9  ;;  %v329_v45 = vmul.f32 %v5303_v29, %v5333_v58  ;;  %v1231_v23 = vunpack.c.l.b16 %v3974_v27  ;;  %v5158_v31 = vmax.f32 %v3977_v62, 0.0  ;;  %v5334_v10 = vld [vmem:[#allocation27_spill] sm:$0xff] }
 0x122   :  { %5332 = vst [vmem:[#allocation23_spill] sm:$0xff] %v3982_v48  ;;  %v760_v33 = vadd.f32 %v696_v50, %v544_v44  ;;  %v330_v4 = vmul.f32 %v5305_v16, %v5333_v58  ;;  %v5157_v63 = vmax.f32 %v3982_v48, 0.0  ;;  %v481_v3 = vmul.f32 %v5287_v37, %v5334_v10  ;;  %v5336_v44 = vld [vmem:[#allocation29_spill] sm:$0xff] }
 0x123   :  { %1425 = vperm.xlu0 %2889, %v1262_v39   ;;  %v975_v54 = vadd.f32 %v911_v7, %v759_v1  ;;  %v482_v8 = vmul.f32 %v3339_v38, %v5334_v10  ;;  %v697_v40 = vmul.f32 %v3371_v30, %v5335_v49  ;;  %v698_v50 = vmul.f32 %v3421_v19, %v5335_v49 }
 0x124   :  { %1422 = vperm.xlu1 %2890, %v1261_v20   ;;  %v976_v9 = vadd.f32 %v912_v51, %v760_v33  ;;  %v913_v39 = vmul.f32 %v3423_v26, %v5336_v44  ;;  %v1151_v20 = vpack.c.bf16 %v5157_v63, %v5158_v31  ;;  %v545_v1 = vadd.f32 %v481_v3, %v329_v45 }
 0x125   :  { %v4008_v7 = vadd.f32 %v3495_v11, %v975_v54  ;;  %v546_v18 = vadd.f32 %v482_v8, %v330_v4  ;;  %v914_v33 = vmul.f32 %v3468_v42, %v5336_v44  ;;  %v299_v55 = vmul.f32 %v5273_v28, %v5325_v34 }
 0x126   :  { %v4011_v51 = vadd.f32 %v3547_v24, %v976_v9  ;;  %v300_v62 = vmul.f32 %v3369_v13, %v5325_v34  ;;  %v5339_v63 = vunpack.c.h.b16 %v3856_v41  ;;  %v1234_v54 = vunpack.c.h.b16 %v1151_v20 }
 0x127   :  { %5337 = vst [vmem:[#allocation46_spill] sm:$0xff] %v4008_v7  ;;  %1332 = vperm.xlu0 %2889, %v1231_v23   ;;  %v1233_v31 = vunpack.c.l.b16 %v1151_v20  ;;  %v5162_v45 = vmax.f32 %v4008_v7, 0.0  ;;  %v761_v4 = vadd.f32 %v697_v40, %v545_v1  ;;  %v762_v8 = vadd.f32 %v698_v50, %v546_v18  ;;  %v5341_v20 = vld [vmem:[#allocation38_spill] sm:$0xff] }
 0x128   :  { %5338 = vst [vmem:[#allocation24_spill] sm:$0xff] %v4011_v51  ;;  %1323 = vperm.xlu1 %2890, %v5339_v63   ;;  %v5161_v3 = vmax.f32 %v4011_v51, 0.0  ;;  %v451_v9 = vmul.f32 %v3341_v36, %v5326_v47  ;;  %v452_v48 = vmul.f32 %v5275_v17, %v5326_v47  ;;  %v667_v34 = vmul.f32 %v5276_v57, %v5327_v22  ;;  %v5350_v51 = vld [vmem:[#allocation37_spill] sm:$0xff] }
 0x129   :  { %v977_v15 = vadd.f32 %v913_v39, %v761_v4  ;;  %v668_v41 = vmul.f32 %v3447_v46, %v5327_v22  ;;  %v883_v23 = vmul.f32 %v3449_v53, %v5328_v35  ;;  %v978_v18 = vadd.f32 %v914_v33, %v762_v8 }
 0x12a   :  { %v4037_v40 = vpack.c.bf16 %v5161_v3, %v5162_v45  ;;  %v515_v63 = vadd.f32 %v451_v9, %v299_v55  ;;  %v516_v50 = vadd.f32 %v452_v48, %v300_v62  ;;  %v1260_v47 = vunpack.c.h.b16 %v3923_v2  ;;  %v5344_v9 = vld [vmem:[#allocation40_spill] sm:$0xff] }
 0x12b   :  { %1341 = vperm.xlu0 %2889, %v1234_v54   ;;  %v4041_v39 = vadd.f32 %v3470_v43, %v977_v15  ;;  %v884_v22 = vmul.f32 %v3493_v6, %v5328_v35  ;;  %v301_v1 = vmul.f32 %v5303_v29, %v5341_v20  ;;  %v4049_v3 = vadd.f32 %v3521_v52, %v978_v18  ;;  %v5343_v15 = vld [vmem:[#allocation39_spill] sm:$0xff] }
 0x12c   :  { %1338 = vperm.xlu1 %2890, %v1233_v31   ;;  %v1263_v4 = vunpack.c.l.b16 %v4037_v40  ;;  %v731_v55 = vadd.f32 %v667_v34, %v515_v63  ;;  %v732_v62 = vadd.f32 %v668_v41, %v516_v50  ;;  %v302_v2 = vmul.f32 %v5305_v16, %v5341_v20 }
 0x12d   :  { %5340 = vst [vmem:[#allocation25_spill] sm:$0xff] %v4041_v39  ;;  %5342 = vst [vmem:[#allocation11_spill] sm:$0xff] %v4049_v3  ;;  %v5164_v48 = vmax.f32 %v4041_v39, 0.0  ;;  %v453_v31 = vmul.f32 %v5287_v37, %v5343_v15  ;;  %v454_v35 = vmul.f32 %v3339_v38, %v5343_v15  ;;  %v5163_v33 = vmax.f32 %v4049_v3, 0.0 }
 0x12e   :  { %v947_v54 = vadd.f32 %v883_v23, %v731_v55  ;;  %v948_v8 = vadd.f32 %v884_v22, %v732_v62  ;;  %v669_v18 = vmul.f32 %v3371_v30, %v5344_v9  ;;  %v670_v63 = vmul.f32 %v3421_v19, %v5344_v9  ;;  %v5345_v22 = vld [vmem:[#allocation41_spill] sm:$0xff] }
 0x12f   :  { %1428 = vperm.xlu0 %2889, %v1263_v4   ;;  %v517_v34 = vadd.f32 %v453_v31, %v301_v1  ;;  %v518_v41 = vadd.f32 %v454_v35, %v302_v2  ;;  %v1167_v50 = vpack.c.bf16 %v5163_v33, %v5164_v48  ;;  %v885_v4 = vmul.f32 %v3423_v26, %v5345_v22 }
 0x130   :  { %1419 = vperm.xlu1 %2890, %v1260_v47   ;;  %v4068_v45 = vadd.f32 %v3495_v11, %v947_v54  ;;  %v4071_v23 = vadd.f32 %v3547_v24, %v948_v8  ;;  %v886_v55 = vmul.f32 %v3468_v42, %v5345_v22  ;;  %v331_v62 = vmul.f32 %v5273_v28, %v5333_v58 }
 0x131   :  { %v733_v47 = vadd.f32 %v669_v18, %v517_v34  ;;  %v734_v1 = vadd.f32 %v670_v63, %v518_v41  ;;  %v1266_v2 = vunpack.c.h.b16 %v1167_v50  ;;  %v1265_v31 = vunpack.c.l.b16 %v1167_v50 }
 0x132   :  { %v5166_v35 = vmax.f32 %v4068_v45, 0.0  ;;  %v5165_v54 = vmax.f32 %v4071_v23, 0.0  ;;  %v332_v48 = vmul.f32 %v3369_v13, %v5333_v58  ;;  %v483_v18 = vmul.f32 %v3341_v36, %v5334_v10 }
 0x133   :  { %v949_v33 = vadd.f32 %v885_v4, %v733_v47  ;;  %v950_v8 = vadd.f32 %v886_v55, %v734_v1  ;;  %1437 = vperm.xlu0 %2889, %v1266_v2   ;;  %v1232_v41 = vunpack.c.h.b16 %v3974_v27  ;;  %v484_v63 = vmul.f32 %v5275_v17, %v5334_v10 }
 0x134   :  { %1434 = vperm.xlu1 %2890, %v1265_v31   ;;  %v4089_v34 = vpack.c.bf16 %v5165_v54, %v5166_v35  ;;  %v699_v50 = vmul.f32 %v5276_v57, %v5335_v49  ;;  %v547_v47 = vadd.f32 %v483_v18, %v331_v62  ;;  %v700_v1 = vmul.f32 %v3447_v46, %v5335_v49 }
 0x135   :  { %v4097_v58 = vadd.f32 %v3470_v43, %v949_v33  ;;  %v4100_v4 = vadd.f32 %v3521_v52, %v950_v8  ;;  %v548_v2 = vadd.f32 %v484_v63, %v332_v48  ;;  %v915_v27 = vmul.f32 %v3449_v53, %v5336_v44  ;;  %v5347_v8 = vld [vmem:[#allocation34_spill] sm:$0xff]  ;;  %v5348_v63 = vld [vmem:[#allocation35_spill] sm:$0xff] }
 0x136   :  { %v1235_v55 = vunpack.c.l.b16 %v4089_v34  ;;  %v916_v10 = vmul.f32 %v3493_v6, %v5336_v44  ;;  %v763_v54 = vadd.f32 %v699_v50, %v547_v47  ;;  %v333_v62 = vmul.f32 %v5303_v29, %v5347_v8 }
 0x137   :  { %5346 = vst [vmem:[#allocation18_spill] sm:$0xff] %v4100_v4  ;;  %v5175_v31 = vmax.f32 %v4097_v58, 0.0  ;;  %v5172_v33 = vmax.f32 %v4100_v4, 0.0  ;;  %v764_v49 = vadd.f32 %v700_v1, %v548_v2  ;;  %v1264_v18 = vunpack.c.h.b16 %v4037_v40 }
 0x138   :  { %1344 = vperm.xlu0 %2889, %v1235_v55   ;;  %1335 = vperm.xlu1 %2890, %v1232_v41   ;;  %v334_v48 = vmul.f32 %v5305_v16, %v5347_v8  ;;  %v485_v35 = vmul.f32 %v5287_v37, %v5348_v63  ;;  %v979_v50 = vadd.f32 %v915_v27, %v763_v54  ;;  %v5349_v55 = vld [vmem:[#allocation36_spill] sm:$0xff] }
 0x139   :  { %v1153_v44 = vpack.c.bf16 %v5172_v33, %v5175_v31  ;;  %v486_v47 = vmul.f32 %v3339_v38, %v5348_v63  ;;  %v701_v41 = vmul.f32 %v3371_v30, %v5349_v55  ;;  %v980_v1 = vadd.f32 %v916_v10, %v764_v49 }
 0x13a   :  { %v549_v40 = vadd.f32 %v485_v35, %v333_v62  ;;  %v702_v2 = vmul.f32 %v3421_v19, %v5349_v55  ;;  %v917_v3 = vmul.f32 %v3423_v26, %v5350_v51  ;;  %v4131_v4 = vadd.f32 %v3495_v11, %v979_v50 }
 0x13b   :  { %v1238_v39 = vunpack.c.h.b16 %v1153_v44  ;;  %v1237_v7 = vunpack.c.l.b16 %v1153_v44  ;;  %v550_v54 = vadd.f32 %v486_v47, %v334_v48  ;;  %v4134_v27 = vadd.f32 %v3547_v24, %v980_v1 }
 0x13c   :  { %5351 = vst [vmem:[#allocation19_spill] sm:$0xff] %v4131_v4  ;;  %v765_v33 = vadd.f32 %v701_v41, %v549_v40  ;;  %v918_v10 = vmul.f32 %v3468_v42, %v5350_v51  ;;  %v303_v35 = vmul.f32 %v5273_v28, %v5341_v20  ;;  %v5174_v62 = vmax.f32 %v4131_v4, 0.0 }
 0x13d   :  { %5352 = vst [vmem:[#allocation20_spill] sm:$0xff] %v4134_v27  ;;  %1353 = vperm.xlu0 %2889, %v1238_v39   ;;  %1350 = vperm.xlu1 %2890, %v1237_v7   ;;  %v766_v49 = vadd.f32 %v702_v2, %v550_v54  ;;  %v304_v44 = vmul.f32 %v3369_v13, %v5341_v20  ;;  %v5173_v50 = vmax.f32 %v4134_v27, 0.0 }
 0x13e   :  { %v455_v48 = vmul.f32 %v3341_v36, %v5343_v15  ;;  %v981_v47 = vadd.f32 %v917_v3, %v765_v33  ;;  %v456_v41 = vmul.f32 %v5275_v17, %v5343_v15  ;;  %v671_v1 = vmul.f32 %v5276_v57, %v5344_v9 }
 0x13f   :  { %v982_v39 = vadd.f32 %v918_v10, %v766_v49  ;;  %v672_v40 = vmul.f32 %v3447_v46, %v5344_v9  ;;  %v887_v20 = vmul.f32 %v3449_v53, %v5345_v22  ;;  %v4158_v2 = vpack.c.bf16 %v5173_v50, %v5174_v62  ;;  %v5355_v10 = vld [vmem:[#allocation48_spill] sm:$0xff] }
 0x140   :  { %v519_v7 = vadd.f32 %v455_v48, %v303_v35  ;;  %v4161_v3 = vadd.f32 %v3470_v43, %v981_v47  ;;  %v520_v15 = vadd.f32 %v456_v41, %v304_v44  ;;  %v888_v33 = vmul.f32 %v3493_v6, %v5345_v22  ;;  %v5356_v44 = vld [vmem:[#allocation49_spill] sm:$0xff]  ;;  %v5358_v47 = vld [vmem:[#allocation51_spill] sm:$0xff] }
 0x141   :  { %1431 = vperm.xlu1 %2890, %v1264_v18   ;;  %v4166_v54 = vadd.f32 %v3521_v52, %v982_v39  ;;  %v305_v35 = vmul.f32 %v5303_v29, %v5355_v10  ;;  %v306_v49 = vmul.f32 %v5305_v16, %v5355_v10  ;;  %v1267_v48 = vunpack.c.l.b16 %v4158_v2  ;;  %v5357_v39 = vld [vmem:[#allocation50_spill] sm:$0xff] }
 0x142   :  { %5353 = vst [vmem:[#allocation21_spill] sm:$0xff] %v4161_v3  ;;  %v735_v9 = vadd.f32 %v671_v1, %v519_v7  ;;  %v736_v50 = vadd.f32 %v672_v40, %v520_v15  ;;  %v457_v41 = vmul.f32 %v5287_v37, %v5356_v44  ;;  %v458_v1 = vmul.f32 %v3339_v38, %v5356_v44 }
 0x143   :  { %5354 = vst [vmem:[#allocation30_spill] sm:$0xff] %v4166_v54  ;;  %v5180_v22 = vmax.f32 %v4166_v54, 0.0  ;;  %v673_v7 = vmul.f32 %v3371_v30, %v5357_v39  ;;  %1440 = vperm.xlu0 %2889, %v1267_v48   ;;  %v674_v27 = vmul.f32 %v3421_v19, %v5357_v39  ;;  %v889_v40 = vmul.f32 %v3423_v26, %v5358_v47 }
 0x144   :  { %v951_v18 = vadd.f32 %v887_v20, %v735_v9  ;;  %v952_v62 = vadd.f32 %v888_v33, %v736_v50  ;;  %v521_v31 = vadd.f32 %v457_v41, %v305_v35  ;;  %v5359_v15 = vmax.f32 %v4161_v3, 0.0 }
 0x145   :  { %v522_v4 = vadd.f32 %v458_v1, %v306_v49  ;;  %v890_v48 = vmul.f32 %v3468_v42, %v5358_v47  ;;  %v335_v35 = vmul.f32 %v5273_v28, %v5347_v8  ;;  %v336_v41 = vmul.f32 %v3369_v13, %v5347_v8 }
 0x146   :  { %v1169_v20 = vpack.c.bf16 %v5180_v22, %v5359_v15  ;;  %v4190_v9 = vadd.f32 %v3495_v11, %v951_v18  ;;  %v4195_v50 = vadd.f32 %v3547_v24, %v952_v62  ;;  %v737_v33 = vadd.f32 %v673_v7, %v521_v31 }
 0x147   :  { %v738_v18 = vadd.f32 %v674_v27, %v522_v4  ;;  %v487_v22 = vmul.f32 %v3341_v36, %v5348_v63  ;;  %v488_v31 = vmul.f32 %v5275_v17, %v5348_v63  ;;  %v1236_v62 = vunpack.c.h.b16 %v4089_v34 }
 0x148   :  { %v1270_v3 = vunpack.c.h.b16 %v1169_v20  ;;  %v1269_v54 = vunpack.c.l.b16 %v1169_v20  ;;  %v5182_v15 = vmax.f32 %v4190_v9, 0.0  ;;  %v5181_v49 = vmax.f32 %v4195_v50, 0.0  ;;  %v5360_v20 = vld [vmem:[#allocation42_spill] sm:$0xff] }
 0x149   :  { %v953_v1 = vadd.f32 %v889_v40, %v737_v33  ;;  %v954_v7 = vadd.f32 %v890_v48, %v738_v18  ;;  %v703_v8 = vmul.f32 %v5276_v57, %v5349_v55  ;;  %v704_v4 = vmul.f32 %v3447_v46, %v5349_v55 }
 0x14a   :  { %1449 = vperm.xlu0 %2889, %v1270_v3   ;;  %1446 = vperm.xlu1 %2890, %v1269_v54   ;;  %v4216_v27 = vpack.c.bf16 %v5181_v49, %v5182_v15  ;;  %v551_v63 = vadd.f32 %v487_v22, %v335_v35  ;;  %v552_v3 = vadd.f32 %v488_v31, %v336_v41  ;;  %v5361_v41 = vld [vmem:[#allocation43_spill] sm:$0xff]  ;;  %v5362_v15 = vld [vmem:[#allocation44_spill] sm:$0xff] }
 0x14b   :  { %v4219_v40 = vadd.f32 %v3470_v43, %v953_v1  ;;  %v4222_v34 = vadd.f32 %v3521_v52, %v954_v7  ;;  %v919_v54 = vmul.f32 %v3449_v53, %v5350_v51  ;;  %v920_v55 = vmul.f32 %v3493_v6, %v5350_v51 }
 0x14c   :  { %v337_v48 = vmul.f32 %v5303_v29, %v5360_v20  ;;  %v1239_v33 = vunpack.c.l.b16 %v4216_v27  ;;  %v767_v1 = vadd.f32 %v703_v8, %v551_v63  ;;  %v768_v49 = vadd.f32 %v704_v4, %v552_v3 }
 0x14d   :  { %v1106_v22 = vmax.f32 %v4222_v34, 0.0  ;;  %v338_v35 = vmul.f32 %v5305_v16, %v5360_v20  ;;  %v489_v31 = vmul.f32 %v5287_v37, %v5361_v41  ;;  %v490_v51 = vmul.f32 %v3339_v38, %v5361_v41  ;;  %v5364_v37 = vld [vmem:[#allocation45_spill] sm:$0xff] }
 0x14e   :  { %1347 = vperm.xlu1 %2890, %v1236_v62   ;;  %1356 = vperm.xlu0 %2889, %v1239_v33   ;;  %v983_v29 = vadd.f32 %v919_v54, %v767_v1  ;;  %v984_v7 = vadd.f32 %v920_v55, %v768_v49  ;;  %v705_v18 = vmul.f32 %v3371_v30, %v5362_v15  ;;  %v5363_v8 = vmax.f32 %v4219_v40, 0.0 }
 0x14f   :  { %v706_v62 = vmul.f32 %v3421_v19, %v5362_v15  ;;  %v553_v4 = vadd.f32 %v489_v31, %v337_v48  ;;  %v554_v63 = vadd.f32 %v490_v51, %v338_v35  ;;  %v921_v3 = vmul.f32 %v3423_v26, %v5364_v37 }
 0x150   :  { %v1155_v16 = vpack.c.bf16 %v1106_v22, %v5363_v8  ;;  %v4250_v38 = vadd.f32 %v3495_v11, %v983_v29  ;;  %v4253_v49 = vadd.f32 %v3547_v24, %v984_v7  ;;  %v922_v30 = vmul.f32 %v3468_v42, %v5364_v37 }
 0x151   :  { %v307_v19 = vmul.f32 %v5273_v28, %v5355_v10  ;;  %v769_v33 = vadd.f32 %v705_v18, %v553_v4  ;;  %v770_v48 = vadd.f32 %v706_v62, %v554_v63  ;;  %v308_v35 = vmul.f32 %v3369_v13, %v5355_v10 }
 0x152   :  { %5365 = vst [vmem:[#allocation31_spill] sm:$0xff] %v4253_v49  ;;  %v1242_v54 = vunpack.c.h.b16 %v1155_v16  ;;  %v1241_v55 = vunpack.c.l.b16 %v1155_v16  ;;  %v5190_v1 = vmax.f32 %v4250_v38, 0.0  ;;  %v5187_v26 = vmax.f32 %v4253_v49, 0.0 }
 0x153   :  { %v459_v31 = vmul.f32 %v3341_v36, %v5356_v44  ;;  %v1268_v42 = vunpack.c.h.b16 %v4158_v2  ;;  %v985_v51 = vadd.f32 %v921_v3, %v769_v33  ;;  %v986_v29 = vadd.f32 %v922_v30, %v770_v48 }
 0x154   :  { %1365 = vperm.xlu0 %2889, %v1242_v54   ;;  %1362 = vperm.xlu1 %2890, %v1241_v55   ;;  %v460_v18 = vmul.f32 %v5275_v17, %v5356_v44  ;;  %v1170_v7 = vpack.c.bf16 %v5187_v26, %v5190_v1  ;;  %v675_v10 = vmul.f32 %v5276_v57, %v5357_v39 }
 0x155   :  { %v523_v62 = vadd.f32 %v459_v31, %v307_v19  ;;  %v676_v8 = vmul.f32 %v3447_v46, %v5357_v39  ;;  %v4277_v16 = vadd.f32 %v3470_v43, %v985_v51  ;;  %v4280_v2 = vadd.f32 %v3521_v52, %v986_v29 }
 0x156   :  { %v524_v4 = vadd.f32 %v460_v18, %v308_v35  ;;  %v891_v44 = vmul.f32 %v3449_v53, %v5358_v47  ;;  %v1271_v63 = vunpack.c.l.b16 %v1170_v7  ;;  %v892_v30 = vmul.f32 %v3493_v6, %v5358_v47 }
 0x157   :  { %5366 = vst [vmem:[#allocation32_spill] sm:$0xff] %v4277_v16  ;;  %5367 = vst [vmem:[#allocation33_spill] sm:$0xff] %v4280_v2  ;;  %v739_v3 = vadd.f32 %v675_v10, %v523_v62  ;;  %v339_v19 = vmul.f32 %v5273_v28, %v5360_v20  ;;  %v5189_v39 = vmax.f32 %v4277_v16, 0.0  ;;  %v5188_v43 = vmax.f32 %v4280_v2, 0.0 }
 0x158   :  { %1443 = vperm.xlu1 %2890, %v1268_v42   ;;  %v740_v54 = vadd.f32 %v676_v8, %v524_v4  ;;  %v340_v52 = vmul.f32 %v3369_v13, %v5360_v20  ;;  %1452 = vperm.xlu0 %2889, %v1271_v63   ;;  %v491_v33 = vmul.f32 %v3341_v36, %v5361_v41 }
 0x159   :  { %v955_v55 = vadd.f32 %v891_v44, %v739_v3  ;;  %v492_v47 = vmul.f32 %v5275_v17, %v5361_v41  ;;  %v707_v28 = vmul.f32 %v5276_v57, %v5362_v15  ;;  %v1171_v48 = vpack.c.bf16 %v5188_v43, %v5189_v39  ;;  %v5430_v39 = vld [vmem:[#allocation54_spill] sm:$0xff] }
 0x15a   :  { %v956_v35 = vadd.f32 %v892_v30, %v740_v54  ;;  %v708_v13 = vmul.f32 %v3447_v46, %v5362_v15  ;;  %v923_v20 = vmul.f32 %v3449_v53, %v5364_v37  ;;  %v555_v31 = vadd.f32 %v491_v33, %v339_v19 }
 0x15b   :  { %v4307_v36 = vadd.f32 %v3495_v11, %v955_v55  ;;  %v556_v17 = vadd.f32 %v492_v47, %v340_v52  ;;  %v924_v57 = vmul.f32 %v3493_v6, %v5364_v37  ;;  %v1274_v41 = vunpack.c.h.b16 %v1171_v48 }
 0x15c   :  { %v1273_v42 = vunpack.c.l.b16 %v1171_v48  ;;  %v4312_v51 = vadd.f32 %v3547_v24, %v956_v35  ;;  %v771_v29 = vadd.f32 %v707_v28, %v555_v31  ;;  %v1240_v37 = vunpack.c.h.b16 %v4216_v27  ;;  %v2907_v28 = vld [vmem:[%s5028_s2] sm:$0xff]  }
 0x15d   :  { %v772_v18 = vadd.f32 %v708_v13, %v556_v17  ;;  %1461 = vperm.xlu0 %2889, %v1274_v41   ;;  %v1107_v46 = vmax.f32 %v4307_v36, 0.0  ;;  %v1272_v19 = vunpack.c.h.b16 %v1170_v7  ;;  %v5183_v7 = vmov 0.0  }
 0x15e   :  { %1458 = vperm.xlu1 %2890, %v1273_v42   ;;  %v1108_v53 = vmax.f32 %v4312_v51, 0.0  ;;  %v987_v15 = vadd.f32 %v923_v20, %v771_v29  ;;  %2845 = vmatprep.subr.bf16.mxu0 %v5183_v7  ;;  %v5370_v48 = vmax.f32 %v3475_v0, 0.0  ;;  %v2908_v20 = vld [vmem:[%s5028_s2 + $0x8] sm:$0xff]   ;;  %v5371_v31 = vmax.f32 %v3525_v56, 0.0 }
 0x15f   :  { %v988_v62 = vadd.f32 %v924_v57, %v772_v18  ;;  %2853 = vmatprep.subr.bf16.mxu1 %v5183_v7  ;;  %2846 = vmatpush3.bf16.msra.mxu0 %v2907_v28  ;;  %v5372_v17 = vmax.f32 %v3508_v5, 0.0  ;;  %v5373_v56 = vmax.f32 %v3578_v21, 0.0  ;;  %v5374_v5 = vmax.f32 %v3480_v59, 0.0 }
 0x160   :  { %v1156_v6 = vpack.c.bf16 %v1108_v53, %v1107_v46  ;;  %v4322_v10 = vadd.f32 %v3495_v11, %v987_v15  ;;  %2847 = vmatprep.subr.bf16.mxu0 %v5183_v7  ;;  %2849 = vmatprep.mubr.msk.bf16.mxu0 %vm2936_vm1, %v5183_v7  ;;  %v5375_v29 = vmax.f32 %v3528_v32, 0.0  ;;  %v5376_v18 = vmax.f32 %v3502_v12, 0.0 }
 0x161   :  { %v4325_v8 = vadd.f32 %v3547_v24, %v988_v62  ;;  %v4329_v3 = vpop.permute.xlu1 %1281  ;;  %v4331_v30 = vpop.permute.xlu0 %1278  ;;  %2869 = vmatprep.mubr.msk.bf16.mxu1 %vm2936_vm1, %v5183_v7  ;;  %v5377_v21 = vmax.f32 %v3575_v61, 0.0  ;;  %v5378_v59 = vmax.f32 %v3513_v25, 0.0  ;;  %v5431_v1 = vmax.f32 %v5430_v39, 0.0  ;;  %v5439_v39 = vld [vmem:[#allocation8_spill] sm:$0xff] }
 0x162   :  { %5368 = vst [vmem:[#allocation26_spill] sm:$0xff] %v4322_v10  ;;  %v1243_v4 = vunpack.c.l.b16 %v1156_v6  ;;  %1359 = vperm.xlu1 %2890, %v1240_v37   ;;  %v5186_v44 = vmax.f32 %v4322_v10, 0.0  ;;  %v1244_v52 = vunpack.c.h.b16 %v1156_v6 }
 0x163   :  { %5369 = vst [vmem:[#allocation27_spill] sm:$0xff] %v4325_v8  ;;  %v5185_v63 = vmax.f32 %v4325_v8, 0.0  ;;  %2848 = vmatpush3.bf16.msra.mxu0 %v2908_v20  ;;  %v5387_v20 = vld [vmem:[#allocation9_spill] sm:$0xff] }
 0x164   :  { %1368 = vperm.xlu0 %2889, %v1243_v4   ;;  %2873 = vmatprep.subr.bf16.mxu0 %v5183_v7  ;;  %v5379_v4 = vld [vmem:[#allocation64_spill] sm:$0xff] }
 0x165   :  { %v1172_v11 = vpack.c.bf16 %v5185_v63, %v5186_v44  ;;  %v4337_v27 = vpop.permute.xlu1 %1290  ;;  %v4339_v54 = vpop.permute.xlu0 %1293  ;;  %v5380_v32 = vmax.f32 %v5379_v4, 0.0  ;;  %v5421_v63 = vld [vmem:[#allocation63_spill] sm:$0xff] }
 0x166   :  { %1455 = vperm.xlu1 %2890, %v1272_v19   ;;  %v5381_v19 = vld [vmem:[#allocation53_spill] sm:$0xff] }
 0x167   :  { %v1275_v24 = vunpack.c.l.b16 %v1172_v11  ;;  %v1276_v55 = vunpack.c.h.b16 %v1172_v11  ;;  %v5382_v12 = vmax.f32 %v5381_v19, 0.0  ;;  %v5394_v19 = vld [vmem:[#allocation55_spill] sm:$0xff] }
 0x169   :  { %1464 = vperm.xlu0 %2889, %v1275_v24   ;;  %v4341_v33 = vpop.permute.xlu1 %1374  ;;  %v4343_v47 = vpop.permute.xlu0 %1377 }
 0x16a   :  { %1371 = vperm.xlu1 %2890, %v1244_v52   ;;  %v5383_v52 = vld [vmem:[#allocation10_spill] sm:$0xff] }
 0x16b   :  { %v5384_v61 = vmax.f32 %v5383_v52, 0.0  ;;  %v5396_v52 = vmax.f32 %v3947_v60, 0.0  ;;  %v5403_v60 = vmax.f32 %v4068_v45, 0.0  ;;  %v5408_v45 = vmax.f32 %v4190_v9, 0.0 }
 0x16d   :  { %1467 = vperm.xlu0 %2889, %v1276_v55   ;;  %v4352_v35 = vpop.permute.xlu1 %1386  ;;  %v4354_v13 = vpop.permute.xlu0 %1389  ;;  %v5385_v55 = vld [vmem:[#allocation17_spill] sm:$0xff] }
 0x16e   :  { %2280 = vperm.xlu1 %2890, %v5370_v48   ;;  %v5386_v25 = vmax.f32 %v5385_v55, 0.0 }
 0x171   :  { %2283 = vperm.xlu0 %2889, %v5371_v31   ;;  %v4364_v0 = vpop.permute.xlu1 %1284  ;;  %v4366_v57 = vpop.permute.xlu0 %1296  ;;  %v5388_v31 = vmax.f32 %v5387_v20, 0.0 }
 0x172   :  { %2286 = vperm.xlu1 %2890, %v5372_v17   ;;  %v5389_v17 = vld [vmem:[#allocation12_spill] sm:$0xff] }
 0x175   :  { %2289 = vperm.xlu0 %2889, %v5373_v56   ;;  %v4377_v41 = vpop.permute.xlu1 %1302  ;;  %v4379_v42 = vpop.permute.xlu0 %1305  ;;  %v5390_v56 = vmax.f32 %v5389_v17, 0.0 }
 0x176   :  { %2292 = vperm.xlu1 %2890, %v5374_v5  }
 0x179   :  { %2295 = vperm.xlu0 %2889, %v5375_v29   ;;  %v4385_v15 = vpop.permute.xlu1 %1380  ;;  %v4387_v62 = vpop.permute.xlu0 %1392 }
 0x17a   :  { %2298 = vperm.xlu1 %2890, %v5376_v18   ;;  %v5391_v18 = vld [vmem:[#allocation52_spill] sm:$0xff] }
 0x17d   :  { %2301 = vperm.xlu0 %2889, %v5377_v21   ;;  %v4393_v6 = vpop.permute.xlu1 %1398  ;;  %v4395_v37 = vpop.permute.xlu0 %1401  ;;  %v5392_v21 = vmax.f32 %v5391_v18, 0.0  ;;  %v5401_v18 = vld [vmem:[#allocation23_spill] sm:$0xff] }
 0x17e   :  { %2304 = vperm.xlu1 %2890, %v5378_v59   ;;  %v5393_v59 = vmax.f32 %v3848_v14, 0.0 }
 0x181   :  { %2307 = vperm.xlu0 %2889, %v5380_v32   ;;  %v4403_v24 = vpop.permute.xlu0 %1299 }
 0x182   :  { %2310 = vperm.xlu1 %2890, %v5382_v12   ;;  %v4401_v11 = vpop.permute.xlu1 %1287  ;;  %v5395_v12 = vmax.f32 %v5394_v19, 0.0 }
 0x185   :  { %2313 = vperm.xlu0 %2889, %v5384_v61   ;;  %v4411_v48 = vpop.permute.xlu0 %1314 }
 0x186   :  { %2316 = vperm.xlu1 %2890, %v5386_v25   ;;  %v4409_v28 = vpop.permute.xlu1 %1308  ;;  %v5397_v25 = vld [vmem:[#allocation22_spill] sm:$0xff] }
 0x187   :  { %v5398_v20 = vmax.f32 %v5397_v25, 0.0 }
 0x189   :  { %2319 = vperm.xlu0 %2889, %v5388_v31   ;;  %v5399_v31 = vld [vmem:[#allocation47_spill] sm:$0xff] }
 0x18a   :  { %2322 = vperm.xlu1 %2890, %v5390_v56   ;;  %v4417_v5 = vpop.permute.xlu1 %1317  ;;  %v4419_v29 = vpop.permute.xlu0 %1383  ;;  %v5400_v14 = vmax.f32 %v5399_v31, 0.0  ;;  %v5406_v31 = vld [vmem:[#allocation18_spill] sm:$0xff] }
 0x18d   :  { %2325 = vperm.xlu0 %2889, %v5392_v21   ;;  %v5402_v21 = vmax.f32 %v5401_v18, 0.0 }
 0x18e   :  { %2328 = vperm.xlu1 %2890, %v5393_v59   ;;  %v4425_v4 = vpop.permute.xlu1 %1395  ;;  %v4427_v32 = vpop.permute.xlu0 %1404 }
 0x191   :  { %2331 = vperm.xlu0 %2889, %v5395_v12   ;;  %v5404_v12 = vmax.f32 %v4071_v23, 0.0  ;;  %v5409_v23 = vmax.f32 %v4195_v50, 0.0  ;;  %v5411_v50 = vld [vmem:[#allocation59_spill] sm:$0xff] }
 0x192   :  { %2334 = vperm.xlu1 %2890, %v5396_v52   ;;  %v4433_v61 = vpop.permute.xlu1 %1410  ;;  %v4435_v55 = vpop.permute.xlu0 %1413  ;;  %v5405_v52 = vmax.f32 %v4097_v58, 0.0  ;;  %v5410_v58 = vmax.f32 %v4219_v40, 0.0  ;;  %v5412_v40 = vmax.f32 %v5411_v50, 0.0 }
 0x195   :  { %2337 = vperm.xlu0 %2889, %v5398_v20  }
 0x196   :  { %2340 = vperm.xlu1 %2890, %v5400_v14   ;;  %v4441_v17 = vpop.permute.xlu1 %1311  ;;  %v4443_v56 = vpop.permute.xlu0 %1320  ;;  %v5407_v14 = vmax.f32 %v5406_v31, 0.0 }
 0x199   :  { %2343 = vperm.xlu0 %2889, %v5402_v21  }
 0x19a   :  { %2346 = vperm.xlu1 %2890, %v5403_v60   ;;  %v4449_v59 = vpop.permute.xlu1 %1326  ;;  %v4451_v19 = vpop.permute.xlu0 %1329 }
 0x19d   :  { %2349 = vperm.xlu0 %2889, %v5404_v12  }
 0x19e   :  { %2352 = vperm.xlu1 %2890, %v5405_v52   ;;  %v4459_v20 = vpop.permute.xlu0 %1416 }
 0x19f   :  { %v4457_v25 = vpop.permute.xlu1 %1407 }
 0x1a1   :  { %2355 = vperm.xlu0 %2889, %v5407_v14  }
 0x1a2   :  { %2358 = vperm.xlu1 %2890, %v5408_v45   ;;  %v4467_v21 = vpop.permute.xlu0 %1425  ;;  %v5413_v45 = vld [vmem:[#allocation62_spill] sm:$0xff] }
 0x1a3   :  { %v4465_v18 = vpop.permute.xlu1 %1422  ;;  %v5414_v34 = vmax.f32 %v5413_v45, 0.0  ;;  %v5422_v45 = vmax.f32 %v5421_v63, 0.0  ;;  %v5432_v63 = vld [vmem:[#allocation57_spill] sm:$0xff] }
 0x1a5   :  { %2361 = vperm.xlu0 %2889, %v5409_v23  }
 0x1a6   :  { %2364 = vperm.xlu1 %2890, %v5410_v58   ;;  %v4475_v12 = vpop.permute.xlu0 %1332  ;;  %v5417_v58 = vld [vmem:[#allocation67_spill] sm:$0xff] }
 0x1a7   :  { %v4473_v60 = vpop.permute.xlu1 %1323  ;;  %v5418_v51 = vmax.f32 %v5417_v58, 0.0  ;;  %v5427_v58 = vld [vmem:[#allocation16_spill] sm:$0xff] }
 0x1a9   :  { %2367 = vperm.xlu0 %2889, %v1106_v22   ;;  %v5415_v22 = vld [vmem:[#allocation66_spill] sm:$0xff] }
 0x1aa   :  { %2370 = vperm.xlu1 %2890, %v1107_v46   ;;  %v4483_v52 = vpop.permute.xlu0 %1341  ;;  %v5416_v36 = vmax.f32 %v5415_v22, 0.0 }
 0x1ab   :  { %v4481_v9 = vpop.permute.xlu1 %1338 }
 0x1ad   :  { %2373 = vperm.xlu0 %2889, %v1108_v53   ;;  %v5419_v53 = vld [vmem:[#allocation60_spill] sm:$0xff] }
 0x1ae   :  { %2376 = vperm.xlu1 %2890, %v5412_v40   ;;  %v4491_v14 = vpop.permute.xlu0 %1428  ;;  %v5420_v50 = vmax.f32 %v5419_v53, 0.0 }
 0x1af   :  { %v4489_v31 = vpop.permute.xlu1 %1419 }
 0x1b1   :  { %2379 = vperm.xlu0 %2889, %v5414_v34   ;;  %v5423_v34 = vld [vmem:[#allocation61_spill] sm:$0xff] }
 0x1b2   :  { %2382 = vperm.xlu1 %2890, %v5416_v36   ;;  %v4499_v23 = vpop.permute.xlu0 %1437  ;;  %v5424_v22 = vmax.f32 %v5423_v34, 0.0  ;;  %v5425_v36 = vld [vmem:[#allocation65_spill] sm:$0xff] }
 0x1b3   :  { %v4497_v46 = vpop.permute.xlu1 %1434  ;;  %v5426_v44 = vmax.f32 %v5425_v36, 0.0  ;;  %v5434_v36 = vld [vmem:[#allocation58_spill] sm:$0xff] }
 0x1b4   :  { %v5435_v8 = vmax.f32 %v5434_v36, 0.0  ;;  %v5442_v36 = vld [vmem:[#allocation13_spill] sm:$0xff] }
 0x1b5   :  { %2385 = vperm.xlu0 %2889, %v5418_v51   ;;  %v5428_v51 = vmax.f32 %v5427_v58, 0.0  ;;  %v5436_v58 = vld [vmem:[#allocation7_spill] sm:$0xff] }
 0x1b6   :  { %2388 = vperm.xlu1 %2890, %v5420_v50   ;;  %v5429_v50 = vlaneseq }
 0x1b7   :  { %v4505_v40 = vpop.permute.xlu1 %1335  ;;  %v4507_v7 = vpop.permute.xlu0 %1344 }
 0x1b8   :  { %v1470_v43 = vand.u32 127, %v5429_v50  ;;  %v5438_v50 = vld [vmem:[#allocation2_spill] sm:$0xff] }
 0x1b9   :  { %2391 = vperm.xlu0 %2889, %v5422_v45   ;;  %v5433_v45 = vmax.f32 %v5432_v63, 0.0  ;;  %v5440_v63 = vmax.f32 %v5439_v39, 0.0 }
 0x1ba   :  { %2394 = vperm.xlu1 %2890, %v5424_v22   ;;  %v1482_v10 = vadd.s32 4294967280, %v1470_v43  ;;  %v1489_v49 = vadd.s32 4294967272, %v1470_v43  ;;  %v4535_v2 = vsub.s32 %v1470_v43, %v5438_v50 }
 0x1bc   :  { %v4515_v26 = vpop.permute.xlu1 %1350  ;;  %v4519_v53 = vpop.permute.xlu0 %1353  ;;  %v1499_v39 = vrot.slane %v4337_v27, %v4535_v2 }
 0x1bd   :  { %2397 = vperm.xlu0 %2889, %v5426_v44   ;;  %v1475_v44 = vadd.s32 4294967288, %v1470_v43 }
 0x1be   :  { %2400 = vperm.xlu1 %2890, %v5428_v51   ;;  %v5437_v51 = vmax.f32 %v5436_v58, 0.0  ;;  %v4549_v58 = vsub.s32 %v1482_v10, %v5438_v50 }
 0x1c0   :  { %v4526_v34 = vpop.permute.xlu1 %1431 }
 0x1c1   :  { %2403 = vperm.xlu0 %2889, %v5431_v1   ;;  %v4538_v1 = vsub.s32 %v1475_v44, %v5438_v50  ;;  %v1474_v44 = vrot.slane %v4331_v30, %v4535_v2 }
 0x1c2   :  { %2406 = vperm.xlu1 %2890, %v5433_v45   ;;  %v4528_v22 = vpop.permute.xlu0 %1440 }
 0x1c3   :  { %v1479_v43 = vrot.slane %v4329_v3, %v4538_v1  ;;  %v1486_v3 = vrot.slane %v4364_v0, %v4549_v58  ;;  %v1636_v0 = vrot.slane %v4343_v47, %v4538_v1  ;;  %v1522_v47 = vrot.slane %v4379_v42, %v4538_v1 }
 0x1c5   :  { %2409 = vperm.xlu0 %2889, %v5435_v8   ;;  %v5443_v8 = vmax.f32 %v5442_v36, 0.0  ;;  %v5444_v36 = vld [vmem:[#allocation14_spill] sm:$0xff]  ;;  %v1481_v30 = vsel %vm1480_vm2, %v1479_v43, %v1474_v44  ;;  %v1651_v43 = vrot.slane %v4352_v35, %v4535_v2 }
 0x1c6   :  { %2412 = vperm.xlu1 %2890, %v5437_v51   ;;  %v4552_v51 = vsub.s32 %v1489_v49, %v5438_v50  ;;  %v5446_v49 = vld [vmem:[#allocation15_spill] sm:$0xff] }
 0x1c7   :  { %v5447_v50 = vmax.f32 %v5446_v49, 0.0  ;;  %v1632_v49 = vrot.slane %v4341_v33, %v4535_v2  ;;  %v1518_v33 = vrot.slane %v4377_v41, %v4535_v2 }
 0x1c8   :  { %v1513_v44 = vrot.slane %v4403_v24, %v4552_v51  ;;  %v1641_v24 = vrot.slane %v4385_v15, %v4549_v58 }
 0x1c9   :  { %2415 = vperm.xlu0 %2889, %v5440_v63   ;;  %v4542_v45 = vpop.permute.xlu1 %1446  ;;  %v4544_v16 = vpop.permute.xlu0 %1449  ;;  %v1503_v63 = vrot.slane %v4339_v54, %v4538_v1  ;;  %v1508_v54 = vrot.slane %v4366_v57, %v4549_v58 }
 0x1ca   :  { %5441 = vst [vmem:[#allocation28_spill] sm:$0xff] %v4544_v16  ;;  %2418 = vperm.xlu1 %2890, %v5443_v8   ;;  %v5445_v8 = vmax.f32 %v5444_v36, 0.0  ;;  %v1493_v36 = vrot.slane %v4401_v11, %v4552_v51  ;;  %v1655_v11 = vrot.slane %v4354_v13, %v4538_v1  ;;  %v1670_v13 = vrot.slane %v4393_v6, %v4535_v2 }
 0x1cb   :  { %v1504_v27 = vsel %vm1480_vm2, %v1503_v63, %v1499_v39  ;;  %v5450_v39 = vld [vmem:[#allocation46_spill] sm:$0xff]  ;;  %v1488_v63 = vsel %vm1487_vm3, %v1486_v3, %v1481_v30  ;;  %v1674_v3 = vrot.slane %v4395_v37, %v4538_v1  ;;  %v1665_v30 = vrot.slane %v4425_v4, %v4552_v51 }
 0x1cc   :  { %v5451_v57 = vmax.f32 %v5450_v39, 0.0  ;;  %v1509_v41 = vsel %vm1487_vm3, %v1508_v54, %v1504_v27  ;;  %v1495_v42 = vsel %vm1494_vm4, %v1493_v36, %v1488_v63  ;;  %v5452_v39 = vld [vmem:[#allocation25_spill] sm:$0xff]  ;;  %v1541_v6 = vrot.slane %v4417_v5, %v4538_v1  ;;  %v5454_v27 = vld [vmem:[#allocation11_spill] sm:$0xff] }
 0x1cd   :  { %2424 = vperm.xlu0 %2889, %v5445_v8   ;;  %v4564_v10 = vpop.permute.xlu1 %1347  ;;  %v4568_v16 = vpop.permute.xlu0 %1356  ;;  %v5448_v8 = vld [vmem:[#allocation56_spill] sm:$0xff]  ;;  %v1514_v15 = vsel %vm1494_vm4, %v1513_v44, %v1509_v41  ;;  %v1646_v37 = vrot.slane %v4419_v29, %v4552_v51  ;;  %v5455_v54 = vmax.f32 %v5454_v27, 0.0  ;;  %v1637_v4 = vsel %vm1480_vm2, %v1636_v0, %v1632_v49  ;;  %v5460_v27 = vld [vmem:[#allocation21_spill] sm:$0xff] }
 0x1ce   :  { %2427 = vperm.xlu1 %2890, %v5447_v50   ;;  %v5449_v50 = vmax.f32 %v5448_v8, 0.0  ;;  %v1656_v36 = vsel %vm1480_vm2, %v1655_v11, %v1651_v43  ;;  %v1523_v63 = vsel %vm1480_vm2, %v1522_v47, %v1518_v33  ;;  %v1679_v44 = vrot.slane %v4427_v32, %v4549_v58  ;;  %v5456_v33 = vld [vmem:[#allocation24_spill] sm:$0xff] }
 0x1cf   :  { %v1642_v5 = vsel %vm1487_vm3, %v1641_v24, %v1637_v4  ;;  %v1675_v29 = vsel %vm1480_vm2, %v1674_v3, %v1670_v13  ;;  %v1782_v0 = vsel %vm1781_vm5, %v1514_v15, %v1495_v42  ;;  %v1532_v32 = vrot.slane %v4441_v17, %v4552_v51  ;;  %v5458_v3 = vld [vmem:[#allocation19_spill] sm:$0xff] }
 0x1d0   :  { %v1684_v11 = vrot.slane %v4457_v25, %v4552_v51  ;;  %v5457_v47 = vmax.f32 %v5456_v33, 0.0  ;;  %v1546_v13 = vrot.slane %v4443_v56, %v4549_v58  ;;  %v5459_v42 = vmax.f32 %v5458_v3, 0.0 }
 0x1d1   :  { %2421 = vperm.xlu0 %2889, %v5449_v50   ;;  %v1660_v50 = vrot.slane %v4387_v62, %v4549_v58  ;;  %v1527_v62 = vrot.slane %v4409_v28, %v4549_v58  ;;  %v1680_v17 = vsel %vm1487_vm3, %v1679_v44, %v1675_v29  ;;  %v1689_v25 = vrot.slane %v4433_v61, %v4535_v2 }
 0x1d2   :  { %2430 = vperm.xlu1 %2890, %v5451_v57   ;;  %v5453_v57 = vmax.f32 %v5452_v39, 0.0  ;;  %v1537_v39 = vrot.slane %v4411_v48, %v4535_v2  ;;  %v1647_v48 = vsel %vm1494_vm4, %v1646_v37, %v1642_v5  ;;  %v1560_v56 = vrot.slane %v4451_v19, %v4538_v1 }
 0x1d3   :  { %v4597_v8 = vpop.permute.xlu1 %1362  ;;  %v4599_v35 = vpop.permute.xlu0 %1365  ;;  %v1661_v41 = vsel %vm1487_vm3, %v1660_v50, %v1656_v36  ;;  %v1528_v24 = vsel %vm1487_vm3, %v1527_v62, %v1523_v63  ;;  %v1556_v62 = vrot.slane %v4449_v59, %v4535_v2  ;;  %v1685_v61 = vsel %vm1494_vm4, %v1684_v11, %v1680_v17  ;;  %v5462_v63 = vld [vmem:[#allocation30_spill] sm:$0xff] }
 0x1d4   :  { %v1666_v43 = vsel %vm1494_vm4, %v1665_v30, %v1661_v41  ;;  %v1542_v50 = vsel %vm1480_vm2, %v1541_v6, %v1537_v39  ;;  %v1693_v30 = vrot.slane %v4435_v55, %v4538_v1  ;;  %v1698_v6 = vrot.slane %v4459_v20, %v4549_v58 }
 0x1d5   :  { %2436 = vperm.xlu0 %2889, %v5453_v57   ;;  %v1551_v57 = vrot.slane %v4473_v60, %v4552_v51  ;;  %v1795_v15 = vsel %vm1781_vm5, %v1666_v43, %v1647_v48  ;;  %v1533_v37 = vsel %vm1494_vm4, %v1532_v32, %v1528_v24  ;;  %v1708_v55 = vrot.slane %v4465_v18, %v4535_v2 }
 0x1d6   :  { %2439 = vperm.xlu1 %2890, %v5455_v54   ;;  %v1712_v60 = vrot.slane %v4467_v21, %v4538_v1  ;;  %v5461_v54 = vmax.f32 %v5460_v27, 0.0  ;;  %v1547_v19 = vsel %vm1487_vm3, %v1546_v13, %v1542_v50  ;;  %v1565_v20 = vrot.slane %v4475_v12, %v4549_v58 }
 0x1d7   :  { %v4629_v28 = vpop.permute.xlu1 %1443  ;;  %v4636_v49 = vpop.permute.xlu0 %1452  ;;  %v1575_v36 = vrot.slane %v4481_v9, %v4535_v2  ;;  %v1579_v18 = vrot.slane %v4483_v52, %v4538_v1  ;;  %v5463_v21 = vmax.f32 %v5462_v63, 0.0  ;;  %v1694_v44 = vsel %vm1480_vm2, %v1693_v30, %v1689_v25  ;;  %v5467_v25 = vld [vmem:[#allocation28_spill] sm:$0xff]  ;;  %v5472_v63 = vld [vmem:[#allocation31_spill] sm:$0xff] }
 0x1d8   :  { %v1552_v5 = vsel %vm1494_vm4, %v1551_v57, %v1547_v19  ;;  %v1703_v41 = vrot.slane %v4489_v31, %v4552_v51  ;;  %v1717_v29 = vrot.slane %v4491_v14, %v4549_v58  ;;  %v1784_v12 = vsel %vm1783_vm6, %v1533_v37, %v1782_v0  ;;  %v5464_v0 = vld [vmem:[#allocation20_spill] sm:$0xff] }
 0x1d9   :  { %2433 = vperm.xlu0 %2889, %v5457_v47   ;;  %v1561_v9 = vsel %vm1480_vm2, %v1560_v56, %v1556_v62  ;;  %v1796_v39 = vsel %vm1783_vm6, %v1685_v61, %v1795_v15  ;;  %v1699_v52 = vsel %vm1487_vm3, %v1698_v6, %v1694_v44  ;;  %v1713_v43 = vsel %vm1480_vm2, %v1712_v60, %v1708_v55  ;;  %v5470_v61 = vld [vmem:[#allocation33_spill] sm:$0xff] }
 0x1da   :  { %2442 = vperm.xlu1 %2890, %v5459_v42   ;;  %v1727_v32 = vrot.slane %v4497_v46, %v4535_v2  ;;  %v1731_v31 = vrot.slane %v4499_v23, %v4538_v1  ;;  %v1570_v14 = vrot.slane %v4505_v40, %v4552_v51  ;;  %v5465_v11 = vmax.f32 %v5464_v0, 0.0 }
 0x1db   :  { %v1786_v47 = vsel %vm1785_vm7, %v1552_v5, %v1784_v12  ;;  %v1566_v24 = vsel %vm1487_vm3, %v1565_v20, %v1561_v9  ;;  %v1580_v50 = vsel %vm1480_vm2, %v1579_v18, %v1575_v36  ;;  %v1584_v46 = vrot.slane %v4507_v7, %v4549_v58  ;;  %v5474_v9 = vld [vmem:[#allocation26_spill] sm:$0xff] }
 0x1dc   :  { %v4677_v4 = vpop.permute.xlu0 %1461  ;;  %v5466_v23 = vmax.f32 %v4250_v38, 0.0  ;;  %v1704_v40 = vsel %vm1494_vm4, %v1703_v41, %v1699_v52  ;;  %v1718_v48 = vsel %vm1487_vm3, %v1717_v29, %v1713_v43  ;;  %v1594_v13 = vrot.slane %v4515_v26, %v4535_v2 }
 0x1dd   :  { %2448 = vperm.xlu0 %2889, %v5461_v54   ;;  %v4675_v59 = vpop.permute.xlu1 %1458  ;;  %v1598_v3 = vrot.slane %v4519_v53, %v4538_v1  ;;  %v1722_v17 = vrot.slane %v4526_v34, %v4552_v51  ;;  %v1736_v7 = vrot.slane %v4528_v22, %v4549_v58  ;;  %v1746_v38 = vrot.slane %v4542_v45, %v4535_v2  ;;  %v5468_v34 = vld [vmem:[#allocation32_spill] sm:$0xff] }
 0x1de   :  { %2451 = vperm.xlu1 %2890, %v5463_v21   ;;  %v1750_v30 = vrot.slane %v5467_v25, %v4538_v1  ;;  %v1732_v57 = vsel %vm1480_vm2, %v1731_v31, %v1727_v32  ;;  %v1571_v26 = vsel %vm1494_vm4, %v1570_v14, %v1566_v24  ;;  %v1589_v53 = vrot.slane %v4564_v10, %v4552_v51 }
 0x1df   :  { %v1603_v15 = vrot.slane %v4568_v16, %v4549_v58  ;;  %v5469_v62 = vmax.f32 %v5468_v34, 0.0  ;;  %v1585_v56 = vsel %vm1487_vm3, %v1584_v46, %v1580_v50  ;;  %v1613_v45 = vrot.slane %v4597_v8, %v4535_v2 }
 0x1e0   :  { %v1617_v6 = vrot.slane %v4599_v35, %v4538_v1  ;;  %v5471_v55 = vmax.f32 %v5470_v61, 0.0  ;;  %v1599_v10 = vsel %vm1480_vm2, %v1598_v3, %v1594_v13  ;;  %v1741_v16 = vrot.slane %v4629_v28, %v4552_v51 }
 0x1e1   :  { %2445 = vperm.xlu0 %2889, %v5465_v11   ;;  %v1360_v33 = vpop.permute.xlu1 %1359  ;;  %v1755_v60 = vrot.slane %v4636_v49, %v4549_v58  ;;  %v1723_v8 = vsel %vm1494_vm4, %v1722_v17, %v1718_v48  ;;  %v1737_v54 = vsel %vm1487_vm3, %v1736_v7, %v1732_v57  ;;  %v1751_v35 = vsel %vm1480_vm2, %v1750_v30, %v1746_v38 }
 0x1e2   :  { %2454 = vperm.xlu1 %2890, %v5466_v23   ;;  %v1608_v37 = vrot.slane %v1360_v33, %v4552_v51  ;;  %v1590_v36 = vsel %vm1494_vm4, %v1589_v53, %v1585_v56  ;;  %v1604_v18 = vsel %vm1487_vm3, %v1603_v15, %v1599_v10  ;;  %v1765_v28 = vrot.slane %v4675_v59, %v4535_v2  ;;  %v5476_v23 = vld [vmem:[#allocation27_spill] sm:$0xff] }
 0x1e3   :  { %v1369_v42 = vpop.permute.xlu0 %1368  ;;  %v1769_v49 = vrot.slane %v4677_v4, %v4538_v1  ;;  %v5473_v21 = vmax.f32 %v5472_v63, 0.0  ;;  %v1618_v5 = vsel %vm1480_vm2, %v1617_v6, %v1613_v45  ;;  %v5475_v52 = vmax.f32 %v5474_v9, 0.0 }
 0x1e4   :  { %v1622_v27 = vrot.slane %v1369_v42, %v4549_v58  ;;  %v1609_v41 = vsel %vm1494_vm4, %v1608_v37, %v1604_v18  ;;  %v1788_v59 = vsel %vm1787_vm8, %v1571_v26, %v1786_v47  ;;  %v1742_v43 = vsel %vm1494_vm4, %v1741_v16, %v1737_v54 }
 0x1e5   :  { %2460 = vperm.xlu0 %2889, %v5469_v62   ;;  %v1456_v22 = vpop.permute.xlu1 %1455  ;;  %v1756_v4 = vsel %vm1487_vm3, %v1755_v60, %v1751_v35  ;;  %v1797_v31 = vsel %vm1785_vm7, %v1704_v40, %v1796_v39  ;;  %v1790_v14 = vsel %vm1789_vm9, %v1590_v36, %v1788_v59  ;;  %v1770_v50 = vsel %vm1480_vm2, %v1769_v49, %v1765_v28 }
 0x1e6   :  { %2463 = vperm.xlu1 %2890, %v5471_v55   ;;  %v1760_v19 = vrot.slane %v1456_v22, %v4552_v51  ;;  %v1623_v32 = vsel %vm1487_vm3, %v1622_v27, %v1618_v5  ;;  %v1798_v24 = vsel %vm1787_vm8, %v1723_v8, %v1797_v31  ;;  %v1792_v47 = vsel %vm1791_vm10, %v1609_v41, %v1790_v14 }
 0x1e7   :  { %v5477_v48 = vmax.f32 %v5476_v23, 0.0  ;;  %v1799_v39 = vsel %vm1789_vm9, %v1742_v43, %v1798_v24  ;;  %v5478_v22 = vmov 0.0  }
 0x1e8   :  { %v1465_v20 = vpop.permute.xlu0 %1464  ;;  %v1761_v0 = vsel %vm1494_vm4, %v1760_v19, %v1756_v4 }
 0x1e9   :  { %2457 = vperm.xlu0 %2889, %v5473_v21   ;;  %v1372_v44 = vpop.permute.xlu1 %1371  ;;  %v1774_v29 = vrot.slane %v1465_v20, %v4549_v58  ;;  %v1800_v42 = vsel %vm1791_vm10, %v1761_v0, %v1799_v39 }
 0x1ea   :  { %v1627_v12 = vrot.slane %v1372_v44, %v4552_v51  ;;  %2466 = vperm.xlu1 %2890, %v5475_v52  }
 0x1eb   :  { %v1775_v40 = vsel %vm1487_vm3, %v1774_v29, %v1770_v50 }
 0x1ec   :  { %v1628_v11 = vsel %vm1494_vm4, %v1627_v12, %v1623_v32  ;;  %v1468_v33 = vpop.permute.xlu0 %1467 }
 0x1ed   :  { %v1779_v46 = vrot.slane %v1468_v33, %v4552_v51  ;;  %2469 = vperm.xlu0 %2889, %v5477_v48   ;;  %v2281_v13 = vpop.permute.xlu1 %2280  ;;  %v1794_v3 = vsel %vm1793_vm11, %v1628_v11, %v1792_v47 }
 0x1ee   :  { %v2474_v7 = vrot.slane %v2281_v13, %v4535_v2 }
 0x1ef   :  { %v1780_v17 = vsel %vm1494_vm4, %v1779_v46, %v1775_v40 }
 0x1f0   :  { %v1801_v38 = vsel %vm1793_vm11, %v1780_v17, %v1800_v42  ;;  %v2284_v25 = vpop.permute.xlu0 %2283 }
 0x1f1   :  { %v2478_v30 = vrot.slane %v2284_v25, %v4538_v1  ;;  %v1802_v57 = vpack.c.b16 %v1801_v38, %v1794_v3  ;;  %v2287_v26 = vpop.permute.xlu1 %2286 }
 0x1f2   :  { %v2483_v53 = vrot.slane %v2287_v26, %v4549_v58 }
 0x1f3   :  { %v2479_v15 = vsel %vm1480_vm2, %v2478_v30, %v2474_v7  ;;  %2850 = vmatmul.mubr.msk.bf16.vlgmr.msra.gmra.mrb[0].mxu0 %vm1815_vm12, %v1802_v57 }
 0x1f4   :  { %v2484_v34 = vsel %vm1487_vm3, %v2483_v53, %v2479_v15  ;;  %v2290_v62 = vpop.permute.xlu0 %2289  ;;  %2881 = vmatprep.mubr.msk.bf16.mxu0 %vm2936_vm1, %v5478_v22 }
 0x1f5   :  { %v2488_v56 = vrot.slane %v2290_v62, %v4552_v51  ;;  %v2293_v45 = vpop.permute.xlu1 %2292 }
 0x1f6   :  { %v2493_v37 = vrot.slane %v2293_v45, %v4535_v2 }
 0x1f7   :  { %v2489_v6 = vsel %vm1494_vm4, %v2488_v56, %v2484_v34 }
 0x1f8   :  { %v2296_v61 = vpop.permute.xlu0 %2295 }
 0x1f9   :  { %v2497_v55 = vrot.slane %v2296_v61, %v4538_v1  ;;  %v2299_v10 = vpop.permute.xlu1 %2298 }
 0x1fa   :  { %v2502_v16 = vrot.slane %v2299_v10, %v4549_v58 }
 0x1fb   :  { %v2498_v60 = vsel %vm1480_vm2, %v2497_v55, %v2493_v37 }
 0x1fc   :  { %v2503_v27 = vsel %vm1487_vm3, %v2502_v16, %v2498_v60  ;;  %v2302_v8 = vpop.permute.xlu0 %2301 }
 0x1fd   :  { %v2507_v54 = vrot.slane %v2302_v8, %v4552_v51  ;;  %v2305_v35 = vpop.permute.xlu1 %2304 }
 0x1fe   :  { %v2512_v20 = vrot.slane %v2305_v35, %v4535_v2 }
 0x1ff   :  { %v2508_v19 = vsel %vm1494_vm4, %v2507_v54, %v2503_v27 }
 0x200   :  { %v2775_v36 = vsel %vm1781_vm5, %v2508_v19, %v2489_v6  ;;  %v2308_v18 = vpop.permute.xlu0 %2307 }
 0x201   :  { %v2516_v28 = vrot.slane %v2308_v18, %v4538_v1  ;;  %v2311_v49 = vpop.permute.xlu1 %2310 }
 0x202   :  { %v2521_v63 = vrot.slane %v2311_v49, %v4549_v58 }
 0x203   :  { %v2517_v21 = vsel %vm1480_vm2, %v2516_v28, %v2512_v20 }
 0x204   :  { %v2522_v44 = vsel %vm1487_vm3, %v2521_v63, %v2517_v21  ;;  %v2314_v5 = vpop.permute.xlu0 %2313 }
 0x205   :  { %v2526_v41 = vrot.slane %v2314_v5, %v4552_v51  ;;  %v2317_v29 = vpop.permute.xlu1 %2316 }
 0x206   :  { %v2531_v9 = vrot.slane %v2317_v29, %v4535_v2 }
 0x207   :  { %v2527_v12 = vsel %vm1494_vm4, %v2526_v41, %v2522_v44 }
 0x208   :  { %v2776_v52 = vsel %vm1783_vm6, %v2527_v12, %v2775_v36  ;;  %v2320_v59 = vpop.permute.xlu0 %2319 }
 0x209   :  { %v2535_v43 = vrot.slane %v2320_v59, %v4538_v1  ;;  %v2323_v4 = vpop.permute.xlu1 %2322  ;;  %v2910_v59 = vld [vmem:[%s5029_s3 + $0x8] sm:$0xff]  }
 0x20a   :  { %v2540_v32 = vrot.slane %v2323_v4, %v4549_v58  ;;  %v2912_v4 = vld [vmem:[%s5029_s3 + $0x18] sm:$0xff]  }
 0x20b   :  { %v2536_v31 = vsel %vm1480_vm2, %v2535_v43, %v2531_v9  ;;  %v2911_v43 = vld [vmem:[%s5029_s3 + $0x10] sm:$0xff]  }
 0x20c   :  { %v2541_v14 = vsel %vm1487_vm3, %v2540_v32, %v2536_v31  ;;  %v2326_v0 = vpop.permute.xlu0 %2325  ;;  %v2913_v32 = vld [vmem:[%s5029_s3 + $0x20] sm:$0xff]   ;;  %v2914_v31 = vld [vmem:[%s5029_s3 + $0x28] sm:$0xff]  }
 0x20d   :  { %v2545_v11 = vrot.slane %v2326_v0, %v4552_v51  ;;  %v2329_v33 = vpop.permute.xlu1 %2328  ;;  %v2916_v0 = vld [vmem:[%s5029_s3 + $0x38] sm:$0xff]  }
 0x20e   :  { %v2550_v50 = vrot.slane %v2329_v33, %v4535_v2  ;;  %v5479_v33 = vld [vmem:[#allocation4_spill] sm:$0xff] }
 0x20f   :  { %v2546_v24 = vsel %vm1494_vm4, %v2545_v11, %v2541_v14  ;;  %v2915_v14 = vld [vmem:[%s5029_s3 + $0x30] sm:$0xff]   ;;  %v4890_v11 = vld [vmem:[%s5027_s5] sm:$0xff] }
 0x210   :  { %v2777_v47 = vsel %vm1785_vm7, %v2546_v24, %v2776_v52  ;;  %v2332_v46 = vpop.permute.xlu0 %2331  ;;  %v2909_v52 = vld [vmem:[%s5029_s3] sm:$0xff]   ;;  %v1180_v24 = vrot.slane %v4890_v11, %v5479_v33 }
 0x211   :  { %v2554_v23 = vrot.slane %v2332_v46, %v4538_v1  ;;  %v2335_v48 = vpop.permute.xlu1 %2334  ;;  %2854 = vmatpush3.bf16.msra.mxu1 %v2909_v52 }
 0x212   :  { %v2559_v13 = vrot.slane %v2335_v48, %v4549_v58  ;;  %2855 = vmatprep.subr.bf16.mxu1 %v5478_v22 }
 0x213   :  { %v2555_v39 = vsel %vm1480_vm2, %v2554_v23, %v2550_v50 }
 0x214   :  { %v2560_v40 = vsel %vm1487_vm3, %v2559_v13, %v2555_v39  ;;  %v2338_v3 = vpop.permute.xlu0 %2337 }
 0x215   :  { %v2564_v42 = vrot.slane %v2338_v3, %v4552_v51  ;;  %v2341_v17 = vpop.permute.xlu1 %2340  ;;  %2856 = vmatpush3.bf16.msra.mxu1 %v2910_v59 }
 0x216   :  { %v2569_v38 = vrot.slane %v2341_v17, %v4535_v2  ;;  %2857 = vmatprep.subr.bf16.mxu1 %v5478_v22 }
 0x217   :  { %v2565_v7 = vsel %vm1494_vm4, %v2564_v42, %v2560_v40 }
 0x218   :  { %v2778_v25 = vsel %vm1787_vm8, %v2565_v7, %v2777_v47  ;;  %v2344_v30 = vpop.permute.xlu0 %2343 }
 0x219   :  { %v2573_v57 = vrot.slane %v2344_v30, %v4538_v1  ;;  %v2347_v26 = vpop.permute.xlu1 %2346  ;;  %2858 = vmatpush3.bf16.msra.mxu1 %v2911_v43 }
 0x21a   :  { %v2578_v53 = vrot.slane %v2347_v26, %v4549_v58  ;;  %2859 = vmatprep.subr.bf16.mxu1 %v5478_v22 }
 0x21b   :  { %v2574_v15 = vsel %vm1480_vm2, %v2573_v57, %v2569_v38 }
 0x21c   :  { %v2579_v34 = vsel %vm1487_vm3, %v2578_v53, %v2574_v15  ;;  %v2350_v62 = vpop.permute.xlu0 %2349 }
 0x21d   :  { %v2583_v56 = vrot.slane %v2350_v62, %v4552_v51  ;;  %v2353_v45 = vpop.permute.xlu1 %2352  ;;  %2860 = vmatpush3.bf16.msra.mxu1 %v2912_v4 }
 0x21e   :  { %v2588_v37 = vrot.slane %v2353_v45, %v4535_v2  ;;  %2861 = vmatprep.subr.bf16.mxu1 %v5478_v22 }
 0x21f   :  { %v2584_v6 = vsel %vm1494_vm4, %v2583_v56, %v2579_v34 }
 0x220   :  { %v2779_v61 = vsel %vm1789_vm9, %v2584_v6, %v2778_v25  ;;  %v2356_v55 = vpop.permute.xlu0 %2355 }
 0x221   :  { %v2592_v10 = vrot.slane %v2356_v55, %v4538_v1  ;;  %v2359_v16 = vpop.permute.xlu1 %2358  ;;  %2862 = vmatpush3.bf16.msra.mxu1 %v2913_v32 }
 0x222   :  { %v2597_v60 = vrot.slane %v2359_v16, %v4549_v58  ;;  %2863 = vmatprep.subr.bf16.mxu1 %v5478_v22 }
 0x223   :  { %v2593_v27 = vsel %vm1480_vm2, %v2592_v10, %v2588_v37 }
 0x224   :  { %v2598_v8 = vsel %vm1487_vm3, %v2597_v60, %v2593_v27  ;;  %v2362_v54 = vpop.permute.xlu0 %2361 }
 0x225   :  { %v2602_v35 = vrot.slane %v2362_v54, %v4552_v51  ;;  %v2365_v19 = vpop.permute.xlu1 %2364  ;;  %2864 = vmatpush3.bf16.msra.mxu1 %v2914_v31 }
 0x226   :  { %v2607_v36 = vrot.slane %v2365_v19, %v4535_v2  ;;  %2865 = vmatprep.subr.bf16.mxu1 %v5478_v22 }
 0x227   :  { %v2603_v20 = vsel %vm1494_vm4, %v2602_v35, %v2598_v8 }
 0x228   :  { %v2368_v18 = vpop.permute.xlu0 %2367  ;;  %v2780_v5 = vsel %vm1791_vm10, %v2603_v20, %v2779_v61 }
 0x229   :  { %v2611_v28 = vrot.slane %v2368_v18, %v4538_v1  ;;  %v2371_v63 = vpop.permute.xlu1 %2370  ;;  %2866 = vmatpush3.bf16.msra.mxu1 %v2915_v14 }
 0x22a   :  { %v2616_v21 = vrot.slane %v2371_v63, %v4549_v58  ;;  %2867 = vmatprep.subr.bf16.mxu1 %v5478_v22  ;;  %v5480_v63 = vld [vmem:[#allocation5_spill] sm:$0xff] }
 0x22b   :  { %v2612_v49 = vsel %vm1480_vm2, %v2611_v28, %v2607_v36 }
 0x22c   :  { %v2374_v44 = vpop.permute.xlu0 %2373  ;;  %v2617_v29 = vsel %vm1487_vm3, %v2616_v21, %v2612_v49  ;;  %v1896_v21 = vrot.slane %v4890_v11, %v5480_v63 }
 0x22d   :  { %v2621_v41 = vrot.slane %v2374_v44, %v4552_v51  ;;  %2868 = vmatpush3.bf16.msra.mxu1 %v2916_v0 }
 0x22f   :  { %v2622_v12 = vsel %vm1494_vm4, %v2621_v41, %v2617_v29 }
 0x230   :  { %v4854_v9 = vsel %vm1793_vm11, %v2622_v12, %v2780_v5  ;;  %v5481_v5 = vld [vmem:[#allocation6_spill] sm:$0xff] }
 0x231   :  { %v1908_v41 = vrot.slane %v4890_v11, %v5481_v5 }
 0x2c6   :  { %v1853_v50 = vpop.f32.mrb[0].mxu0 }
 0x2c7   :  { %v1854_v47 = vadd.f32 %v1853_v50, %v1180_v24  ;;  %v2851_v46 = vpop.f32.mrb[1].mxu0  ;;  %v2918_v50 = vld [vmem:[%s5030_s4 + $0x8] sm:$0xff]  }
 0x2c8   :  { %v1856_v23 = vpop.f32.mrb[2].mxu0  ;;  %v2920_v46 = vld [vmem:[%s5030_s4 + $0x18] sm:$0xff]  }
 0x2c9   :  { %v1860_v48 = vrot.slane %v1854_v47, 4  ;;  %v1857_v13 = vadd.f32 %v1856_v23, %v1180_v24  ;;  %v2852_v39 = vpop.f32.mrb[3].mxu0  ;;  %v2917_v24 = vld [vmem:[%s5030_s4] sm:$0xff]  }
 0x2ca   :  { %2874 = vmatpush3.bf16.msra.mxu0 %v2917_v24  ;;  %v5482_v23 = vld [vmem:[#allocation2_spill] sm:$0xff] }
 0x2cb   :  { %v1861_v40 = vadd.f32 %v1860_v48, %v1854_v47  ;;  %v1866_v3 = vrot.slane %v1857_v13, 4  ;;  %2875 = vmatprep.subr.bf16.mxu0 %v5478_v22  ;;  %v1932_v48 = vsub.s32 4, %v5482_v23 }
 0x2cd   :  { %v1862_v42 = vrot.slane %v1861_v40, 2  ;;  %v1867_v17 = vadd.f32 %v1866_v3, %v1857_v13 }
 0x2ce   :  { %2876 = vmatpush3.bf16.msra.mxu0 %v2918_v50 }
 0x2cf   :  { %v1863_v7 = vadd.f32 %v1862_v42, %v1861_v40  ;;  %v1868_v38 = vrot.slane %v1867_v17, 2  ;;  %2877 = vmatprep.subr.bf16.mxu0 %v5478_v22 }
 0x2d1   :  { %v1864_v25 = vrot.slane %v1863_v7, 1  ;;  %v1869_v30 = vadd.f32 %v1868_v38, %v1867_v17 }
 0x2d3   :  { %v1865_v57 = vadd.f32 %v1864_v25, %v1863_v7  ;;  %v1870_v26 = vrot.slane %v1869_v30, 1 }
 0x2d5   :  { %v1873_v53 = vmul.f32 0.125, %v1865_v57  ;;  %v1871_v15 = vadd.f32 %v1870_v26, %v1869_v30 }
 0x2d7   :  { %v1875_v34 = vsub.f32 %v1854_v47, %v1873_v53  ;;  %v1874_v62 = vmul.f32 0.125, %v1871_v15  ;;  %v2919_v47 = vld [vmem:[%s5030_s4 + $0x10] sm:$0xff]  }
 0x2d8   :  { %2878 = vmatpush3.bf16.msra.mxu0 %v2919_v47 }
 0x2d9   :  { %v1877_v56 = vmul.f32 %v1875_v34, %v1875_v34  ;;  %v1876_v45 = vsub.f32 %v1857_v13, %v1874_v62  ;;  %v1897_v44 = vmul.f32 %v1896_v21, %v1875_v34  ;;  %2879 = vmatprep.subr.bf16.mxu0 %v5478_v22  ;;  %v1933_v13 = vrot.slane %v4890_v11, %v1932_v48 }
 0x2db   :  { %v1879_v6 = vrot.slane %v1877_v56, 4  ;;  %v1878_v37 = vmul.f32 %v1876_v45, %v1876_v45  ;;  %v1898_v12 = vmul.f32 %v1896_v21, %v1876_v45 }
 0x2dc   :  { %2880 = vmatpush3.bf16.msra.mxu0 %v2920_v46 }
 0x2dd   :  { %v1880_v61 = vadd.f32 %v1879_v6, %v1877_v56  ;;  %v1885_v55 = vrot.slane %v1878_v37, 4 }
 0x2df   :  { %v1881_v10 = vrot.slane %v1880_v61, 2  ;;  %v1886_v16 = vadd.f32 %v1885_v55, %v1878_v37 }
 0x2e1   :  { %v1882_v60 = vadd.f32 %v1881_v10, %v1880_v61  ;;  %v1887_v27 = vrot.slane %v1886_v16, 2 }
 0x2e3   :  { %v1883_v8 = vrot.slane %v1882_v60, 1  ;;  %v1888_v54 = vadd.f32 %v1887_v27, %v1886_v16 }
 0x2e5   :  { %v1884_v35 = vadd.f32 %v1883_v8, %v1882_v60  ;;  %v1889_v19 = vrot.slane %v1888_v54, 1 }
 0x2e7   :  { %v1891_v20 = vmul.f32 0.125, %v1884_v35  ;;  %v1890_v36 = vadd.f32 %v1889_v19, %v1888_v54 }
 0x2e9   :  { %v1899_v18 = vadd.f32 1e-05, %v1891_v20  ;;  %v1892_v28 = vmul.f32 0.125, %v1890_v36 }
 0x2eb   :  { %2921 = vrsqrt.f32 %v1899_v18  ;;  %v1900_v49 = vadd.f32 1e-05, %v1892_v28 }
 0x2ed   :  { %2923 = vrsqrt.f32 %v1900_v49 }
 0x2f5   :  { %v2922_v29 = vpop.eup %2921 }
 0x2f6   :  { %v1903_v52 = vmul.f32 %v2922_v29, %v1897_v44 }
 0x2f7   :  { %v2924_v59 = vpop.eup %2923 }
 0x2f8   :  { %v1904_v43 = vmul.f32 %v2924_v59, %v1898_v12  ;;  %v1909_v4 = vadd.f32 %v1908_v41, %v1903_v52 }
 0x2fa   :  { %v1910_v32 = vadd.f32 %v1908_v41, %v1904_v43  ;;  %v1911_v31 = vmax.f32 %v1909_v4, 0.0  ;;  %v2062_v43 = vsub.s32 5, %v5482_v23 }
 0x2fc   :  { %v1912_v14 = vmax.f32 %v1910_v32, 0.0  ;;  %v2063_v4 = vrot.slane %v4890_v11, %v2062_v43  ;;  %v2074_v32 = vsub.s32 6, %v5482_v23 }
 0x2fe   :  { %v1913_v0 = vpack.c.bf16 %v1912_v14, %v1911_v31  ;;  %v2075_v14 = vrot.slane %v4890_v11, %v2074_v32 }
 0x300   :  { %2870 = vmatmul.mubr.bf16.vlgmr.msra.gmra.mrb[0].mxu1 %v1913_v0 }
 0x3d3   :  { %v2016_v39 = vpop.f32.mrb[0].mxu1 }
 0x3d4   :  { %v4915_v40 = vadd.f32 %v2016_v39, %v1933_v13  ;;  %v2871_v3 = vpop.f32.mrb[1].mxu1 }
 0x3d5   :  { %v2019_v42 = vpop.f32.mrb[2].mxu1 }
 0x3d6   :  { %v2024_v17 = vsel %vm2023_vm13, %v4915_v40, 0.0  ;;  %v4919_v7 = vadd.f32 %v2019_v42, %v1933_v13  ;;  %v2872_v38 = vpop.f32.mrb[3].mxu1 }
 0x3d7   :  { %v2025_v25 = vrot.slane %v2024_v17, 4 }
 0x3d8   :  { %v2031_v22 = vsel %vm2023_vm13, %v4919_v7, 0.0 }
 0x3d9   :  { %v2026_v30 = vadd.f32 %v2025_v25, %v2024_v17  ;;  %v2032_v57 = vrot.slane %v2031_v22, 4  ;;  %v2091_v17 = vsub.s32 7, %v5482_v23 }
 0x3db   :  { %v2027_v26 = vrot.slane %v2026_v30, 2  ;;  %v2033_v53 = vadd.f32 %v2032_v57, %v2031_v22  ;;  %v2092_v38 = vrot.slane %v4890_v11, %v2091_v17 }
 0x3dd   :  { %v2028_v15 = vadd.f32 %v2027_v26, %v2026_v30  ;;  %v2034_v34 = vrot.slane %v2033_v53, 2 }
 0x3df   :  { %v2029_v62 = vrot.slane %v2028_v15, 1  ;;  %v2035_v56 = vadd.f32 %v2034_v34, %v2033_v53 }
 0x3e1   :  { %v2030_v45 = vadd.f32 %v2029_v62, %v2028_v15  ;;  %v2036_v6 = vrot.slane %v2035_v56, 1 }
 0x3e3   :  { %v2038_v37 = vmul.f32 0.125, %v2030_v45  ;;  %v2037_v61 = vadd.f32 %v2036_v6, %v2035_v56 }
 0x3e5   :  { %v2040_v55 = vsub.f32 %v4915_v40, %v2038_v37  ;;  %v2039_v10 = vmul.f32 0.125, %v2037_v61 }
 0x3e7   :  { %v2042_v16 = vmul.f32 %v2040_v55, %v2040_v55  ;;  %v2041_v60 = vsub.f32 %v4919_v7, %v2039_v10  ;;  %v2064_v31 = vmul.f32 %v2063_v4, %v2040_v55 }
 0x3e9   :  { %v2044_v27 = vsel %vm2023_vm13, %v2042_v16, 0.0  ;;  %v2043_v8 = vmul.f32 %v2041_v60, %v2041_v60  ;;  %v2065_v50 = vmul.f32 %v2063_v4, %v2041_v60 }
 0x3ea   :  { %v2045_v54 = vrot.slane %v2044_v27, 4 }
 0x3eb   :  { %v2051_v35 = vsel %vm2023_vm13, %v2043_v8, 0.0 }
 0x3ec   :  { %v2046_v19 = vadd.f32 %v2045_v54, %v2044_v27  ;;  %v2052_v20 = vrot.slane %v2051_v35, 4 }
 0x3ee   :  { %v2047_v36 = vrot.slane %v2046_v19, 2  ;;  %v2053_v18 = vadd.f32 %v2052_v20, %v2051_v35 }
 0x3f0   :  { %v2048_v28 = vadd.f32 %v2047_v36, %v2046_v19  ;;  %v2054_v49 = vrot.slane %v2053_v18, 2 }
 0x3f2   :  { %v2049_v63 = vrot.slane %v2048_v28, 1  ;;  %v2055_v21 = vadd.f32 %v2054_v49, %v2053_v18 }
 0x3f4   :  { %v2050_v44 = vadd.f32 %v2049_v63, %v2048_v28  ;;  %v2056_v5 = vrot.slane %v2055_v21, 1 }
 0x3f6   :  { %v2058_v41 = vmul.f32 0.125, %v2050_v44  ;;  %v2057_v29 = vadd.f32 %v2056_v5, %v2055_v21 }
 0x3f8   :  { %v2066_v12 = vadd.f32 1e-05, %v2058_v41  ;;  %v2059_v52 = vmul.f32 0.125, %v2057_v29 }
 0x3fa   :  { %2925 = vrsqrt.f32 %v2066_v12  ;;  %v2067_v59 = vadd.f32 1e-05, %v2059_v52 }
 0x3fc   :  { %2927 = vrsqrt.f32 %v2067_v59 }
 0x404   :  { %v2926_v0 = vpop.eup %2925 }
 0x405   :  { %v2070_v24 = vmul.f32 %v2926_v0, %v2064_v31  ;;  %v25_v0 = vld [vmem:[%s5027_s5 + $0x8] sm:$0x3] }
 0x406   :  { %v2928_v47 = vpop.eup %2927 }
 0x407   :  { %v2076_v46 = vadd.f32 %v2075_v14, %v2070_v24  ;;  %v2071_v48 = vmul.f32 %v2928_v47, %v2065_v50  ;;  %v5483_v24 = vld [vmem:[#allocation3_spill] sm:$0xff] }
 0x408   :  { %v2200_v50 = vrot.slane %v25_v0, %v5483_v24 }
 0x409   :  { %v2077_v13 = vadd.f32 %v2075_v14, %v2071_v48  ;;  %v2078_v39 = vmax.f32 %v2076_v46, 0.0  ;;  %v2212_v46 = vrot.slane %v25_v0, %v5479_v33 }
 0x40b   :  { %v2079_v3 = vmax.f32 %v2077_v13, 0.0 }
 0x40d   :  { %v2080_v42 = vpack.c.bf16 %v2079_v3, %v2078_v39 }
 0x40f   :  { %2882 = vmatmul.mubr.msk.bf16.vlgmr.msra.gmra.mrb[4].mxu0 %vm2023_vm13, %v2080_v42 }
 0x4e2   :  { %v2154_v25 = vpop.f32.mrb[4].mxu0 }
 0x4e3   :  { %v2155_v22 = vadd.f32 %v2154_v25, %v2092_v38  ;;  %v2883_v30 = vpop.f32.mrb[5].mxu0  ;;  %v2377_v25 = vpop.permute.xlu1 %2376 }
 0x4e4   :  { %v2157_v57 = vpop.f32.mrb[6].mxu0 }
 0x4e5   :  { %v2161_v26 = vsel %vm1815_vm12, %v2155_v22, 0.0  ;;  %v2158_v53 = vadd.f32 %v2157_v57, %v2092_v38  ;;  %v2884_v15 = vpop.f32.mrb[7].mxu0 }
 0x4e6   :  { %v2162_v34 = vrot.slane %v2161_v26, 4 }
 0x4e7   :  { %v2168_v62 = vsel %vm1815_vm12, %v2158_v53, 0.0  ;;  %v2383_v30 = vpop.permute.xlu1 %2382 }
 0x4e8   :  { %v2163_v56 = vadd.f32 %v2162_v34, %v2161_v26  ;;  %v2169_v45 = vrot.slane %v2168_v62, 4 }
 0x4ea   :  { %v2164_v6 = vrot.slane %v2163_v56, 2  ;;  %v2170_v37 = vadd.f32 %v2169_v45, %v2168_v62 }
 0x4eb   :  { %v2389_v26 = vpop.permute.xlu1 %2388 }
 0x4ec   :  { %v2165_v61 = vadd.f32 %v2164_v6, %v2163_v56  ;;  %v2171_v55 = vrot.slane %v2170_v37, 2 }
 0x4ee   :  { %v2166_v23 = vrot.slane %v2165_v61, 1  ;;  %v2172_v10 = vadd.f32 %v2171_v55, %v2170_v37 }
 0x4ef   :  { %v2395_v15 = vpop.permute.xlu1 %2394 }
 0x4f0   :  { %v2167_v11 = vadd.f32 %v2166_v23, %v2165_v61  ;;  %v2173_v16 = vrot.slane %v2172_v10, 1 }
 0x4f2   :  { %v2175_v60 = vmul.f32 0.125, %v2167_v11  ;;  %v2174_v27 = vadd.f32 %v2173_v16, %v2172_v10 }
 0x4f3   :  { %v2401_v62 = vpop.permute.xlu1 %2400 }
 0x4f4   :  { %v2177_v8 = vsub.f32 %v2155_v22, %v2175_v60  ;;  %v2176_v54 = vmul.f32 0.125, %v2174_v27  ;;  %v2380_v22 = vpop.permute.xlu0 %2379 }
 0x4f6   :  { %v2179_v35 = vmul.f32 %v2177_v8, %v2177_v8  ;;  %v2178_v19 = vsub.f32 %v2158_v53, %v2176_v54  ;;  %v2201_v47 = vmul.f32 %v2200_v50, %v2177_v8 }
 0x4f7   :  { %v2407_v56 = vpop.permute.xlu1 %2406 }
 0x4f8   :  { %v2181_v20 = vsel %vm1815_vm12, %v2179_v35, 0.0  ;;  %v2180_v36 = vmul.f32 %v2178_v19, %v2178_v19  ;;  %v2202_v39 = vmul.f32 %v2200_v50, %v2178_v19  ;;  %v2386_v57 = vpop.permute.xlu0 %2385 }
 0x4f9   :  { %v2182_v18 = vrot.slane %v2181_v20, 4 }
 0x4fa   :  { %v2188_v28 = vsel %vm1815_vm12, %v2180_v36, 0.0  ;;  %v2645_v36 = vrot.slane %v2389_v26, %v4535_v2 }
 0x4fb   :  { %v2183_v49 = vadd.f32 %v2182_v18, %v2181_v20  ;;  %v2189_v63 = vrot.slane %v2188_v28, 4  ;;  %v2413_v6 = vpop.permute.xlu1 %2412 }
 0x4fc   :  { %v2392_v53 = vpop.permute.xlu0 %2391 }
 0x4fd   :  { %v2184_v21 = vrot.slane %v2183_v49, 2  ;;  %v2190_v44 = vadd.f32 %v2189_v63, %v2188_v28  ;;  %v2649_v18 = vrot.slane %v2392_v53, %v4538_v1  ;;  %v2654_v28 = vrot.slane %v2395_v15, %v4549_v58 }
 0x4fe   :  { %v2630_v63 = vrot.slane %v2380_v22, %v4538_v1 }
 0x4ff   :  { %v2185_v5 = vadd.f32 %v2184_v21, %v2183_v49  ;;  %v2191_v41 = vrot.slane %v2190_v44, 2  ;;  %v2419_v61 = vpop.permute.xlu1 %2418  ;;  %v2626_v49 = vrot.slane %v2377_v25, %v4535_v2 }
 0x500   :  { %v2398_v34 = vpop.permute.xlu0 %2397 }
 0x501   :  { %v2186_v29 = vrot.slane %v2185_v5, 1  ;;  %v2192_v12 = vadd.f32 %v2191_v41, %v2190_v44  ;;  %v2635_v44 = vrot.slane %v2383_v30, %v4549_v58  ;;  %v2659_v41 = vrot.slane %v2398_v34, %v4552_v51 }
 0x503   :  { %v2187_v52 = vadd.f32 %v2186_v29, %v2185_v5  ;;  %v2193_v59 = vrot.slane %v2192_v12, 1  ;;  %v2428_v23 = vpop.permute.xlu1 %2427  ;;  %v2650_v5 = vsel %vm1480_vm2, %v2649_v18, %v2645_v36  ;;  %v2664_v29 = vrot.slane %v2401_v62, %v4535_v2 }
 0x504   :  { %v2404_v33 = vpop.permute.xlu0 %2403  ;;  %v2706_v22 = vrot.slane %v2428_v23, %v4538_v1 }
 0x505   :  { %v2195_v43 = vmul.f32 0.125, %v2187_v52  ;;  %v2194_v4 = vadd.f32 %v2193_v59, %v2192_v12  ;;  %v2668_v12 = vrot.slane %v2404_v33, %v4538_v1  ;;  %v2655_v52 = vsel %vm1487_vm3, %v2654_v28, %v2650_v5 }
 0x506   :  { %v2673_v59 = vrot.slane %v2407_v56, %v4549_v58  ;;  %v2660_v24 = vsel %vm1494_vm4, %v2659_v41, %v2655_v52 }
 0x507   :  { %v2203_v32 = vadd.f32 1e-05, %v2195_v43  ;;  %v2196_v31 = vmul.f32 0.125, %v2194_v4  ;;  %v2431_v11 = vpop.permute.xlu1 %2430  ;;  %v2631_v4 = vsel %vm1480_vm2, %v2630_v63, %v2626_v49  ;;  %v2669_v50 = vsel %vm1480_vm2, %v2668_v12, %v2664_v29 }
 0x508   :  { %v2410_v45 = vpop.permute.xlu0 %2409  ;;  %v2711_v26 = vrot.slane %v2431_v11, %v4549_v58 }
 0x509   :  { %2929 = vrsqrt.f32 %v2203_v32  ;;  %v2204_v14 = vadd.f32 1e-05, %v2196_v31  ;;  %v2640_v32 = vrot.slane %v2386_v57, %v4552_v51  ;;  %v2636_v31 = vsel %vm1487_vm3, %v2635_v44, %v2631_v4 }
 0x50b   :  { %2931 = vrsqrt.f32 %v2204_v14  ;;  %v2440_v60 = vpop.permute.xlu1 %2439  ;;  %v2683_v14 = vrot.slane %v2413_v6, %v4535_v2 }
 0x50c   :  { %v2416_v37 = vpop.permute.xlu0 %2415  ;;  %v2725_v53 = vrot.slane %v2440_v60, %v4538_v1 }
 0x50d   :  { %v2687_v0 = vrot.slane %v2416_v37, %v4538_v1 }
 0x50f   :  { %v2443_v8 = vpop.permute.xlu1 %2442 }
 0x510   :  { %v2425_v55 = vpop.permute.xlu0 %2424  ;;  %v2730_v62 = vrot.slane %v2443_v8, %v4549_v58 }
 0x511   :  { %v2702_v57 = vrot.slane %v2425_v55, %v4535_v2 }
 0x513   :  { %v2930_v48 = vpop.eup %2929  ;;  %v2452_v35 = vpop.permute.xlu1 %2451  ;;  %v2707_v23 = vsel %vm1480_vm2, %v2706_v22, %v2702_v57 }
 0x514   :  { %v2207_v13 = vmul.f32 %v2930_v48, %v2201_v47  ;;  %v2422_v10 = vpop.permute.xlu0 %2421  ;;  %v2678_v47 = vrot.slane %v2410_v45, %v4552_v51  ;;  %v2744_v33 = vrot.slane %v2452_v35, %v4538_v1  ;;  %v2712_v60 = vsel %vm1487_vm3, %v2711_v26, %v2707_v23 }
 0x515   :  { %v2932_v3 = vpop.eup %2931  ;;  %v2697_v30 = vrot.slane %v2422_v10, %v4552_v51 }
 0x516   :  { %v2208_v42 = vmul.f32 %v2932_v3, %v2202_v39  ;;  %v2213_v17 = vadd.f32 %v2212_v46, %v2207_v13  ;;  %v2674_v13 = vsel %vm1487_vm3, %v2673_v59, %v2669_v50  ;;  %v2641_v39 = vsel %vm1494_vm4, %v2640_v32, %v2636_v31 }
 0x517   :  { %v4945_v20 = vpop.permute.xlu1 %2454  ;;  %v2782_v3 = vsel %vm1781_vm5, %v2660_v24, %v2641_v39 }
 0x518   :  { %2793 = vrot.lane.b32.xlu1 %v2213_v17, %s2937_s10  ;;  %v2214_v38 = vadd.f32 %v2212_v46, %v2208_v42  ;;  %v2437_v16 = vpop.permute.xlu0 %2436  ;;  %v2692_v46 = vrot.slane %v2419_v61, %v4549_v58  ;;  %v2688_v42 = vsel %vm1480_vm2, %v2687_v0, %v2683_v14  ;;  %v2749_v61 = vrot.slane %v4945_v20, %v4549_v58 }
 0x519   :  { %v2721_v6 = vrot.slane %v2437_v16, %v4535_v2 }
 0x51a   :  { %2795 = vrot.lane.b32.xlu0 %v2214_v38, %s2937_s10  ;;  %v2679_v38 = vsel %vm1494_vm4, %v2678_v47, %v2674_v13  ;;  %v2693_v25 = vsel %vm1487_vm3, %v2692_v46, %v2688_v42 }
 0x51b   :  { %v2464_v43 = vpop.permute.xlu1 %2463  ;;  %v2698_v10 = vsel %vm1494_vm4, %v2697_v30, %v2693_v25  ;;  %v2726_v16 = vsel %vm1480_vm2, %v2725_v53, %v2721_v6 }
 0x51c   :  { %v2434_v27 = vpop.permute.xlu0 %2433  ;;  %v2763_v15 = vrot.slane %v2464_v43, %v4538_v1  ;;  %v2731_v35 = vsel %vm1487_vm3, %v2730_v62, %v2726_v16 }
 0x51d   :  { %v2716_v34 = vrot.slane %v2434_v27, %v4552_v51 }
 0x51f   :  { %v2467_v17 = vpop.permute.xlu1 %2466 }
 0x520   :  { %v2449_v54 = vpop.permute.xlu0 %2448  ;;  %v2768_v56 = vrot.slane %v2467_v17, %v4549_v58  ;;  %v2717_v58 = vsel %vm1494_vm4, %v2716_v34, %v2712_v60 }
 0x521   :  { %v2740_v11 = vrot.slane %v2449_v54, %v4535_v2 }
 0x524   :  { %v4943_v19 = vpop.permute.xlu0 %2445 }
 0x525   :  { %v2735_v37 = vrot.slane %v4943_v19, %v4552_v51  ;;  %v2745_v19 = vsel %vm1480_vm2, %v2744_v33, %v2740_v11 }
 0x526   :  { %v2750_v36 = vsel %vm1487_vm3, %v2749_v61, %v2745_v19 }
 0x527   :  { %v2736_v54 = vsel %vm1494_vm4, %v2735_v37, %v2731_v35 }
 0x528   :  { %v2461_v21 = vpop.permute.xlu0 %2460 }
 0x529   :  { %v2759_v55 = vrot.slane %v2461_v21, %v4535_v2  ;;  %v2783_v2 = vsel %vm1783_vm6, %v2679_v38, %v2782_v3 }
 0x52a   :  { %v2784_v18 = vsel %vm1785_vm7, %v2698_v10, %v2783_v2 }
 0x52b   :  { %v2764_v27 = vsel %vm1480_vm2, %v2763_v15, %v2759_v55 }
 0x52c   :  { %v2458_v48 = vpop.permute.xlu0 %2457  ;;  %v2769_v20 = vsel %vm1487_vm3, %v2768_v56, %v2764_v27 }
 0x52d   :  { %v2754_v1 = vrot.slane %v2458_v48, %v4552_v51 }
 0x52f   :  { %v2755_v28 = vsel %vm1494_vm4, %v2754_v1, %v2750_v36 }
 0x530   :  { %v2470_v45 = vpop.permute.xlu0 %2469 }
 0x531   :  { %v2773_v8 = vrot.slane %v2470_v45, %v4552_v51  ;;  %v2785_v51 = vsel %vm1787_vm8, %v2717_v58, %v2784_v18 }
 0x532   :  { %v2786_v63 = vsel %vm1789_vm9, %v2736_v54, %v2785_v51 }
 0x533   :  { %v2774_v49 = vsel %vm1494_vm4, %v2773_v8, %v2769_v20  ;;  %v2787_v5 = vsel %vm1791_vm10, %v2755_v28, %v2786_v63 }
 0x534   :  { %v2788_v29 = vsel %vm1793_vm11, %v2774_v49, %v2787_v5 }
 0x58a   :  { %v2794_v21 = vpop.permute.xlu1 %2793 }
 0x58b   :  { %v2799_v44 = vsel %vm1815_vm12, %v4854_v9, %v2794_v21 }
 0x58c   :  { %v2801_v41 = vsel %vm2023_vm13, %v2799_v44, %v4915_v40  ;;  %v2796_v12 = vpop.permute.xlu0 %2795 }
 0x58d   :  { %v2804_v52 = vsel %vm2803_vm14, %v2801_v41, 0.0  ;;  %v2800_v59 = vsel %vm1815_vm12, %v2788_v29, %v2796_v12 }
 0x58e   :  { %2806 = vst [vmem:[%s5031_s6] sm:$0xff] %v2804_v52  ;;  %v2802_v43 = vsel %vm2023_vm13, %v2800_v59, %v4919_v7 }
 0x58f   :  { %v2805_v4 = vsel %vm2803_vm14, %v2802_v43, 0.0 }
 0x590   :  { %2807 = vst [vmem:[%s5031_s6 + $0x8] sm:$0xff] %v2805_v4 }

</bundles_post_ra>
